<compile_context>
chip_gen: v7x
topology: tpu7x:2x2x1
jax: 0.10.0
libtpu: 0.0.40
codegen_flags: <defaults>
</compile_context>

<pallas_src>
import jax
import jax.numpy as jnp
from jax.experimental import pallas as pl
from jax.experimental.pallas import tpu as pltpu


# ----------------------------- encoder kernel -----------------------------

def encoder_kernel(x_ref, w1_ref, b1_ref, w2_ref, b2_ref, w3_ref, b3_ref,
                   feat_ref, acc_ref):
    kn = pl.program_id(1)
    bt, nt, _ = x_ref.shape
    m = bt * nt

    x = x_ref[...].reshape(m, 3)                       # (m, 3) f32

    # layer 1 (3 -> 64): K=3 is MXU-hostile, do it as 3 VPU broadcast-multiply-adds.
    w1 = w1_ref[...]                                   # (3, 64) f32
    h = (x[:, 0:1] * w1[0:1, :]
         + x[:, 1:2] * w1[1:2, :]
         + x[:, 2:3] * w1[2:3, :]
         + b1_ref[...])
    h = jnp.maximum(h, 0.0)                            # (m, 64) f32

    # layer 2 (64 -> 128): bf16 MXU, f32 accumulate.
    h = jnp.dot(h.astype(jnp.bfloat16), w2_ref[...],
                preferred_element_type=jnp.float32) + b2_ref[...]
    h = jnp.maximum(h, 0.0)                            # (m, 128) f32

    # layer 3 (128 -> 1024): bf16 MXU, f32 accumulate, no ReLU (matches bn3).
    h = jnp.dot(h.astype(jnp.bfloat16), w3_ref[...],
                preferred_element_type=jnp.float32) + b3_ref[...]   # (m, 1024) f32

    # per-cloud max over this tile of points (static slices -> sublane reductions)
    tile_max = jnp.concatenate(
        [jnp.max(h[i * nt:(i + 1) * nt, :], axis=0, keepdims=True)
         for i in range(bt)], axis=0)                  # (bt, 1024)

    @pl.when(kn == 0)
    def _init():
        acc_ref[...] = tile_max

    @pl.when(kn != 0)
    def _update():
        acc_ref[...] = jnp.maximum(acc_ref[...], tile_max)

    @pl.when(kn == pl.num_programs(1) - 1)
    def _emit():
        feat_ref[0] = acc_ref[...]


# --------------------------- classification head ---------------------------

def head_kernel(feat_ref, hw1_ref, hb1_ref, hw2_ref, hb2_ref, hw3_ref, hb3_ref,
                out_ref):
    # Dropout(0.3) is identity in eval mode; BN folded into weights/biases.
    f = feat_ref[...].astype(jnp.bfloat16)             # (B, 1024)
    g = jnp.maximum(
        jnp.dot(f, hw1_ref[...], preferred_element_type=jnp.float32) + hb1_ref[...], 0.0)
    g = jnp.maximum(
        jnp.dot(g.astype(jnp.bfloat16), hw2_ref[...],
                preferred_element_type=jnp.float32) + hb2_ref[...], 0.0)
    out_ref[...] = jnp.dot(g.astype(jnp.bfloat16), hw3_ref[...],
                           preferred_element_type=jnp.float32) + hb3_ref[...]


# --------------------------------- wrapper ---------------------------------

def pointnet_not_forward(pts, params, *, bt=None, nt=None):
    """pts: [B, N, C>=3] -> logits [B, cls_dim]"""
    B, N, _ = pts.shape
    x = pts[:, :, :3].astype(jnp.float32)              # channels-last [B, N, 3]
    (w1, b1, w2, b2, w3, b3, hw1, hb1, hw2, hb2, hw3, hb3) = params
    cls_dim = hw3.shape[1]

    # bf16 weights for MXU dots (w1 stays f32: it is used on the VPU)
    w2b = w2.astype(jnp.bfloat16)
    w3b = w3.astype(jnp.bfloat16)
    hw1b = hw1.astype(jnp.bfloat16)
    hw2b = hw2.astype(jnp.bfloat16)
    # pad the head output to a lane-dense multiple of 128
    pad = (-cls_dim) % 128
    hw3p = jnp.pad(hw3, ((0, 0), (0, pad))).astype(jnp.bfloat16)
    hb3p = jnp.pad(hb3, ((0, 0), (0, pad)))
    cls_pad = cls_dim + pad

    # ---- tile selection ----
    if nt is None:
        nt = next((t for t in (512, 256, 128) if N % t == 0), N)
    if bt is None:
        candidates = [b for b in (8, 4, 2, 1) if B % b == 0]
        # prefer >=2 parallel grid steps (megacore) while keeping bt*nt >= 256 (MXU fill)
        pref = [b for b in candidates if (B // b) >= 2 and b * nt >= 256]
        bt = pref[0] if pref else candidates[0]
    assert B % bt == 0 and N % nt == 0

    enc_flops = 2 * B * N * (3 * 64 + 64 * 128 + 128 * 1024)
    enc_bytes = (B * N * 3 * 4                                    # x
                 + (3 * 64 * 4 + 64 * 4 + 64 * 128 * 2 + 128 * 4
                    + 128 * 1024 * 2 + 1024 * 4)                  # weights/biases
                 + B * 1024 * 4)                                  # feat out

    def wspec(arr):
        nd = arr.ndim
        return pl.BlockSpec(arr.shape, lambda b, n, _nd=nd: (0,) * _nd)

    feat = pl.pallas_call(
        encoder_kernel,
        out_shape=jax.ShapeDtypeStruct((B // bt, bt, 1024), jnp.float32),
        grid=(B // bt, N // nt),
        in_specs=[pl.BlockSpec((bt, nt, 3), lambda b, n: (b, n, 0))]
                 + [wspec(a) for a in (w1, b1, w2b, b2, w3b, b3)],
        out_specs=pl.BlockSpec((1, bt, 1024), lambda b, n: (b, 0, 0)),
        scratch_shapes=[pltpu.VMEM((bt, 1024), jnp.float32)],
        compiler_params=pltpu.CompilerParams(
            dimension_semantics=("parallel", "arbitrary")),
        cost_estimate=pl.CostEstimate(flops=enc_flops, transcendentals=0,
                                      bytes_accessed=enc_bytes),
    )(x, w1, b1, w2b, b2, w3b, b3)
    feat = feat.reshape(B, 1024)

    logits_padded = pl.pallas_call(
        head_kernel,
        out_shape=jax.ShapeDtypeStruct((B, cls_pad), jnp.float32),
    )(feat, hw1b, hb1, hw2b, hb2, hw3p, hb3p)

    return logits_padded[:, :cls_dim]


# ------------------- deterministic parameter construction -------------------

def _linear(key, fan_in, fan_out):
    kw, kb = jax.random.split(key)
    w = jax.random.normal(kw, (fan_in, fan_out), jnp.float32) / jnp.sqrt(float(fan_in))
    b = 0.01 * jax.random.normal(kb, (1, fan_out), jnp.float32)
    return w, b


def _bn(key, c):
    k1, k2, k3, k4 = jax.random.split(key, 4)
    gamma = 1.0 + 0.1 * jax.random.normal(k1, (1, c), jnp.float32)
    beta = 0.1 * jax.random.normal(k2, (1, c), jnp.float32)
    mean = 0.1 * jax.random.normal(k3, (1, c), jnp.float32)
    var = 1.0 + 0.2 * jax.random.uniform(k4, (1, c), jnp.float32)
    return gamma, beta, mean, var


def _fold_bn(w, b, bn_params, eps=1e-5):
    gamma, beta, mean, var = bn_params
    s = gamma / jnp.sqrt(var + eps)
    return w * s, (b - mean) * s + beta


def init_params(key, cls_dim=40):
    keys = jax.random.split(key, 12)
    w1, b1 = _fold_bn(*_linear(keys[0], 3, 64),     _bn(keys[1], 64))
    w2, b2 = _fold_bn(*_linear(keys[2], 64, 128),   _bn(keys[3], 128))
    w3, b3 = _fold_bn(*_linear(keys[4], 128, 1024), _bn(keys[5], 1024))
    hw1, hb1 = _fold_bn(*_linear(keys[6], 1024, 512), _bn(keys[7], 512))
    hw2, hb2 = _fold_bn(*_linear(keys[8], 512, 256),  _bn(keys[9], 256))
    hw3, hb3 = _linear(keys[10], 256, cls_dim)
    return (w1, b1, w2, b2, w3, b3, hw1, hb1, hw2, hb2, hw3, hb3)


def reference_forward(pts, params):
    """Plain-JAX reference mirroring the kernel's bf16-weight / f32-accumulate numerics."""
    x = pts[:, :, :3].astype(jnp.float32)
    w1, b1, w2, b2, w3, b3, hw1, hb1, hw2, hb2, hw3, hb3 = params
    bf = jnp.bfloat16
    h = jax.nn.relu(jnp.einsum('bnc,cd->bnd', x, w1) + b1)
    h = jax.nn.relu(jnp.einsum('bnc,cd->bnd', h.astype(bf), w2.astype(bf),
                               preferred_element_type=jnp.float32) + b2)
    h = jnp.einsum('bnc,cd->bnd', h.astype(bf), w3.astype(bf),
                   preferred_element_type=jnp.float32) + b3
    feat = jnp.max(h, axis=1)                          # (B, 1024)
    g = jax.nn.relu(jnp.dot(feat.astype(bf), hw1.astype(bf),
                            preferred_element_type=jnp.float32) + hb1)
    g = jax.nn.relu(jnp.dot(g.astype(bf), hw2.astype(bf),
                            preferred_element_type=jnp.float32) + hb2)
    return jnp.dot(g.astype(bf), hw3.astype(bf),
                   preferred_element_type=jnp.float32) + hb3


# TODO(synk): training-mode BatchNorm (batch statistics) and stochastic Dropout are not
# reproduced; eval-mode semantics are implemented (BN folded, Dropout = identity).

if __name__ == "__main__":
    key = jax.random.PRNGKey(0)
    k_pts, k_par = jax.random.split(key)

    B, N, C_in, CLS = 4, 256, 6, 40
    pts = jax.random.normal(k_pts, (B, N, C_in), jnp.float32)   # extra channels exercise [:, :, :3]
    params = init_params(k_par, cls_dim=CLS)

    logits = pointnet_not_forward(pts, params)
    logits = jax.block_until_ready(logits)

    ref = reference_forward(pts, params)
    assert logits.shape == (B, CLS), logits.shape
    assert jnp.allclose(logits, ref, rtol=5e-3, atol=5e-3), \
        f"max abs diff = {float(jnp.max(jnp.abs(logits - ref)))}"

    print("KERNEL_OK")
</pallas_src>

<mosaic_0001>
module attributes {stable_mosaic.version = 11 : i64} {
  func.func @encoder_kernel(%arg0: i32, %arg1: i32, %arg2: memref<2x256x3xf32, #tpu.memory_space<vmem>>, %arg3: memref<3x64xf32, #tpu.memory_space<vmem>>, %arg4: memref<1x64xf32, #tpu.memory_space<vmem>>, %arg5: memref<64x128xbf16, #tpu.memory_space<vmem>>, %arg6: memref<1x128xf32, #tpu.memory_space<vmem>>, %arg7: memref<128x1024xbf16, #tpu.memory_space<vmem>>, %arg8: memref<1x1024xf32, #tpu.memory_space<vmem>>, %arg9: memref<1x2x1024xf32, #tpu.memory_space<vmem>>, %arg10: memref<2x1024xf32, #tpu.memory_space<vmem>>) attributes {dimension_semantics = [#tpu.dimension_semantics<parallel>, #tpu.dimension_semantics<arbitrary>], iteration_bounds = array<i64: 2, 1>, scalar_prefetch = 0 : i64, scratch_operands = 1 : i64, tpu.core_type = #tpu.core_type<tc>, window_params = [{transform_indices = @transform_0, window_bounds = array<i64: 2, 256, 3>}, {pipeline_mode = #tpu.pipeline_mode<synchronous>, transform_indices = @transform_1, window_bounds = array<i64: 3, 64>}, {pipeline_mode = #tpu.pipeline_mode<synchronous>, transform_indices = @transform_2, window_bounds = array<i64: 1, 64>}, {pipeline_mode = #tpu.pipeline_mode<synchronous>, transform_indices = @transform_3, window_bounds = array<i64: 64, 128>}, {pipeline_mode = #tpu.pipeline_mode<synchronous>, transform_indices = @transform_4, window_bounds = array<i64: 1, 128>}, {pipeline_mode = #tpu.pipeline_mode<synchronous>, transform_indices = @transform_5, window_bounds = array<i64: 128, 1024>}, {pipeline_mode = #tpu.pipeline_mode<synchronous>, transform_indices = @transform_6, window_bounds = array<i64: 1, 1024>}, {transform_indices = @transform_7, window_bounds = array<i64: 1, 2, 1024>}]} {
    %c0 = arith.constant 0 : index
    %c0_0 = arith.constant 0 : index
    %c0_1 = arith.constant 0 : index
    %0 = vector.load %arg2[%c0, %c0_0, %c0_1] : memref<2x256x3xf32, #tpu.memory_space<vmem>>, vector<2x256x3xf32>
    %1 = vector.shape_cast %0 : vector<2x256x3xf32> to vector<512x3xf32>
    %c0_2 = arith.constant 0 : index
    %c0_3 = arith.constant 0 : index
    %2 = vector.load %arg3[%c0_2, %c0_3] : memref<3x64xf32, #tpu.memory_space<vmem>>, vector<3x64xf32>
    %3 = vector.extract_strided_slice %1 {offsets = [0, 0], sizes = [512, 1], strides = [1, 1]} : vector<512x3xf32> to vector<512x1xf32>
    %4 = vector.extract_strided_slice %2 {offsets = [0, 0], sizes = [1, 64], strides = [1, 1]} : vector<3x64xf32> to vector<1x64xf32>
    %5 = vector.broadcast %3 : vector<512x1xf32> to vector<512x64xf32>
    %6 = vector.broadcast %4 : vector<1x64xf32> to vector<512x64xf32>
    %7 = arith.mulf %5, %6 : vector<512x64xf32>
    %8 = vector.extract_strided_slice %1 {offsets = [0, 1], sizes = [512, 1], strides = [1, 1]} : vector<512x3xf32> to vector<512x1xf32>
    %9 = vector.extract_strided_slice %2 {offsets = [1, 0], sizes = [1, 64], strides = [1, 1]} : vector<3x64xf32> to vector<1x64xf32>
    %10 = vector.broadcast %8 : vector<512x1xf32> to vector<512x64xf32>
    %11 = vector.broadcast %9 : vector<1x64xf32> to vector<512x64xf32>
    %12 = arith.mulf %10, %11 : vector<512x64xf32>
    %13 = arith.addf %7, %12 : vector<512x64xf32>
    %14 = vector.extract_strided_slice %1 {offsets = [0, 2], sizes = [512, 1], strides = [1, 1]} : vector<512x3xf32> to vector<512x1xf32>
    %15 = vector.extract_strided_slice %2 {offsets = [2, 0], sizes = [1, 64], strides = [1, 1]} : vector<3x64xf32> to vector<1x64xf32>
    %16 = vector.broadcast %14 : vector<512x1xf32> to vector<512x64xf32>
    %17 = vector.broadcast %15 : vector<1x64xf32> to vector<512x64xf32>
    %18 = arith.mulf %16, %17 : vector<512x64xf32>
    %19 = arith.addf %13, %18 : vector<512x64xf32>
    %c0_4 = arith.constant 0 : index
    %c0_5 = arith.constant 0 : index
    %20 = vector.load %arg4[%c0_4, %c0_5] : memref<1x64xf32, #tpu.memory_space<vmem>>, vector<1x64xf32>
    %21 = vector.broadcast %20 : vector<1x64xf32> to vector<512x64xf32>
    %22 = arith.addf %19, %21 : vector<512x64xf32>
    %cst = arith.constant 0.000000e+00 : f32
    %23 = vector.broadcast %cst : f32 to vector<512x64xf32>
    %24 = arith.maximumf %22, %23 : vector<512x64xf32>
    %25 = arith.truncf %24 : vector<512x64xf32> to vector<512x64xbf16>
    %c0_6 = arith.constant 0 : index
    %c0_7 = arith.constant 0 : index
    %26 = vector.load %arg5[%c0_6, %c0_7] : memref<64x128xbf16, #tpu.memory_space<vmem>>, vector<64x128xbf16>
    %cst_8 = arith.constant dense<0.000000e+00> : vector<512x128xf32>
    %27 = tpu.matmul %25, %26, %cst_8 {dimension_numbers = #tpu.dot_dimension_numbers<[1], [0], [0], [1], [0, 0, 1, 1], [], []>} : vector<512x64xbf16>, vector<64x128xbf16>, vector<512x128xf32> -> vector<512x128xf32>
    %c0_9 = arith.constant 0 : index
    %c0_10 = arith.constant 0 : index
    %28 = vector.load %arg6[%c0_9, %c0_10] : memref<1x128xf32, #tpu.memory_space<vmem>>, vector<1x128xf32>
    %29 = vector.broadcast %28 : vector<1x128xf32> to vector<512x128xf32>
    %30 = arith.addf %27, %29 : vector<512x128xf32>
    %cst_11 = arith.constant 0.000000e+00 : f32
    %31 = vector.broadcast %cst_11 : f32 to vector<512x128xf32>
    %32 = arith.maximumf %30, %31 : vector<512x128xf32>
    %33 = arith.truncf %32 : vector<512x128xf32> to vector<512x128xbf16>
    %c0_12 = arith.constant 0 : index
    %c0_13 = arith.constant 0 : index
    %34 = vector.load %arg7[%c0_12, %c0_13] : memref<128x1024xbf16, #tpu.memory_space<vmem>>, vector<128x1024xbf16>
    %cst_14 = arith.constant dense<0.000000e+00> : vector<512x1024xf32>
    %35 = tpu.matmul %33, %34, %cst_14 {dimension_numbers = #tpu.dot_dimension_numbers<[1], [0], [0], [1], [0, 0, 1, 1], [], []>} : vector<512x128xbf16>, vector<128x1024xbf16>, vector<512x1024xf32> -> vector<512x1024xf32>
    %c0_15 = arith.constant 0 : index
    %c0_16 = arith.constant 0 : index
    %36 = vector.load %arg8[%c0_15, %c0_16] : memref<1x1024xf32, #tpu.memory_space<vmem>>, vector<1x1024xf32>
    %37 = vector.broadcast %36 : vector<1x1024xf32> to vector<512x1024xf32>
    %38 = arith.addf %35, %37 : vector<512x1024xf32>
    %39 = vector.extract_strided_slice %38 {offsets = [0, 0], sizes = [256, 1024], strides = [1, 1]} : vector<512x1024xf32> to vector<256x1024xf32>
    %cst_17 = arith.constant dense<0xFF800000> : vector<1024xf32>
    %40 = vector.multi_reduction <maximumf>, %39, %cst_17 [0] : vector<256x1024xf32> to vector<1024xf32>
    %41 = vector.shape_cast %40 : vector<1024xf32> to vector<1x1024xf32>
    %42 = vector.extract_strided_slice %38 {offsets = [256, 0], sizes = [256, 1024], strides = [1, 1]} : vector<512x1024xf32> to vector<256x1024xf32>
    %cst_18 = arith.constant dense<0xFF800000> : vector<1024xf32>
    %43 = vector.multi_reduction <maximumf>, %42, %cst_18 [0] : vector<256x1024xf32> to vector<1024xf32>
    %44 = vector.shape_cast %43 : vector<1024xf32> to vector<1x1024xf32>
    %45 = tpu.concatenate %41, %44 in 0 : vector<1x1024xf32>, vector<1x1024xf32> -> vector<2x1024xf32>
    %c0_i32 = arith.constant 0 : i32
    %46 = arith.cmpi eq, %arg1, %c0_i32 : i32
    %47 = arith.extui %46 : i1 to i32
    %c0_i32_19 = arith.constant 0 : i32
    %48 = arith.cmpi ne, %47, %c0_i32_19 : i32
    scf.if %48 {
      %c0_24 = arith.constant 0 : index
      %c0_25 = arith.constant 0 : index
      %55 = vector.load %arg10[%c0_24, %c0_25] : memref<2x1024xf32, #tpu.memory_space<vmem>>, vector<2x1024xf32>
      tpu.vector_store %arg10[%c0_24, %c0_25], %45 {strides = array<i32>} : memref<2x1024xf32, #tpu.memory_space<vmem>>, vector<2x1024xf32>,
    } else {
    }
    %c0_i32_20 = arith.constant 0 : i32
    %49 = arith.cmpi ne, %arg1, %c0_i32_20 : i32
    %50 = arith.extui %49 : i1 to i32
    %c0_i32_21 = arith.constant 0 : i32
    %51 = arith.cmpi ne, %50, %c0_i32_21 : i32
    scf.if %51 {
      %c0_24 = arith.constant 0 : index
      %c0_25 = arith.constant 0 : index
      %55 = vector.load %arg10[%c0_24, %c0_25] : memref<2x1024xf32, #tpu.memory_space<vmem>>, vector<2x1024xf32>
      %56 = arith.maximumf %55, %45 : vector<2x1024xf32>
      %c0_26 = arith.constant 0 : index
      %c0_27 = arith.constant 0 : index
      %57 = vector.load %arg10[%c0_26, %c0_27] : memref<2x1024xf32, #tpu.memory_space<vmem>>, vector<2x1024xf32>
      tpu.vector_store %arg10[%c0_26, %c0_27], %56 {strides = array<i32>} : memref<2x1024xf32, #tpu.memory_space<vmem>>, vector<2x1024xf32>,
    } else {
    }
    %c0_i32_22 = arith.constant 0 : i32
    %52 = arith.cmpi eq, %arg1, %c0_i32_22 : i32
    %53 = arith.extui %52 : i1 to i32
    %c0_i32_23 = arith.constant 0 : i32
    %54 = arith.cmpi ne, %53, %c0_i32_23 : i32
    scf.if %54 {
      %c0_24 = arith.constant 0 : index
      %c0_25 = arith.constant 0 : index
      %55 = vector.load %arg10[%c0_24, %c0_25] : memref<2x1024xf32, #tpu.memory_space<vmem>>, vector<2x1024xf32>
      %c0_26 = arith.constant 0 : index
      %c0_27 = arith.constant 0 : index
      %c0_28 = arith.constant 0 : index
      %56 = vector.load %arg9[%c0_26, %c0_27, %c0_28] : memref<1x2x1024xf32, #tpu.memory_space<vmem>>, vector<1x2x1024xf32>
      %57 = vector.shape_cast %56 : vector<1x2x1024xf32> to vector<2x1024xf32>
      %58 = vector.shape_cast %55 : vector<2x1024xf32> to vector<1x2x1024xf32>
      tpu.vector_store %arg9[%c0_26, %c0_27, %c0_28], %58 {strides = array<i32>} : memref<1x2x1024xf32, #tpu.memory_space<vmem>>, vector<1x2x1024xf32>,
    } else {
    }
    return
  }
  func.func @transform_0(%arg0: i32, %arg1: i32) -> (i32, i32, i32) {
    %c0_i32 = arith.constant 0 : i32
    %c0_i32_0 = arith.constant 0 : i32
    return %arg0, %arg1, %c0_i32 : i32, i32, i32
  }
  func.func @transform_1(%arg0: i32, %arg1: i32) -> (i32, i32) {
    %c0_i32 = arith.constant 0 : i32
    %c0_i32_0 = arith.constant 0 : i32
    %c0_i32_1 = arith.constant 0 : i32
    return %c0_i32, %c0_i32_0 : i32, i32
  }
  func.func @transform_2(%arg0: i32, %arg1: i32) -> (i32, i32) {
    %c0_i32 = arith.constant 0 : i32
    %c0_i32_0 = arith.constant 0 : i32
    %c0_i32_1 = arith.constant 0 : i32
    return %c0_i32, %c0_i32_0 : i32, i32
  }
  func.func @transform_3(%arg0: i32, %arg1: i32) -> (i32, i32) {
    %c0_i32 = arith.constant 0 : i32
    %c0_i32_0 = arith.constant 0 : i32
    %c0_i32_1 = arith.constant 0 : i32
    return %c0_i32, %c0_i32_0 : i32, i32
  }
  func.func @transform_4(%arg0: i32, %arg1: i32) -> (i32, i32) {
    %c0_i32 = arith.constant 0 : i32
    %c0_i32_0 = arith.constant 0 : i32
    %c0_i32_1 = arith.constant 0 : i32
    return %c0_i32, %c0_i32_0 : i32, i32
  }
  func.func @transform_5(%arg0: i32, %arg1: i32) -> (i32, i32) {
    %c0_i32 = arith.constant 0 : i32
    %c0_i32_0 = arith.constant 0 : i32
    %c0_i32_1 = arith.constant 0 : i32
    return %c0_i32, %c0_i32_0 : i32, i32
  }
  func.func @transform_6(%arg0: i32, %arg1: i32) -> (i32, i32) {
    %c0_i32 = arith.constant 0 : i32
    %c0_i32_0 = arith.constant 0 : i32
    %c0_i32_1 = arith.constant 0 : i32
    return %c0_i32, %c0_i32_0 : i32, i32
  }
  func.func @transform_7(%arg0: i32, %arg1: i32) -> (i32, i32, i32) {
    %c0_i32 = arith.constant 0 : i32
    %c0_i32_0 = arith.constant 0 : i32
    %c0_i32_1 = arith.constant 0 : i32
    return %arg0, %c0_i32, %c0_i32_0 : i32, i32, i32
  }
}

</mosaic_0001>

<bundles_post_ra>
// kernel: tpu_custom_call.1
= control target key start
LH: loop header
LB: loop body
LE: loop exit
PB: predicated region body
PF: predicated region fallthrough
CT: control target
= control target key end

     0   :  { %12 = vsyncpa [#allocation4], 0  ;;  %s7641_s0 = inlined_call_operand.vmem [shape: f32[4,256,3], index: 0, kind: input, shape index: {}]   ;;  %s7642_s1 = inlined_call_operand.vmem [shape: f32[3,64], index: 1, kind: input, shape index: {}]   ;;  %s7643_s2 = inlined_call_operand.vmem [shape: f32[1,64], index: 2, kind: input, shape index: {}]   ;;  %s7644_s3 = inlined_call_operand.vmem [shape: bf16[64,128], index: 3, kind: input, shape index: {}]   ;;  %s7645_s4 = inlined_call_operand.vmem [shape: f32[1,128], index: 4, kind: input, shape index: {}]   ;;  %s7646_s5 = inlined_call_operand.vmem [shape: bf16[128,1024], index: 5, kind: input, shape index: {}]   ;;  %s7647_s6 = inlined_call_operand.vmem [shape: f32[1,1024], index: 6, kind: input, shape index: {}]   ;;  %s7648_s7 = inlined_call_operand.hbm [shape: f32[2,2,1024], index: 7, kind: output, shape index: {}]  }
   0x1   :  { %14 = vsyncpa [#allocation4 + $0x1], 0  ;;  %s5385_s24 = smov 0   ;;  %s5387_s25 = smov 0  }
   0x2   :  { %s5389_s26 = smov 0   ;;  %s5391_s27 = smov 0  }
   0x3   :  { %s5393_s28 = smov 0   ;;  %s5395_s29 = smov 0  }
   0x4 LB: > { %s4866_s30 = sadd.s32 4294967295, %s5338_s29   ;;  %s4867_s8 = sadd.s32 4294967294, %s5338_s29   ;;  %s5338_s29 = sphi %s5395_s29, %s20_s29   ;;  %s5334_s28 = sphi %s5393_s28, %s7699_s28   ;;  %s5330_s27 = sphi %s5391_s27, %s7698_s27   ;;  %s5326_s26 = sphi %s5389_s26, %s7697_s26   ;;  %s5322_s25 = sphi %s5387_s25, %s7696_s25   ;;  %s5318_s24 = sphi %s5385_s24, %s7695_s24  }
   0x5   : > { %s32_s9 = sadd.s32 1, %s5334_s28  ;;  %s193_s10 = sadd.s32 1, %s5326_s26 }
   0x6   : > { %p34_p0 = scmp.ge.s32.totalorder %s32_s9, 2  ;;  %p203_p1 = scmp.ne.s32.totalorder %s5326_s26, %s5322_s25 }
   0x7   : > { %p204_p2 = scmp.eq.s32.totalorder %s4866_s30, 1  ;;  %p209_p3 = scmp.ne.s32.totalorder %s5322_s25, %s5318_s24 }
   0x8   : > { %s7701_s9 = smov (%p34_p0, %s32_s9), 0  ;;  %p210_p5 = scmp.eq.s32.totalorder %s4867_s8, 1 }
   0x9   : > { %p5425_p4 = por %p204_p2, %p203_p1  ;;  %s190_s12 = ssub.s32 %s5334_s28, %s7701_s9 }
   0xa   : > { %p4870_p6 = scmp.ge.s32.totalorder %s5338_s29, 1  ;;  %p191_p7 = scmp.eq.s32.totalorder %s190_s12, 0 }
   0xb   : > { %p5432_p8 = por %p210_p5, %p209_p3  ;;  %p261_p9 = scmp.lt.s32.totalorder %s5338_s29, 3 }
   0xc   : > { %s5438_s14 = scalar_select %p191_p7, %s5326_s26, %s193_s10  }
   0xd   : > { %p262_p10 = pnand %p4870_p6, %p261_p9 }
   0xf   : > { %265 = sbr.rel (%p262_p10) target bundleno = 1481 (0x5c9), region = 48 }
  0x16   : > { %s4872_s15 = sshll.u32 %s5330_s27, 1  ;;  %v7652_v0 = vmov 2   ;;  %v7656_v1 = vmov 1   ;;  %v7654_v7 = vmov 0   ;;  %v5245_v25 = vld [vmem:[%s7644_s3] sm:$0xff]   ;;  %v5246_v26 = vld [vmem:[%s7644_s3 + $0x8] sm:$0xff]   ;;  %v696_v44 = vlaneseq }
  0x17   : > { %5163 = vset.pattern.permute.xlu0 %v7652_v0  ;;  %5159 = vset.pattern.permute.xlu1 %v7656_v1  ;;  %p300_p11 = scmp.lt.s32.totalorder %s4872_s15, 3  ;;  %v5247_v27 = vld [vmem:[%s7644_s3 + $0x10] sm:$0xff]   ;;  %v5248_v28 = vld [vmem:[%s7644_s3 + $0x18] sm:$0xff]   ;;  %v375_v54 = vld [vmem:[%s7642_s1] sm:$0x7]  ;;  %vm1746_vm0 = vcmask 523264  }
  0x18   : > { %5020 = vmatprep.subr.bf16.mxu0 %v5245_v25  ;;  %5092 = vmatprep.subr.bf16.mxu1 %v5245_v25  ;;  %v5586_v48 = vshrl.u32 %v696_v44, 7  ;;  %vm4658_vm1 = vcmask 1040384   ;;  %s295_s23 = sand.u32 1, %s5322_s25   ;;  %s4983_s10 = sshll.u32 %s5330_s27, 8 }
  0x19   : > { %s7703_s15 = smov (!%p300_p11, %s4872_s15), 3  ;;  %5021 = vmatpush3.bf16.msra.mxu0 %v5245_v25  ;;  %5096 = vmatpush3.bf16.msra.mxu1 %v5245_v25  ;;  %s4871_s30 = sshll.u32 %s295_s23, 4 }
  0x1a   : > { %s4982_s16 = sshll.u32 %s7703_s15, 8  ;;  %5022 = vmatprep.subr.bf16.mxu0 %v5246_v26  ;;  %5093 = vmatprep.subr.bf16.mxu1 %v5246_v26  ;;  %7670 = vst [vmem:[#allocation7_spill] sm:$0xff] %v5586_v48  ;;  %v7649_v53 = vsub.s32 1, %v5586_v48  ;;  %v7651_v56 = vsub.s32 2, %v5586_v48  ;;  %v7650_v57 = vsub.s32 0, %v5586_v48  ;;  %s7335_s8 = scalar_lea.vmem [#allocation3], %s4871_s30 }
  0x1b   : > { %s5446_s19 = scalar_lea.vmem %s7641_s0, %s4982_s16  ;;  %s4793_s12 = sshll.u32 %s7335_s8, 4  ;;  %s7593_s12 = int_to_ptr.vmem [resolvable:$true] %s4793_s12 }
  0x1c   : > { %v312_v2 = vld [vmem:[%s5446_s19 + $0x8] sm:$0xff]  ;;  %v311_v3 = vld [vmem:[%s5446_s19] sm:$0xff]  ;;  %v318_v5 = vld [vmem:[%s5446_s19 + $0x38] sm:$0xff]  ;;  %v5612_v60 = vrot.slane %v375_v54, %v7649_v53  ;;  %v5620_v62 = vrot.slane %v375_v54, %v7651_v56  ;;  %v5624_v63 = vrot.slane %v375_v54, %v7650_v57  ;;  %s7591_s17 = scalar_lea.hbm %s7648_s7, %s4983_s10  ;;  %s4779_s18 = scalar_lea.sflag [#allocation4], %s295_s23 }
  0x1d   : > { %1157 = vperm.xlu0 %5163, %v312_v2   ;;  %765 = vperm.xlu1 %5159, %v311_v3   ;;  %v315_v4 = vld [vmem:[%s5446_s19 + $0x20] sm:$0xff]  ;;  %v314_v6 = vld [vmem:[%s5446_s19 + $0x18] sm:$0xff]  ;;  %v320_v8 = vld [vmem:[%s5446_s19 + $0x48] sm:$0xff]  ;;  %s5260_s27 = scalar_lea.vmem %s7593_s12, 256 }
  0x1e   : > { %v5457_v9 = vld [vmem:[%s5446_s19 + $0x60] sm:$0xff]  ;;  %v5461_v10 = vld [vmem:[%s5446_s19 + $0x78] sm:$0xff]  ;;  %v313_v11 = vld [vmem:[%s5446_s19 + $0x10] sm:$0xff]  ;;  %5023 = vmatpush3.bf16.msra.mxu0 %v5246_v26  ;;  %5097 = vmatpush3.bf16.msra.mxu1 %v5246_v26  ;;  %p5261_p12 = scmp.ne.s32.totalorder %s7593_s12, %s5260_s27 }
  0x1f   : > { %v5467_v12 = vld [vmem:[%s5446_s19 + $0x88] sm:$0xff]  ;;  %v317_v14 = vld [vmem:[%s5446_s19 + $0x30] sm:$0xff]  ;;  %v5489_v17 = vld [vmem:[%s5446_s19 + $0xa0] sm:$0xff]  ;;  %5024 = vmatprep.subr.bf16.mxu0 %v5247_v27  ;;  %5094 = vmatprep.subr.bf16.mxu1 %v5247_v27 }
  0x20   : > { %v316_v13 = vld [vmem:[%s5446_s19 + $0x28] sm:$0xff]  ;;  %v5477_v15 = vld [vmem:[%s5446_s19 + $0x50] sm:$0xff]  ;;  %v319_v18 = vld [vmem:[%s5446_s19 + $0x40] sm:$0xff]  ;;  %p5262_p13 = pnand %p5261_p12, %p5425_p4 }
  0x21   : > { %1169 = vperm.xlu0 %5163, %v315_v4   ;;  %769 = vperm.xlu1 %5159, %v312_v2   ;;  %v5485_v16 = vld [vmem:[%s5446_s19 + $0x90] sm:$0xff]  ;;  %v5495_v19 = vld [vmem:[%s5446_s19 + $0xc8] sm:$0xff]  ;;  %v5504_v21 = vld [vmem:[%s5446_s19 + $0xe0] sm:$0xff] }
  0x22   : > { %v5500_v20 = vld [vmem:[%s5446_s19 + $0xd0] sm:$0xff]  ;;  %v322_v22 = vld [vmem:[%s5446_s19 + $0x58] sm:$0xff]  ;;  %v5510_v23 = vld [vmem:[%s5446_s19 + $0x108] sm:$0xff]  ;;  %5025 = vmatpush3.bf16.msra.mxu0 %v5247_v27  ;;  %5098 = vmatpush3.bf16.msra.mxu1 %v5247_v27  ;;  %p5263_p0 = pneg %p5262_p13 }
  0x23   : > { %v5514_v24 = vld [vmem:[%s5446_s19 + $0x110] sm:$0xff]  ;;  %5026 = vmatprep.subr.bf16.mxu0 %v5248_v28  ;;  %v324_v29 = vld [vmem:[%s5446_s19 + $0x68] sm:$0xff]  ;;  %5095 = vmatprep.subr.bf16.mxu1 %v5248_v28  ;;  %v327_v39 = vld [vmem:[%s5446_s19 + $0x80] sm:$0xff] }
  0x24   : > { %v325_v30 = vld [vmem:[%s5446_s19 + $0x70] sm:$0xff]  ;;  %v5542_v31 = vld [vmem:[%s5446_s19 + $0xa8] sm:$0xff]  ;;  %v330_v50 = vld [vmem:[%s5446_s19 + $0x98] sm:$0xff] }
  0x25   : > { %1181 = vperm.xlu0 %5163, %v318_v5   ;;  %5160 = vset.pattern.permute.xlu1 %v7654_v7  ;;  %v5547_v32 = vld [vmem:[%s5446_s19 + $0xb0] sm:$0xff]  ;;  %v5555_v35 = vld [vmem:[%s5446_s19 + $0xe8] sm:$0xff]  ;;  %v5671_v54 = vld [vmem:[%s5446_s19 + $0xf8] sm:$0xff] }
  0x26   : > { %393 = vperm.xlu1 %5160, %v314_v6   ;;  %5027 = vmatpush3.bf16.msra.mxu0 %v5248_v28  ;;  %v5561_v38 = vld [vmem:[%s5446_s19 + $0xf0] sm:$0xff]  ;;  %v5575_v43 = vld [vmem:[%s5446_s19 + $0x128] sm:$0xff] }
  0x27   : > { %5099 = vmatpush3.bf16.msra.mxu1 %v5248_v28  ;;  %v5583_v47 = vld [vmem:[%s5446_s19 + $0x130] sm:$0xff]  ;;  %v5608_v59 = vld [vmem:[%s5446_s19 + $0x168] sm:$0xff]  ;;  %v334_v28 = vld [vmem:[%s5446_s19 + $0xb8] sm:$0xff] }
  0x28   : > { %7669 = vst [vmem:[#allocation6_spill] sm:$0xff] %v5583_v47  ;;  %v5593_v52 = vld [vmem:[%s5446_s19 + $0x150] sm:$0xff]  ;;  %7671 = vst [vmem:[#allocation8_spill] sm:$0xff] %v5608_v59 }
  0x29   : > { %1189 = vperm.xlu0 %5163, %v320_v8  }
  0x2a   : > { %5161 = vset.pattern.permute.xlu1 %v7656_v1 }
  0x2b   : > { %777 = vperm.xlu1 %5161, %v314_v6  }
  0x2d   : > { %1201 = vperm.xlu0 %5163, %v5457_v9  }
  0x2f   : > { %5162 = vset.pattern.permute.xlu1 %v7652_v0 }
  0x30   : > { %1153 = vperm.xlu1 %5162, %v311_v3  }
  0x31   : > { %1213 = vperm.xlu0 %5163, %v5461_v10  }
  0x34   : > { %1161 = vperm.xlu1 %5162, %v313_v11  }
  0x35   : > { %1221 = vperm.xlu0 %5163, %v5467_v12  }
  0x38   : > { %1165 = vperm.xlu1 %5162, %v314_v6  }
  0x39   : > { %5184 = vset.pattern.permute.xlu0 %v7654_v7 }
  0x3a   : > { %378 = vperm.xlu0 %5184, %v311_v3  }
  0x3c   : > { %5164 = vset.pattern.permute.xlu1 %v7654_v7 }
  0x3d   : > { %403 = vperm.xlu1 %5164, %v316_v13  }
  0x3e   : > { %383 = vperm.xlu0 %5184, %v312_v2   ;;  %v357_v2 = vld [vmem:[%s5446_s19 + $0x170] sm:$0xff] }
  0x41   : > { %5165 = vset.pattern.permute.xlu1 %v7656_v1 }
  0x42   : > { %388 = vperm.xlu0 %5184, %v313_v11   ;;  %781 = vperm.xlu1 %5165, %v315_v4  }
  0x46   : > { %398 = vperm.xlu0 %5184, %v315_v4   ;;  %5166 = vset.pattern.permute.xlu1 %v7654_v7 }
  0x47   : > { %408 = vperm.xlu1 %5166, %v317_v14  }
  0x4a   : > { %423 = vperm.xlu0 %5184, %v320_v8  }
  0x4b   : > { %413 = vperm.xlu1 %5166, %v318_v5  }
  0x4e   : > { %428 = vperm.xlu0 %5184, %v5477_v15  }
  0x4f   : > { %5167 = vset.pattern.permute.xlu1 %v7656_v1 }
  0x50   : > { %793 = vperm.xlu1 %5167, %v318_v5  }
  0x52   : > { %438 = vperm.xlu0 %5184, %v5457_v9  }
  0x54   : > { %5168 = vset.pattern.permute.xlu1 %v7652_v0 }
  0x55   : > { %1173 = vperm.xlu1 %5168, %v316_v13  }
  0x56   : > { %463 = vperm.xlu0 %5184, %v5467_v12  }
  0x59   : > { %1177 = vperm.xlu1 %5168, %v317_v14  }
  0x5a   : > { %468 = vperm.xlu0 %5184, %v5485_v16  }
  0x5d   : > { %5169 = vset.pattern.permute.xlu1 %v7654_v7 }
  0x5e   : > { %478 = vperm.xlu0 %5184, %v5489_v17   ;;  %418 = vperm.xlu1 %5169, %v319_v18  }
  0x62   : > { %503 = vperm.xlu0 %5184, %v5495_v19   ;;  %5170 = vset.pattern.permute.xlu1 %v7656_v1 }
  0x63   : > { %797 = vperm.xlu1 %5170, %v319_v18  }
  0x66   : > { %508 = vperm.xlu0 %5184, %v5500_v20  }
  0x67   : > { %801 = vperm.xlu1 %5170, %v320_v8  }
  0x6a   : > { %518 = vperm.xlu0 %5184, %v5504_v21  }
  0x6b   : > { %5171 = vset.pattern.permute.xlu1 %v7654_v7 }
  0x6c   : > { %433 = vperm.xlu1 %5171, %v322_v22  }
  0x6e   : > { %543 = vperm.xlu0 %5184, %v5510_v23  }
  0x70   : > { %5172 = vset.pattern.permute.xlu1 %v7656_v1 }
  0x71   : > { %809 = vperm.xlu1 %5172, %v322_v22  }
  0x72   : > { %548 = vperm.xlu0 %5184, %v5514_v24  }
  0x75   : > { %5173 = vset.pattern.permute.xlu1 %v7652_v0 }
  0x76   : > { %5202 = vset.pattern.permute.xlu0 %v7656_v1  ;;  %1185 = vperm.xlu1 %5173, %v319_v18   ;;  %v5642_v18 = vld [vmem:[%s7643_s2] ss:$0 sm:$0xff] }
  0x77   : > { %773 = vperm.xlu0 %5202, %v313_v11  }
  0x7a   : > { %1193 = vperm.xlu1 %5173, %v5477_v15  }
  0x7b   : > { %785 = vperm.xlu0 %5202, %v316_v13  }
  0x7e   : > { %1197 = vperm.xlu1 %5173, %v322_v22  }
  0x7f   : > { %789 = vperm.xlu0 %5202, %v317_v14  }
  0x82   : > { %5174 = vset.pattern.permute.xlu1 %v7654_v7 }
  0x83   : > { %805 = vperm.xlu0 %5202, %v5477_v15   ;;  %443 = vperm.xlu1 %5174, %v324_v29  }
  0x87   : > { %817 = vperm.xlu0 %5202, %v324_v29   ;;  %5175 = vset.pattern.permute.xlu1 %v7656_v1 }
  0x88   : > { %813 = vperm.xlu1 %5175, %v5457_v9  }
  0x8b   : > { %821 = vperm.xlu0 %5202, %v325_v30  }
  0x8c   : > { %5176 = vset.pattern.permute.xlu1 %v7654_v7 }
  0x8d   : > { %448 = vperm.xlu1 %5176, %v325_v30  }
  0x8f   : > { %837 = vperm.xlu0 %5202, %v5485_v16  }
  0x91   : > { %453 = vperm.xlu1 %5176, %v5461_v10  }
  0x93   : > { %849 = vperm.xlu0 %5202, %v5542_v31  }
  0x95   : > { %5177 = vset.pattern.permute.xlu1 %v7656_v1 }
  0x96   : > { %825 = vperm.xlu1 %5177, %v5461_v10  }
  0x97   : > { %853 = vperm.xlu0 %5202, %v5547_v32  }
  0x9a   : > { %5178 = vset.pattern.permute.xlu1 %v7652_v0 }
  0x9b   : > { %1205 = vperm.xlu1 %5178, %v324_v29   ;;  %869 = vperm.xlu0 %5202, %v5500_v20  }
  0x9c   : > { %v766_v33 = vpop.permute.xlu1 %765  ;;  %v1158_v34 = vpop.permute.xlu0 %1157 }
  0x9d   : > { %v1024_v4 = vmul.f32 %v5612_v60, %v766_v33  ;;  %v1413_v11 = vmul.f32 %v5620_v62, %v1158_v34 }
  0x9f   : > { %1209 = vperm.xlu1 %5178, %v325_v30   ;;  %881 = vperm.xlu0 %5202, %v5555_v35  }
  0xa0   : > { %v770_v36 = vpop.permute.xlu1 %769  ;;  %v5558_v37 = vpop.permute.xlu0 %1169 }
  0xa3   : > { %5179 = vset.pattern.permute.xlu1 %v7654_v7  ;;  %885 = vperm.xlu0 %5202, %v5561_v38  }
  0xa4   : > { %458 = vperm.xlu1 %5179, %v327_v39   ;;  %v5566_v40 = vpop.permute.xlu0 %1181 }
  0xa5   : > { %v5568_v41 = vpop.permute.xlu1 %393 }
  0xa6   : > { %v703_v56 = vmul.f32 %v5624_v63, %v5568_v41 }
  0xa7   : > { %901 = vperm.xlu0 %5202, %v5514_v24  }
  0xa8   : > { %5180 = vset.pattern.permute.xlu1 %v7656_v1  ;;  %v5572_v42 = vpop.permute.xlu0 %1189 }
  0xa9   : > { %829 = vperm.xlu1 %5180, %v327_v39  }
  0xaa   : > { %v5577_v45 = vpop.permute.xlu1 %777 }
  0xab   : > { %913 = vperm.xlu0 %5202, %v5575_v43   ;;  %v1027_v53 = vmul.f32 %v5612_v60, %v5577_v45 }
  0xac   : > { %v5580_v46 = vpop.permute.xlu0 %1201 }
  0xad   : > { %833 = vperm.xlu1 %5180, %v5467_v12   ;;  %v1025_v12 = vmul.f32 %v5612_v60, %v770_v36  ;;  %v1091_v48 = vadd.f32 %v1027_v53, %v703_v56 }
  0xaf   : > { %v1154_v49 = vpop.permute.xlu1 %1153  ;;  %917 = vperm.xlu0 %5202, %v5583_v47  }
  0xb0   : > { %v5590_v51 = vpop.permute.xlu0 %1213  ;;  %v1412_v6 = vmul.f32 %v5620_v62, %v1154_v49 }
  0xb1   : > { %5181 = vset.pattern.permute.xlu1 %v7654_v7 }
  0xb2   : > { %473 = vperm.xlu1 %5181, %v330_v50  }
  0xb3   : > { %v5600_v55 = vpop.permute.xlu1 %1161  ;;  %933 = vperm.xlu0 %5202, %v5593_v52  }
  0xb4   : > { %v5605_v58 = vpop.permute.xlu0 %1221 }
  0xb6   : > { %5182 = vset.pattern.permute.xlu1 %v7656_v1 }
  0xb7   : > { %841 = vperm.xlu1 %5182, %v330_v50   ;;  %v5615_v61 = vpop.permute.xlu1 %1165  ;;  %945 = vperm.xlu0 %5202, %v5608_v59   ;;  %v5757_v59 = vld [vmem:[%s5446_s19 + $0xd8] sm:$0xff] }
  0xb9   : > { %v379_v3 = vpop.permute.xlu0 %378 }
  0xba   : > { %v700_v5 = vmul.f32 %v5624_v63, %v379_v3 }
  0xbb   : > { %5183 = vset.pattern.permute.xlu1 %v7652_v0  ;;  %949 = vperm.xlu0 %5202, %v357_v2  }
  0xbc   : > { %v1088_v8 = vadd.f32 %v1024_v4, %v700_v5  ;;  %1217 = vperm.xlu1 %5183, %v327_v39   ;;  %v5631_v9 = vpop.permute.xlu1 %403 }
  0xbd   : > { %v384_v10 = vpop.permute.xlu0 %383 }
  0xbe   : > { %v1476_v13 = vadd.f32 %v1412_v6, %v1088_v8  ;;  %v701_v14 = vmul.f32 %v5624_v63, %v384_v10  ;;  %v5692_v8 = vld [vmem:[%s5446_s19 + $0x138] sm:$0xff] }
  0xbf   : > { %5219 = vset.pattern.permute.xlu0 %v7652_v0  ;;  %7672 = vst [vmem:[#allocation9_spill] sm:$0xff] %v5692_v8 }
  0xc0   : > { %v1089_v15 = vadd.f32 %v1025_v12, %v701_v14  ;;  %1225 = vperm.xlu1 %5183, %v5485_v16   ;;  %1233 = vperm.xlu0 %5219, %v5489_v17   ;;  %v1547_v27 = vadd.f32 %v5642_v18, %v1476_v13  ;;  %v5699_v12 = vld [vmem:[%s5446_s19 + $0x148] sm:$0xff]  ;;  %v5707_v14 = vld [vmem:[%s5446_s19 + $0x160] sm:$0xff] }
  0xc1   : > { %v5644_v22 = vpop.permute.xlu0 %388  ;;  %v5646_v25 = vpop.permute.xlu1 %781 }
  0xc2   : > { %v1477_v26 = vadd.f32 %v1413_v11, %v1089_v15  ;;  %v1611_v33 = vmax.f32 %v1547_v27, 0.0  ;;  %v5714_v27 = vld [vmem:[%s5446_s19 + $0x178] sm:$0xff]  ;;  %v702_v41 = vmul.f32 %v5624_v63, %v5644_v22 }
  0xc3   : > { %7675 = vst [vmem:[#allocation12_spill] sm:$0xff] %v5714_v27 }
  0xc4   : > { %1229 = vperm.xlu1 %5183, %v330_v50   ;;  %v1548_v29 = vadd.f32 %v5642_v18, %v1477_v26  ;;  %1245 = vperm.xlu0 %5219, %v334_v28  }
  0xc5   : > { %v5651_v16 = vpop.permute.xlu0 %398 }
  0xc6   : > { %v5653_v30 = vpop.permute.xlu1 %408  ;;  %v1612_v34 = vmax.f32 %v1548_v29, 0.0  ;;  %v5717_v29 = vld [vmem:[%s5446_s19 + $0xc0] sm:$0xff]  ;;  %v704_v45 = vmul.f32 %v5624_v63, %v5651_v16 }
  0xc8   : > { %5185 = vset.pattern.permute.xlu1 %v7654_v7  ;;  %v1675_v36 = vpack.c.bf16 %v1612_v34, %v1611_v33  ;;  %1253 = vperm.xlu0 %5219, %v5495_v19   ;;  %v5724_v33 = vld [vmem:[%s5446_s19 + $0x188] sm:$0xff] }
  0xc9   : > { %483 = vperm.xlu1 %5185, %v5542_v31   ;;  %v5658_v39 = vpop.permute.xlu0 %423 }
  0xca   : > { %5028 = vmatprep.mubr.msk.bf16.mxu0 %vm1746_vm0, %v1675_v36  ;;  %v5661_v44 = vpop.permute.xlu1 %413  ;;  %v5733_v36 = vld [vmem:[%s5446_s19 + $0x1a0] sm:$0xff] }
  0xcb   : > { %v707_v56 = vmul.f32 %v5624_v63, %v5661_v44 }
  0xcc   : > { %1265 = vperm.xlu0 %5219, %v5504_v21  }
  0xcd   : > { %5186 = vset.pattern.permute.xlu1 %v7656_v1  ;;  %v5665_v49 = vpop.permute.xlu0 %428 }
  0xce   : > { %845 = vperm.xlu1 %5186, %v5489_v17   ;;  %v5684_v17 = vld [vmem:[%s5446_s19 + $0x120] sm:$0xff] }
  0xcf   : > { %v5668_v50 = vpop.permute.xlu1 %793 }
  0xd0   : > { %1277 = vperm.xlu0 %5219, %v5671_v54  }
  0xd1   : > { %v5674_v2 = vpop.permute.xlu0 %438 }
  0xd2   : > { %5187 = vset.pattern.permute.xlu1 %v7654_v7 }
  0xd3   : > { %488 = vperm.xlu1 %5187, %v5547_v32  }
  0xd4   : > { %v5678_v3 = vpop.permute.xlu1 %1173  ;;  %1285 = vperm.xlu0 %5219, %v5510_v23  }
  0xd5   : > { %v5681_v4 = vpop.permute.xlu0 %463 }
  0xd7   : > { %493 = vperm.xlu1 %5187, %v334_v28  }
  0xd8   : > { %v5686_v5 = vpop.permute.xlu1 %1177  ;;  %1297 = vperm.xlu0 %5219, %v5684_v17  }
  0xd9   : > { %v5689_v6 = vpop.permute.xlu0 %468 }
  0xdb   : > { %5188 = vset.pattern.permute.xlu1 %v7656_v1 }
  0xdc   : > { %857 = vperm.xlu1 %5188, %v334_v28   ;;  %1309 = vperm.xlu0 %5219, %v5692_v8  }
  0xdd   : > { %v419_v10 = vpop.permute.xlu1 %418  ;;  %v5696_v11 = vpop.permute.xlu0 %478 }
  0xe0   : > { %5189 = vset.pattern.permute.xlu1 %v7652_v0  ;;  %1317 = vperm.xlu0 %5219, %v5699_v12   ;;  %v1415_v0 = vmul.f32 %v5620_v62, %v5615_v61  ;;  %v5760_v61 = vld [vmem:[%s5446_s19 + $0x1c8] sm:$0xff] }
  0xe1   : > { %1237 = vperm.xlu1 %5189, %v5542_v31   ;;  %v5704_v13 = vpop.permute.xlu0 %503 }
  0xe2   : > { %7673 = vst [vmem:[#allocation10_spill] sm:$0xff] %v5704_v13  ;;  %v798_v15 = vpop.permute.xlu1 %797  ;;  %v705_v13 = vmul.f32 %v5624_v63, %v5631_v9 }
  0xe3   : > { %v1032_v22 = vmul.f32 %v5612_v60, %v798_v15  ;;  %v708_v15 = vmul.f32 %v5624_v63, %v419_v10 }
  0xe4   : > { %1329 = vperm.xlu0 %5219, %v5707_v14  }
  0xe5   : > { %1241 = vperm.xlu1 %5189, %v5547_v32   ;;  %v5711_v26 = vpop.permute.xlu0 %508  ;;  %v1096_v47 = vadd.f32 %v1032_v22, %v708_v15 }
  0xe6   : > { %7674 = vst [vmem:[#allocation11_spill] sm:$0xff] %v5711_v26  ;;  %v802_v28 = vpop.permute.xlu1 %801 }
  0xe8   : > { %1341 = vperm.xlu0 %5219, %v5714_v27   ;;  %v1479_v27 = vadd.f32 %v1415_v0, %v1091_v48  ;;  %v7679_v48 = vmov 0  }
  0xe9   : > { %5190 = vset.pattern.permute.xlu1 %v7654_v7  ;;  %v5721_v31 = vpop.permute.xlu0 %518 }
  0xea   : > { %7676 = vst [vmem:[#allocation13_spill] sm:$0xff] %v5721_v31  ;;  %498 = vperm.xlu1 %5190, %v5717_v29  }
  0xeb   : > { %v5727_v34 = vpop.permute.xlu1 %433 }
  0xec   : > { %1349 = vperm.xlu0 %5219, %v5724_v33  }
  0xed   : > { %v5730_v32 = vpop.permute.xlu0 %543 }
  0xee   : > { %7677 = vst [vmem:[#allocation14_spill] sm:$0xff] %v5730_v32  ;;  %5191 = vset.pattern.permute.xlu1 %v7656_v1  ;;  %v366_v1 = vld [vmem:[%s5446_s19 + $0x1b8] sm:$0xff]  ;;  %v1028_v32 = vmul.f32 %v5612_v60, %v5646_v25  ;;  %v1033_v25 = vmul.f32 %v5612_v60, %v802_v28 }
  0xef   : > { %861 = vperm.xlu1 %5191, %v5717_v29  }
  0xf0   : > { %v5739_v57 = vpop.permute.xlu1 %809  ;;  %1361 = vperm.xlu0 %5219, %v5733_v36   ;;  %v1092_v16 = vadd.f32 %v1028_v32, %v704_v45 }
  0xf1   : > { %v5746_v7 = vpop.permute.xlu0 %548 }
  0xf2   : > { %7678 = vst [vmem:[#allocation15_spill] sm:$0xff] %v5746_v7  ;;  %v1416_v7 = vmul.f32 %v5620_v62, %v5558_v37  ;;  %v1419_v37 = vmul.f32 %v5620_v62, %v5566_v40 }
  0xf3   : > { %865 = vperm.xlu1 %5191, %v5495_v19   ;;  %v1031_v19 = vmul.f32 %v5612_v60, %v5668_v50  ;;  %v1550_v50 = vadd.f32 %v5642_v18, %v1479_v27 }
  0xf4   : > { %1373 = vperm.xlu0 %5219, %v366_v1   ;;  %v709_v1 = vmul.f32 %v5624_v63, %v5658_v39  ;;  %v1414_v39 = vmul.f32 %v5620_v62, %v5600_v55  ;;  %v1421_v55 = vmul.f32 %v5620_v62, %v5572_v42 }
  0xf5   : > { %v1186_v31 = vpop.permute.xlu1 %1185  ;;  %v1095_v44 = vadd.f32 %v1031_v19, %v707_v56 }
  0xf6   : > { %v774_v53 = vpop.permute.xlu0 %773  ;;  %v1420_v28 = vmul.f32 %v5620_v62, %v1186_v31  ;;  %v1097_v27 = vadd.f32 %v1033_v25, %v709_v1 }
  0xf7   : > { %v1026_v0 = vmul.f32 %v5612_v60, %v774_v53  ;;  %5192 = vset.pattern.permute.xlu1 %v7679_v48  ;;  %v1480_v53 = vadd.f32 %v1416_v7, %v1092_v16  ;;  %v1417_v7 = vmul.f32 %v5620_v62, %v5678_v3  ;;  %v1483_v16 = vadd.f32 %v1419_v37, %v1095_v44 }
  0xf8   : > { %513 = vperm.xlu1 %5192, %v5757_v59   ;;  %1381 = vperm.xlu0 %5219, %v5760_v61   ;;  %v1484_v19 = vadd.f32 %v1420_v28, %v1096_v47  ;;  %v1485_v25 = vadd.f32 %v1421_v55, %v1097_v27 }
  0xf9   : > { %v1090_v32 = vadd.f32 %v1026_v0, %v702_v41  ;;  %v1194_v45 = vpop.permute.xlu1 %1193  ;;  %v7680_v41 = vmov 1   ;;  %v1551_v42 = vadd.f32 %v5642_v18, %v1480_v53  ;;  %v706_v0 = vmul.f32 %v5624_v63, %v5653_v30 }
  0xfa   : > { %v786_v26 = vpop.permute.xlu0 %785  ;;  %v1554_v53 = vadd.f32 %v5642_v18, %v1483_v16  ;;  %v1556_v27 = vadd.f32 %v5642_v18, %v1485_v25 }
  0xfb   : > { %v1478_v8 = vadd.f32 %v1414_v39, %v1090_v32  ;;  %v1029_v40 = vmul.f32 %v5612_v60, %v786_v26  ;;  %v1614_v26 = vmax.f32 %v1550_v50, 0.0  ;;  %v1035_v39 = vmul.f32 %v5612_v60, %v5739_v57 }
  0xfc   : > { %5193 = vset.pattern.permute.xlu1 %v7680_v41  ;;  %5237 = vset.pattern.permute.xlu0 %v7679_v48  ;;  %v7681_v50 = vmov 2   ;;  %v1615_v32 = vmax.f32 %v1551_v42, 0.0 }
  0xfd   : > { %v1549_v10 = vadd.f32 %v5642_v18, %v1478_v8  ;;  %v1093_v31 = vadd.f32 %v1029_v40, %v705_v13  ;;  %873 = vperm.xlu1 %5193, %v5757_v59   ;;  %v1198_v9 = vpop.permute.xlu1 %1197  ;;  %558 = vperm.xlu0 %5237, %v5684_v17   ;;  %v710_v8 = vmul.f32 %v5624_v63, %v5665_v49 }
  0xfe   : > { %v790_v1 = vpop.permute.xlu0 %789  ;;  %v1418_v13 = vmul.f32 %v5620_v62, %v5686_v5  ;;  %v711_v49 = vmul.f32 %v5624_v63, %v5727_v34  ;;  %v1555_v5 = vadd.f32 %v5642_v18, %v1484_v19  ;;  %v1423_v28 = vmul.f32 %v5620_v62, %v1198_v9 }
  0xff   : > { %v1613_v56 = vmax.f32 %v1549_v10, 0.0  ;;  %v1481_v22 = vadd.f32 %v1417_v7, %v1093_v31  ;;  %v1030_v3 = vmul.f32 %v5612_v60, %v790_v1  ;;  %v1422_v10 = vmul.f32 %v5620_v62, %v1194_v45 }
 0x100   : > { %v1099_v7 = vadd.f32 %v1035_v39, %v711_v49  ;;  %v1618_v9 = vmax.f32 %v1554_v53, 0.0  ;;  %v1424_v53 = vmul.f32 %v5620_v62, %v5580_v46 }
 0x101   : > { %v1552_v47 = vadd.f32 %v5642_v18, %v1481_v22  ;;  %v1094_v37 = vadd.f32 %v1030_v3, %v706_v0  ;;  %5194 = vset.pattern.permute.xlu1 %v7681_v50  ;;  %v1676_v30 = vpack.c.bf16 %v1614_v26, %v1613_v56  ;;  %583 = vperm.xlu0 %5237, %v5699_v12   ;;  %v1620_v0 = vmax.f32 %v1556_v27, 0.0 }
 0x102   : > { %v806_v44 = vpop.permute.xlu0 %805  ;;  %1249 = vperm.xlu1 %5194, %v5717_v29   ;;  %v444_v57 = vpop.permute.xlu1 %443  ;;  %v1619_v29 = vmax.f32 %v1555_v5, 0.0  ;;  %v1487_v42 = vadd.f32 %v1423_v28, %v1099_v7 }
 0x103   : > { %v1616_v15 = vmax.f32 %v1552_v47, 0.0  ;;  %v1482_v40 = vadd.f32 %v1418_v13, %v1094_v37  ;;  %v1034_v55 = vmul.f32 %v5612_v60, %v806_v44  ;;  %5029 = vmatmul.mubr.msk.bf16.vlgmr.msra.gmra.mrb[0].mxu0 %vm1746_vm0, %v1676_v30 }
 0x104   : > { %v1679_v3 = vpack.c.bf16 %v1620_v0, %v1619_v29 }
 0x105   : > { %v1553_v34 = vadd.f32 %v5642_v18, %v1482_v40  ;;  %v1098_v31 = vadd.f32 %v1034_v55, %v710_v8  ;;  %v1677_v26 = vpack.c.bf16 %v1616_v15, %v1615_v32  ;;  %588 = vperm.xlu0 %5237, %v5593_v52   ;;  %v1558_v8 = vadd.f32 %v5642_v18, %v1487_v42 }
 0x106   : > { %1257 = vperm.xlu1 %5194, %v5500_v20   ;;  %v818_v56 = vpop.permute.xlu0 %817  ;;  %v1427_v40 = vmul.f32 %v5620_v62, %v5590_v51 }
 0x107   : > { %v1617_v16 = vmax.f32 %v1553_v34, 0.0  ;;  %v1486_v19 = vadd.f32 %v1422_v10, %v1098_v31  ;;  %5032 = vmatprep.mubr.msk.bf16.mxu0 %vm1746_vm0, %v1677_v26  ;;  %v814_v1 = vpop.permute.xlu1 %813  ;;  %v1622_v39 = vmax.f32 %v1558_v8, 0.0 }
 0x108   : > { %v1036_v30 = vmul.f32 %v5612_v60, %v814_v1 }
 0x109   : > { %v1557_v45 = vadd.f32 %v5642_v18, %v1486_v19  ;;  %v1678_v22 = vpack.c.bf16 %v1618_v9, %v1617_v16  ;;  %598 = vperm.xlu0 %5237, %v5707_v14  }
 0x10a   : > { %1261 = vperm.xlu1 %5194, %v5757_v59   ;;  %v822_v20 = vpop.permute.xlu0 %821  ;;  %v712_v59 = vmul.f32 %v5624_v63, %v5674_v2  ;;  %v1037_v2 = vmul.f32 %v5612_v60, %v818_v56 }
 0x10b   : > { %5033 = vmatmul.mubr.msk.bf16.gmra.mrb[4].mxu0 %vm1746_vm0, %v1678_v22  ;;  %v1621_v25 = vmax.f32 %v1557_v45, 0.0  ;;  %v1038_v10 = vmul.f32 %v5612_v60, %v822_v20 }
 0x10c   : > { %5036 = vmatprep.mubr.msk.bf16.mxu0 %vm1746_vm0, %v1679_v3  ;;  %v449_v13 = vpop.permute.xlu1 %448  ;;  %v1100_v49 = vadd.f32 %v1036_v30, %v712_v59  ;;  %v5874_v30 = vld [vmem:[%s5446_s19 + $0x100] sm:$0xff] }
 0x10d   : > { %623 = vperm.xlu0 %5237, %v5724_v33   ;;  %v1680_v32 = vpack.c.bf16 %v1622_v39, %v1621_v25  ;;  %v714_v34 = vmul.f32 %v5624_v63, %v449_v13 }
 0x10e   : > { %5195 = vset.pattern.permute.xlu1 %v7679_v48  ;;  %v5831_v37 = vpop.permute.xlu0 %837  ;;  %v1488_v55 = vadd.f32 %v1424_v53, %v1100_v49 }
 0x10f   : > { %523 = vperm.xlu1 %5195, %v5555_v35   ;;  %v1102_v42 = vadd.f32 %v1038_v10, %v714_v34 }
 0x110   : > { %v454_v47 = vpop.permute.xlu1 %453  ;;  %v1559_v29 = vadd.f32 %v5642_v18, %v1488_v55 }
 0x111   : > { %v715_v28 = vmul.f32 %v5624_v63, %v454_v47 }
 0x112   : > { %v5842_v15 = vpop.permute.xlu0 %849  ;;  %v1623_v1 = vmax.f32 %v1559_v29, 0.0 }
 0x113   : > { %5196 = vset.pattern.permute.xlu1 %v7680_v41  ;;  %5037 = vmatmul.mubr.msk.bf16.gmra.mrb[8].mxu0 %vm1746_vm0, %v1680_v32 }
 0x114   : > { %877 = vperm.xlu1 %5196, %v5504_v21   ;;  %v713_v21 = vmul.f32 %v5624_v63, %v444_v57 }
 0x115   : > { %v826_v5 = vpop.permute.xlu1 %825 }
 0x116   : > { %v1039_v44 = vmul.f32 %v5612_v60, %v826_v5  ;;  %v1101_v7 = vadd.f32 %v1037_v2, %v713_v21  ;;  %v5854_v26 = vpop.permute.xlu0 %853 }
 0x118   : > { %5197 = vset.pattern.permute.xlu1 %v7679_v48  ;;  %v1103_v27 = vadd.f32 %v1039_v44, %v715_v28 }
 0x119   : > { %528 = vperm.xlu1 %5197, %v5561_v38  }
 0x11a   : > { %v1206_v46 = vpop.permute.xlu1 %1205  ;;  %v1491_v9 = vadd.f32 %v1427_v40, %v1103_v27  ;;  %v5863_v22 = vpop.permute.xlu0 %869  ;;  %v718_v40 = vmul.f32 %v5624_v63, %v5689_v6  ;;  %v2229_v6 = vld [vmem:[%s7646_s5 + $0x8] sm:$0xff] }
 0x11b   : > { %v1425_v31 = vmul.f32 %v5620_v62, %v1206_v46 }
 0x11c   : > { %v1562_v0 = vadd.f32 %v5642_v18, %v1491_v9 }
 0x11d   : > { %v1489_v51 = vadd.f32 %v1425_v31, %v1101_v7  ;;  %533 = vperm.xlu1 %5197, %v5671_v54   ;;  %v5899_v7 = vld [vmem:[%s5446_s19 + $0x118] sm:$0xff] }
 0x11e   : > { %v1210_v57 = vpop.permute.xlu1 %1209  ;;  %v1626_v13 = vmax.f32 %v1562_v0, 0.0  ;;  %v5869_v59 = vpop.permute.xlu0 %881 }
 0x11f   : > { %v1560_v16 = vadd.f32 %v5642_v18, %v1489_v51  ;;  %v1426_v19 = vmul.f32 %v5620_v62, %v1210_v57 }
 0x121   : > { %v1624_v56 = vmax.f32 %v1560_v16, 0.0  ;;  %v1490_v45 = vadd.f32 %v1426_v19, %v1102_v42  ;;  %5198 = vset.pattern.permute.xlu1 %v7680_v41 }
 0x122   : > { %889 = vperm.xlu1 %5198, %v5671_v54   ;;  %v5876_v32 = vpop.permute.xlu0 %885 }
 0x123   : > { %v1561_v3 = vadd.f32 %v5642_v18, %v1490_v45  ;;  %v459_v8 = vpop.permute.xlu1 %458  ;;  %v1681_v20 = vpack.c.bf16 %v1624_v56, %v1623_v1  ;;  %v5917_v1 = vld [vmem:[%s5446_s19 + $0x190] sm:$0xff]  ;;  %v2237_v56 = vld [vmem:[%s7646_s5 + $0x48] sm:$0xff] }
 0x124   : > { %v716_v21 = vmul.f32 %v5624_v63, %v459_v8  ;;  %628 = vperm.xlu0 %5237, %v5917_v1   ;;  %v2241_v45 = vld [vmem:[%s7646_s5 + $0x68] sm:$0xff] }
 0x125   : > { %v1625_v25 = vmax.f32 %v1561_v3, 0.0  ;;  %5040 = vmatprep.mubr.msk.bf16.mxu0 %vm1746_vm0, %v1681_v20 }
 0x126   : > { %5199 = vset.pattern.permute.xlu1 %v7681_v50  ;;  %v5884_v5 = vpop.permute.xlu0 %901 }
 0x127   : > { %1269 = vperm.xlu1 %5199, %v5555_v35   ;;  %v1682_v39 = vpack.c.bf16 %v1626_v13, %v1625_v25  ;;  %v717_v35 = vmul.f32 %v5624_v63, %v5681_v4  ;;  %v1042_v4 = vmul.f32 %v5612_v60, %v5831_v37  ;;  %v4924_v13 = vcombine.high %v2237_v56, %v2241_v45 }
 0x128   : > { %v830_v47 = vpop.permute.xlu1 %829  ;;  %638 = vperm.xlu0 %5237, %v5733_v36  }
 0x129   : > { %5041 = vmatmul.mubr.msk.bf16.gmra.mrb[12].mxu0 %vm1746_vm0, %v1682_v39  ;;  %v1040_v28 = vmul.f32 %v5612_v60, %v830_v47  ;;  %v1106_v34 = vadd.f32 %v1042_v4, %v718_v40  ;;  %v4923_v39 = vcombine.low %v2237_v56, %v2241_v45  ;;  %v2281_v45 = vld [vmem:[%s7646_s5 + $0x1a8] sm:$0xff] }
 0x12a   : > { %v5896_v27 = vpop.permute.xlu0 %913 }
 0x12b   : > { %1273 = vperm.xlu1 %5199, %v5561_v38   ;;  %v1429_v38 = vmul.f32 %v5620_v62, %v5605_v58  ;;  %v1104_v58 = vadd.f32 %v1040_v28, %v716_v21  ;;  %v2253_v21 = vld [vmem:[%s7646_s5 + $0xc8] sm:$0xff] }
 0x12c   : > { %v834_v54 = vpop.permute.xlu1 %833  ;;  %663 = vperm.xlu0 %5237, %v5760_v61   ;;  %v5957_v61 = vld [vmem:[%s5446_s19 + $0x1d0] sm:$0xff] }
 0x12d   : > { %v1041_v49 = vmul.f32 %v5612_v60, %v834_v54 }
 0x12e   : > { %v5913_v16 = vpop.permute.xlu0 %917 }
 0x12f   : > { %5200 = vset.pattern.permute.xlu1 %v7679_v48  ;;  %v1105_v44 = vadd.f32 %v1041_v49, %v717_v35  ;;  %v2245_v35 = vld [vmem:[%s7646_s5 + $0x88] sm:$0xff] }
 0x130   : > { %538 = vperm.xlu1 %5200, %v5874_v30   ;;  %v2249_v49 = vld [vmem:[%s7646_s5 + $0xa8] sm:$0xff]  ;;  %668 = vperm.xlu0 %5237, %v5957_v61  }
 0x131   : > { %v474_v53 = vpop.permute.xlu1 %473  ;;  %v1493_v55 = vadd.f32 %v1429_v38, %v1105_v44  ;;  %v4932_v28 = vcombine.high %v2245_v35, %v2249_v49  ;;  %v4931_v36 = vcombine.low %v2245_v35, %v2249_v49 }
 0x132   : > { %v719_v0 = vmul.f32 %v5624_v63, %v474_v53  ;;  %v5938_v44 = vpop.permute.xlu0 %933 }
 0x133   : > { %v1564_v37 = vadd.f32 %v5642_v18, %v1493_v55  ;;  %v2257_v55 = vld [vmem:[%s7646_s5 + $0xe8] sm:$0xff] }
 0x134   : > { %5201 = vset.pattern.permute.xlu1 %v7680_v41 }
 0x135   : > { %893 = vperm.xlu1 %5201, %v5874_v30   ;;  %v1628_v3 = vmax.f32 %v1564_v37, 0.0  ;;  %v2261_v37 = vld [vmem:[%s7646_s5 + $0x108] sm:$0xff] }
 0x136   : > { %v842_v2 = vpop.permute.xlu1 %841 }
 0x137   : > { %v1043_v57 = vmul.f32 %v5612_v60, %v842_v2 }
 0x139   : > { %897 = vperm.xlu1 %5201, %v5510_v23   ;;  %v2233_v23 = vld [vmem:[%s7646_s5 + $0x28] sm:$0xff]  ;;  %v1107_v47 = vadd.f32 %v1043_v57, %v719_v0 }
 0x13a   : > { %v4915_v29 = vcombine.low %v2229_v6, %v2233_v23  ;;  %v4916_v9 = vcombine.high %v2229_v6, %v2233_v23  ;;  %v2273_v57 = vld [vmem:[%s7646_s5 + $0x168] sm:$0xff] }
 0x13b   : > { %v1218_v46 = vpop.permute.xlu1 %1217 }
 0x13c   : > { %v1428_v10 = vmul.f32 %v5620_v62, %v1218_v46  ;;  %3007 = vmatprep.subr.bf16.mxu0 %v4916_v9  ;;  %v5969_v9 = vld [vmem:[%s5446_s19 + $0x1e0] sm:$0xff] }
 0x13d   : > { %5203 = vset.pattern.permute.xlu1 %v7679_v48  ;;  %3008 = vmatpush1.bf16.msra.mxu0 %v4915_v29 }
 0x13e   : > { %v1492_v31 = vadd.f32 %v1428_v10, %v1104_v58  ;;  %553 = vperm.xlu1 %5203, %v5899_v7   ;;  %3009 = vmatprep.subr.bf16.mxu0 %v4924_v13  ;;  %v4940_v10 = vcombine.high %v2253_v21, %v2257_v55 }
 0x13f   : > { %v1226_v51 = vpop.permute.xlu1 %1225  ;;  %678 = vperm.xlu0 %5237, %v5969_v9  }
 0x140   : > { %v1563_v42 = vadd.f32 %v5642_v18, %v1492_v31  ;;  %v1430_v19 = vmul.f32 %v5620_v62, %v1226_v51  ;;  %v2265_v31 = vld [vmem:[%s7646_s5 + $0x128] sm:$0xff] }
 0x141   : > { %3010 = vmatpush1.bf16.msra.mxu0 %v4923_v39  ;;  %v4948_v29 = vcombine.high %v2261_v37, %v2265_v31  ;;  %v2269_v51 = vld [vmem:[%s7646_s5 + $0x148] sm:$0xff] }
 0x142   : > { %v1627_v8 = vmax.f32 %v1563_v42, 0.0  ;;  %v1494_v20 = vadd.f32 %v1430_v19, %v1106_v34  ;;  %5204 = vset.pattern.permute.xlu1 %v7680_v41  ;;  %3011 = vmatprep.subr.bf16.mxu0 %v4932_v28  ;;  %v4939_v34 = vcombine.low %v2253_v21, %v2257_v55  ;;  %v4956_v0 = vcombine.high %v2269_v51, %v2273_v57 }
 0x143   : > { %905 = vperm.xlu1 %5204, %v5899_v7   ;;  %v1230_v25 = vpop.permute.xlu1 %1229  ;;  %v4955_v56 = vcombine.low %v2269_v51, %v2273_v57  ;;  %5238 = vset.pattern.permute.xlu0 %v7680_v41 }
 0x144   : > { %v1431_v54 = vmul.f32 %v5620_v62, %v1230_v25  ;;  %v1683_v53 = vpack.c.bf16 %v1628_v3, %v1627_v8  ;;  %v1565_v38 = vadd.f32 %v5642_v18, %v1494_v20  ;;  %965 = vperm.xlu0 %5238, %v5917_v1   ;;  %v720_v20 = vmul.f32 %v5624_v63, %v5696_v11 }
 0x145   : > { %3012 = vmatpush1.bf16.msra.mxu0 %v4931_v36  ;;  %v1045_v36 = vmul.f32 %v5612_v60, %v5842_v15  ;;  %v1046_v15 = vmul.f32 %v5612_v60, %v5854_v26 }
 0x146   : > { %v1495_v2 = vadd.f32 %v1431_v54, %v1107_v47  ;;  %5044 = vmatprep.mubr.msk.bf16.mxu0 %vm1746_vm0, %v1683_v53  ;;  %v1629_v46 = vmax.f32 %v1565_v38, 0.0  ;;  %3013 = vmatprep.subr.bf16.mxu0 %v4940_v10  ;;  %v2285_v47 = vld [vmem:[%s7646_s5 + $0x1c8] sm:$0xff] }
 0x147   : > { %5205 = vset.pattern.permute.xlu1 %v7681_v50  ;;  %v2289_v54 = vld [vmem:[%s7646_s5 + $0x1e8] sm:$0xff] }
 0x148   : > { %v1566_v40 = vadd.f32 %v5642_v18, %v1495_v2  ;;  %1281 = vperm.xlu1 %5205, %v5874_v30   ;;  %v5944_v4 = vpop.permute.xlu1 %483  ;;  %v5953_v30 = vpop.permute.xlu0 %945  ;;  %v4972_v53 = vcombine.high %v2285_v47, %v2289_v54  ;;  %v4971_v38 = vcombine.low %v2285_v47, %v2289_v54 }
 0x149   : > { %3014 = vmatpush1.bf16.msra.mxu0 %v4939_v34  ;;  %v6012_v34 = vld [vmem:[%s5446_s19 + $0x1a8] sm:$0xff] }
 0x14a   : > { %v1630_v58 = vmax.f32 %v1566_v40, 0.0  ;;  %3015 = vmatprep.subr.bf16.mxu0 %v4948_v29  ;;  %v721_v40 = vmul.f32 %v5624_v63, %v5944_v4  ;;  %977 = vperm.xlu0 %5238, %v6012_v34  }
 0x14c   : > { %1289 = vperm.xlu1 %5205, %v5514_v24   ;;  %v1684_v6 = vpack.c.bf16 %v1630_v58, %v1629_v46  ;;  %v4947_v24 = vcombine.low %v2261_v37, %v2265_v31  ;;  %v5978_v42 = vpop.permute.xlu0 %949  ;;  %v7682_v58 = vld [vmem:[#allocation6_spill] sm:$0xff] }
 0x14d   : > { %v846_v23 = vpop.permute.xlu1 %845 }
 0x14e   : > { %5045 = vmatmul.mubr.msk.bf16.gmra.mrb[16].mxu0 %vm1746_vm0, %v1684_v6  ;;  %v1044_v13 = vmul.f32 %v5612_v60, %v846_v23  ;;  %v1109_v6 = vadd.f32 %v1045_v36, %v721_v40 }
 0x14f   : > { %3016 = vmatpush1.bf16.msra.mxu0 %v4947_v24  ;;  %v7683_v24 = vld [vmem:[#allocation9_spill] sm:$0xff] }
 0x150   : > { %1293 = vperm.xlu1 %5205, %v5899_v7   ;;  %3017 = vmatprep.subr.bf16.mxu0 %v4956_v0  ;;  %v2277_v7 = vld [vmem:[%s7646_s5 + $0x188] sm:$0xff]  ;;  %v1234_v39 = vpop.permute.xlu0 %1233  ;;  %v1108_v11 = vadd.f32 %v1044_v13, %v720_v20  ;;  %v6028_v13 = vld [vmem:[%s5446_s19 + $0x1b0] sm:$0xff] }
 0x151   : > { %v4964_v8 = vcombine.high %v2277_v7, %v2281_v45  ;;  %v4963_v25 = vcombine.low %v2277_v7, %v2281_v45  ;;  %v1432_v35 = vmul.f32 %v5620_v62, %v1234_v39  ;;  %981 = vperm.xlu0 %5238, %v6028_v13  }
 0x152   : > { %v489_v19 = vpop.permute.xlu1 %488 }
 0x153   : > { %3018 = vmatpush1.bf16.msra.mxu0 %v4955_v56  ;;  %v1496_v21 = vadd.f32 %v1432_v35, %v1108_v11  ;;  %v722_v4 = vmul.f32 %v5624_v63, %v489_v19  ;;  %v351_v11 = vld [vmem:[%s5446_s19 + $0x140] sm:$0xff] }
 0x154   : > { %5206 = vset.pattern.permute.xlu1 %v7679_v48  ;;  %3019 = vmatprep.subr.bf16.mxu0 %v4964_v8  ;;  %v1246_v28 = vpop.permute.xlu0 %1245 }
 0x155   : > { %563 = vperm.xlu1 %5206, %v5575_v43   ;;  %v1435_v46 = vmul.f32 %v5620_v62, %v1246_v28  ;;  %v1567_v37 = vadd.f32 %v5642_v18, %v1496_v21  ;;  %v1110_v57 = vadd.f32 %v1046_v15, %v722_v4  ;;  %997 = vperm.xlu0 %5238, %v5957_v61   ;;  %v7685_v21 = vld [vmem:[#allocation11_spill] sm:$0xff] }
 0x156   : > { %v494_v3 = vpop.permute.xlu1 %493 }
 0x157   : > { %3020 = vmatpush1.bf16.msra.mxu0 %v4963_v25  ;;  %v1631_v56 = vmax.f32 %v1567_v37, 0.0 }
 0x158   : > { %3021 = vmatprep.subr.bf16.mxu0 %v4972_v53 }
 0x159   : > { %5207 = vset.pattern.permute.xlu1 %v7680_v41 }
 0x15a   : > { %909 = vperm.xlu1 %5207, %v5684_v17   ;;  %v723_v17 = vmul.f32 %v5624_v63, %v494_v3 }
 0x15b   : > { %v858_v49 = vpop.permute.xlu1 %857  ;;  %3022 = vmatpush1.bf16.msra.mxu0 %v4971_v38 }
 0x15c   : > { %v1047_v2 = vmul.f32 %v5612_v60, %v858_v49  ;;  %v7684_v49 = vld [vmem:[#allocation10_spill] sm:$0xff] }
 0x15d   : > { %v725_v38 = vmul.f32 %v5624_v63, %v7684_v49 }
 0x15e   : > { %5208 = vset.pattern.permute.xlu1 %v7679_v48  ;;  %v1111_v55 = vadd.f32 %v1047_v2, %v723_v17  ;;  %v1254_v2 = vpop.permute.xlu0 %1253 }
 0x15f   : > { %568 = vperm.xlu1 %5208, %v7682_v58   ;;  %v1437_v36 = vmul.f32 %v5620_v62, %v1254_v2 }
 0x160   : > { %v1238_v10 = vpop.permute.xlu1 %1237  ;;  %v1499_v31 = vadd.f32 %v1435_v46, %v1111_v55  ;;  %v726_v55 = vmul.f32 %v5624_v63, %v7685_v21  ;;  %v1050_v46 = vmul.f32 %v5612_v60, %v5863_v22 }
 0x161   : > { %v1433_v23 = vmul.f32 %v5620_v62, %v1238_v10 }
 0x162   : > { %v1570_v19 = vadd.f32 %v5642_v18, %v1499_v31  ;;  %v1114_v37 = vadd.f32 %v1050_v46, %v726_v55  ;;  %v6076_v55 = vld [vmem:[%s5446_s19 + $0x1e8] sm:$0xff] }
 0x163   : > { %v1497_v29 = vadd.f32 %v1433_v23, %v1109_v6  ;;  %573 = vperm.xlu1 %5208, %v7683_v24   ;;  %v354_v6 = vld [vmem:[%s5446_s19 + $0x158] sm:$0xff]  ;;  %1009 = vperm.xlu0 %5238, %v6076_v55  }
 0x164   : > { %v1242_v51 = vpop.permute.xlu1 %1241  ;;  %v1634_v25 = vmax.f32 %v1570_v19, 0.0 }
 0x165   : > { %v1568_v0 = vadd.f32 %v5642_v18, %v1497_v29  ;;  %v1434_v26 = vmul.f32 %v5620_v62, %v1242_v51 }
 0x167   : > { %v1632_v7 = vmax.f32 %v1568_v0, 0.0  ;;  %v1498_v45 = vadd.f32 %v1434_v26, %v1110_v57  ;;  %5209 = vset.pattern.permute.xlu1 %v7680_v41 }
 0x168   : > { %921 = vperm.xlu1 %5209, %v7683_v24  }
 0x169   : > { %v1569_v3 = vadd.f32 %v5642_v18, %v1498_v45  ;;  %v499_v8 = vpop.permute.xlu1 %498  ;;  %v1685_v20 = vpack.c.bf16 %v1632_v7, %v1631_v56 }
 0x16b   : > { %v1633_v39 = vmax.f32 %v1569_v3, 0.0  ;;  %5048 = vmatprep.mubr.msk.bf16.mxu0 %vm1746_vm0, %v1685_v20 }
 0x16c   : > { %5210 = vset.pattern.permute.xlu1 %v7681_v50 }
 0x16d   : > { %1301 = vperm.xlu1 %5210, %v5575_v43   ;;  %v1686_v47 = vpack.c.bf16 %v1634_v25, %v1633_v39 }
 0x16e   : > { %v862_v54 = vpop.permute.xlu1 %861 }
 0x16f   : > { %5049 = vmatmul.mubr.msk.bf16.gmra.mrb[20].mxu0 %vm1746_vm0, %v1686_v47  ;;  %v1048_v17 = vmul.f32 %v5612_v60, %v862_v54 }
 0x171   : > { %1305 = vperm.xlu1 %5210, %v7682_v58   ;;  %v724_v58 = vmul.f32 %v5624_v63, %v499_v8 }
 0x172   : > { %v866_v53 = vpop.permute.xlu1 %865 }
 0x173   : > { %v1049_v43 = vmul.f32 %v5612_v60, %v866_v53  ;;  %v1112_v4 = vadd.f32 %v1048_v17, %v724_v58  ;;  %v1053_v58 = vmul.f32 %v5612_v60, %v5869_v59  ;;  %v1054_v59 = vmul.f32 %v5612_v60, %v5876_v32  ;;  %v6103_v32 = vld [vmem:[%s7643_s2] ss:$0 sm:$0xff] }
 0x175   : > { %5211 = vset.pattern.permute.xlu1 %v7679_v48  ;;  %v1113_v28 = vadd.f32 %v1049_v43, %v725_v38  ;;  %v7686_v38 = vld [vmem:[#allocation8_spill] sm:$0xff]  ;;  %v1266_v43 = vpop.permute.xlu0 %1265 }
 0x176   : > { %578 = vperm.xlu1 %5211, %v351_v11   ;;  %v1440_v17 = vmul.f32 %v5620_v62, %v1266_v43 }
 0x177   : > { %v514_v35 = vpop.permute.xlu1 %513  ;;  %v1501_v10 = vadd.f32 %v1437_v36, %v1113_v28  ;;  %v7687_v28 = vld [vmem:[#allocation13_spill] sm:$0xff] }
 0x178   : > { %v727_v0 = vmul.f32 %v5624_v63, %v514_v35 }
 0x179   : > { %v1572_v31 = vadd.f32 %v5642_v18, %v1501_v10 }
 0x17a   : > { %5212 = vset.pattern.permute.xlu1 %v7680_v41 }
 0x17b   : > { %925 = vperm.xlu1 %5212, %v351_v11   ;;  %v1636_v57 = vmax.f32 %v1572_v31, 0.0  ;;  %v6088_v31 = vld [vmem:[%s5446_s19 + $0x1f0] sm:$0xff] }
 0x17c   : > { %v874_v40 = vpop.permute.xlu1 %873  ;;  %1013 = vperm.xlu0 %5238, %v6088_v31  }
 0x17d   : > { %v1051_v24 = vmul.f32 %v5612_v60, %v874_v40 }
 0x17f   : > { %929 = vperm.xlu1 %5212, %v5699_v12   ;;  %v1115_v7 = vadd.f32 %v1051_v24, %v727_v0 }
 0x180   : > { %5243 = vset.pattern.permute.xlu0 %v7681_v50 }
 0x181   : > { %v1250_v15 = vpop.permute.xlu1 %1249  ;;  %1393 = vperm.xlu0 %5243, %v5969_v9  }
 0x182   : > { %v1436_v23 = vmul.f32 %v5620_v62, %v1250_v15 }
 0x183   : > { %5213 = vset.pattern.permute.xlu1 %v7679_v48 }
 0x184   : > { %v1500_v12 = vadd.f32 %v1436_v23, %v1112_v4  ;;  %593 = vperm.xlu1 %5213, %v354_v6  }
 0x185   : > { %v1258_v29 = vpop.permute.xlu1 %1257 }
 0x186   : > { %v1571_v22 = vadd.f32 %v5642_v18, %v1500_v12  ;;  %v1438_v51 = vmul.f32 %v5620_v62, %v1258_v29 }
 0x188   : > { %v1635_v26 = vmax.f32 %v1571_v22, 0.0  ;;  %v1502_v56 = vadd.f32 %v1438_v51, %v1114_v37  ;;  %5214 = vset.pattern.permute.xlu1 %v7680_v41  ;;  %v5249_v37 = vld [vmem:[%s5446_s19 + $0x170] sm:$0xff] }
 0x189   : > { %937 = vperm.xlu1 %5214, %v354_v6   ;;  %v1262_v19 = vpop.permute.xlu1 %1261 }
 0x18a   : > { %v1439_v45 = vmul.f32 %v5620_v62, %v1262_v19  ;;  %v1687_v3 = vpack.c.bf16 %v1636_v57, %v1635_v26  ;;  %v1573_v8 = vadd.f32 %v5642_v18, %v1502_v56  ;;  %v7688_v26 = vld [vmem:[#allocation12_spill] sm:$0xff] }
 0x18c   : > { %v1503_v20 = vadd.f32 %v1439_v45, %v1115_v7  ;;  %5052 = vmatprep.mubr.msk.bf16.mxu0 %vm1746_vm0, %v1687_v3  ;;  %v1637_v47 = vmax.f32 %v1573_v8, 0.0 }
 0x18d   : > { %5215 = vset.pattern.permute.xlu1 %v7681_v50 }
 0x18e   : > { %v1574_v25 = vadd.f32 %v5642_v18, %v1503_v20  ;;  %1313 = vperm.xlu1 %5215, %v351_v11   ;;  %v524_v39 = vpop.permute.xlu1 %523  ;;  %v728_v11 = vmul.f32 %v5624_v63, %v7687_v28  ;;  %v6118_v28 = vld [vmem:[%s5446_s19 + $0x1f8] sm:$0xff] }
 0x18f   : > { %v729_v10 = vmul.f32 %v5624_v63, %v524_v39  ;;  %1405 = vperm.xlu0 %5243, %v6118_v28  }
 0x190   : > { %v1638_v54 = vmax.f32 %v1574_v25, 0.0 }
 0x191   : > { %v1117_v29 = vadd.f32 %v1053_v58, %v729_v10 }
 0x192   : > { %1321 = vperm.xlu1 %5215, %v5593_v52   ;;  %v1688_v53 = vpack.c.bf16 %v1638_v54, %v1637_v47  ;;  %v1278_v52 = vpop.permute.xlu0 %1277 }
 0x193   : > { %v878_v35 = vpop.permute.xlu1 %877  ;;  %v1443_v23 = vmul.f32 %v5620_v62, %v1278_v52  ;;  %v359_v52 = vld [vmem:[%s5446_s19 + $0x180] sm:$0xff] }
 0x194   : > { %5053 = vmatmul.mubr.msk.bf16.gmra.mrb[24].mxu0 %vm1746_vm0, %v1688_v53  ;;  %v1052_v36 = vmul.f32 %v5612_v60, %v878_v35 }
 0x196   : > { %1325 = vperm.xlu1 %5215, %v354_v6   ;;  %v1116_v40 = vadd.f32 %v1052_v36, %v728_v11  ;;  %v1286_v15 = vpop.permute.xlu0 %1285 }
 0x197   : > { %v1445_v10 = vmul.f32 %v5620_v62, %v1286_v15 }
 0x198   : > { %v529_v49 = vpop.permute.xlu1 %528  ;;  %v1504_v6 = vadd.f32 %v1440_v17, %v1116_v40 }
 0x199   : > { %v730_v24 = vmul.f32 %v5624_v63, %v529_v49 }
 0x19a   : > { %5216 = vset.pattern.permute.xlu1 %v7679_v48  ;;  %v1575_v51 = vadd.f32 %v5642_v18, %v1504_v6  ;;  %v6097_v19 = vpop.permute.xlu0 %1297 }
 0x19b   : > { %603 = vperm.xlu1 %5216, %v7686_v38   ;;  %v1118_v7 = vadd.f32 %v1054_v59, %v730_v24  ;;  %v5251_v38 = vld [vmem:[%s5446_s19 + $0x168] sm:$0xff] }
 0x19c   : > { %v534_v2 = vpop.permute.xlu1 %533  ;;  %v1639_v18 = vmax.f32 %v1575_v51, 0.0  ;;  %v7690_v24 = vld [vmem:[#allocation15_spill] sm:$0xff]  ;;  %v1058_v51 = vmul.f32 %v5612_v60, %v5884_v5 }
 0x19e   : > { %v6112_v53 = vpop.permute.xlu0 %1309 }
 0x19f   : > { %5217 = vset.pattern.permute.xlu1 %v7680_v41 }
 0x1a0   : > { %941 = vperm.xlu1 %5217, %v5707_v14   ;;  %v731_v14 = vmul.f32 %v5624_v63, %v534_v2 }
 0x1a1   : > { %v890_v21 = vpop.permute.xlu1 %889 }
 0x1a2   : > { %v1055_v46 = vmul.f32 %v5612_v60, %v890_v21  ;;  %v6122_v11 = vpop.permute.xlu0 %1317 }
 0x1a4   : > { %5218 = vset.pattern.permute.xlu1 %v7679_v48  ;;  %v1119_v4 = vadd.f32 %v1055_v46, %v731_v14  ;;  %v7689_v46 = vld [vmem:[#allocation14_spill] sm:$0xff] }
 0x1a5   : > { %608 = vperm.xlu1 %5218, %v5249_v37   ;;  %v733_v58 = vmul.f32 %v5624_v63, %v7689_v46 }
 0x1a6   : > { %v1270_v12 = vpop.permute.xlu1 %1269  ;;  %v1507_v57 = vadd.f32 %v1443_v23, %v1119_v4  ;;  %v6127_v40 = vpop.permute.xlu0 %1329 }
 0x1a7   : > { %v1441_v22 = vmul.f32 %v5620_v62, %v1270_v12 }
 0x1a8   : > { %v1578_v8 = vadd.f32 %v6103_v32, %v1507_v57 }
 0x1a9   : > { %v1505_v0 = vadd.f32 %v1441_v22, %v1117_v29  ;;  %613 = vperm.xlu1 %5218, %v7688_v26   ;;  %v362_v29 = vld [vmem:[%s5446_s19 + $0x198] sm:$0xff]  ;;  %v734_v22 = vmul.f32 %v5624_v63, %v7690_v24 }
 0x1aa   : > { %v1274_v56 = vpop.permute.xlu1 %1273  ;;  %v1642_v35 = vmax.f32 %v1578_v8, 0.0  ;;  %v6134_v4 = vpop.permute.xlu0 %1341 }
 0x1ab   : > { %v1576_v45 = vadd.f32 %v6103_v32, %v1505_v0  ;;  %v1442_v3 = vmul.f32 %v5620_v62, %v1274_v56 }
 0x1ad   : > { %v1640_v20 = vmax.f32 %v1576_v45, 0.0  ;;  %v1506_v25 = vadd.f32 %v1442_v3, %v1118_v7  ;;  %5220 = vset.pattern.permute.xlu1 %v7680_v41  ;;  %v1122_v7 = vadd.f32 %v1058_v51, %v734_v22 }
 0x1ae   : > { %953 = vperm.xlu1 %5220, %v7688_v26   ;;  %v6145_v0 = vpop.permute.xlu0 %1349 }
 0x1af   : > { %v1577_v39 = vadd.f32 %v6103_v32, %v1506_v25  ;;  %v539_v47 = vpop.permute.xlu1 %538  ;;  %v1689_v54 = vpack.c.bf16 %v1640_v20, %v1639_v18 }
 0x1b1   : > { %v1641_v49 = vmax.f32 %v1577_v39, 0.0  ;;  %5056 = vmatprep.mubr.msk.bf16.mxu0 %vm1746_vm0, %v1689_v54 }
 0x1b2   : > { %5221 = vset.pattern.permute.xlu1 %v7681_v50  ;;  %v6153_v20 = vpop.permute.xlu0 %1361 }
 0x1b3   : > { %1333 = vperm.xlu1 %5221, %v5251_v38   ;;  %v1690_v43 = vpack.c.bf16 %v1642_v35, %v1641_v49 }
 0x1b4   : > { %v894_v2 = vpop.permute.xlu1 %893 }
 0x1b5   : > { %5057 = vmatmul.mubr.msk.bf16.gmra.mrb[28].mxu0 %vm1746_vm0, %v1690_v43  ;;  %v1056_v23 = vmul.f32 %v5612_v60, %v894_v2 }
 0x1b6   : > { %3039 = vmatprep.mubr.bf16.mxu0 %v7679_v48 }
 0x1b7   : > { %1337 = vperm.xlu1 %5221, %v5249_v37   ;;  %v732_v37 = vmul.f32 %v5624_v63, %v539_v47 }
 0x1b8   : > { %v898_v36 = vpop.permute.xlu1 %897 }
 0x1b9   : > { %v1057_v21 = vmul.f32 %v5612_v60, %v898_v36  ;;  %v1120_v15 = vadd.f32 %v1056_v23, %v732_v37  ;;  %v6161_v36 = vpop.permute.xlu0 %1373 }
 0x1bb   : > { %5222 = vset.pattern.permute.xlu1 %v7679_v48  ;;  %v1121_v14 = vadd.f32 %v1057_v21, %v733_v58  ;;  %v6166_v21 = vld [vmem:[%s7645_s4] ss:$0 sm:$0xff] }
 0x1bc   : > { %618 = vperm.xlu1 %5222, %v359_v52  }
 0x1bd   : > { %v554_v17 = vpop.permute.xlu1 %553  ;;  %v1509_v12 = vadd.f32 %v1445_v10, %v1121_v14  ;;  %v6172_v22 = vpop.permute.xlu0 %1381 }
 0x1be   : > { %v735_v5 = vmul.f32 %v5624_v63, %v554_v17 }
 0x1c0   : > { %5223 = vset.pattern.permute.xlu1 %v7680_v41 }
 0x1c1   : > { %957 = vperm.xlu1 %5223, %v359_v52  }
 0x1c2   : > { %v906_v6 = vpop.permute.xlu1 %905 }
 0x1c3   : > { %v1059_v45 = vmul.f32 %v5612_v60, %v906_v6 }
 0x1c5   : > { %961 = vperm.xlu1 %5223, %v5724_v33   ;;  %v1580_v33 = vadd.f32 %v6103_v32, %v1509_v12  ;;  %v1123_v54 = vadd.f32 %v1059_v45, %v735_v5  ;;  %v559_v5 = vpop.permute.xlu0 %558 }
 0x1c7   : > { %v1282_v59 = vpop.permute.xlu1 %1281  ;;  %v1644_v39 = vmax.f32 %v1580_v33, 0.0 }
 0x1c8   : > { %v1444_v57 = vmul.f32 %v5620_v62, %v1282_v59 }
 0x1c9   : > { %5224 = vset.pattern.permute.xlu1 %v7679_v48 }
 0x1ca   : > { %v1508_v26 = vadd.f32 %v1444_v57, %v1120_v15  ;;  %633 = vperm.xlu1 %5224, %v362_v29  }
 0x1cb   : > { %v1290_v56 = vpop.permute.xlu1 %1289 }
 0x1cc   : > { %v1446_v3 = vmul.f32 %v5620_v62, %v1290_v56  ;;  %v1579_v18 = vadd.f32 %v6103_v32, %v1508_v26 }
 0x1ce   : > { %v1510_v8 = vadd.f32 %v1446_v3, %v1122_v7  ;;  %5225 = vset.pattern.permute.xlu1 %v7680_v41  ;;  %v1643_v25 = vmax.f32 %v1579_v18, 0.0 }
 0x1cf   : > { %969 = vperm.xlu1 %5225, %v362_v29   ;;  %v1294_v47 = vpop.permute.xlu1 %1293 }
 0x1d0   : > { %v1447_v35 = vmul.f32 %v5620_v62, %v1294_v47  ;;  %v1691_v49 = vpack.c.bf16 %v1644_v39, %v1643_v25  ;;  %v1581_v38 = vadd.f32 %v6103_v32, %v1510_v8 }
 0x1d2   : > { %v1511_v43 = vadd.f32 %v1447_v35, %v1123_v54  ;;  %5060 = vmatprep.mubr.msk.bf16.mxu1 %vm1746_vm0, %v1691_v49  ;;  %v1645_v46 = vmax.f32 %v1581_v38, 0.0  ;;  %v736_v35 = vmul.f32 %v5624_v63, %v559_v5 }
 0x1d3   : > { %5226 = vset.pattern.permute.xlu1 %v7681_v50 }
 0x1d4   : > { %v1582_v2 = vadd.f32 %v6103_v32, %v1511_v43  ;;  %1345 = vperm.xlu1 %5226, %v359_v52   ;;  %v564_v17 = vpop.permute.xlu1 %563 }
 0x1d6   : > { %v1646_v58 = vmax.f32 %v1582_v2, 0.0  ;;  %v5030_v10 = vpop.f32.mrb[0].mxu0 }
 0x1d7   : > { %v1886_v14 = vadd.f32 %v5030_v10, %v6166_v21  ;;  %v1877_v6 = vpop.f32.mrb[1].mxu0 }
 0x1d8   : > { %v1878_v23 = vadd.f32 %v6166_v21, %v1877_v6  ;;  %v5031_v37 = vpop.f32.mrb[2].mxu0  ;;  %1353 = vperm.xlu1 %5226, %v5917_v1   ;;  %v1692_v12 = vpack.c.bf16 %v1646_v58, %v1645_v46  ;;  %v5252_v6 = vld [vmem:[%s5446_s19 + $0x1a0] sm:$0xff] }
 0x1d9   : > { %v1889_v52 = vadd.f32 %v5031_v37, %v6166_v21  ;;  %v1880_v59 = vpop.f32.mrb[3].mxu0  ;;  %v910_v24 = vpop.permute.xlu1 %909  ;;  %v2134_v15 = vmax.f32 %v1886_v14, 0.0 }
 0x1da   : > { %v1881_v51 = vadd.f32 %v6166_v21, %v1880_v59  ;;  %5061 = vmatmul.mubr.msk.bf16.vlgmr.msra.gmra.mrb[0].mxu1 %vm1746_vm0, %v1692_v12  ;;  %v2132_v26 = vmax.f32 %v1878_v23, 0.0  ;;  %v1060_v49 = vmul.f32 %v5612_v60, %v910_v24  ;;  %v1448_v23 = vmul.f32 %v5620_v62, %v6097_v19 }
 0x1db   : > { %v2135_v57 = vmax.f32 %v1889_v52, 0.0 }
 0x1dc   : > { %v2133_v33 = vmax.f32 %v1881_v51, 0.0  ;;  %1357 = vperm.xlu1 %5226, %v362_v29   ;;  %v1124_v37 = vadd.f32 %v1060_v49, %v736_v35 }
 0x1dd   : > { %v6176_v56 = vpack.c.bf16 %v2135_v57, %v2134_v15  ;;  %v1061_v57 = vmul.f32 %v5612_v60, %v5896_v27 }
 0x1de   : > { %v6178_v7 = vpack.c.bf16 %v2133_v33, %v2132_v26  ;;  %v5034_v1 = vpop.f32.mrb[4].mxu0  ;;  %v569_v45 = vpop.permute.xlu1 %568  ;;  %v737_v26 = vmul.f32 %v5624_v63, %v564_v17  ;;  %v1512_v5 = vadd.f32 %v1448_v23, %v1124_v37  ;;  %v1062_v17 = vmul.f32 %v5612_v60, %v5913_v16 }
 0x1df   : > { %v1902_v3 = vadd.f32 %v5034_v1, %v6166_v21  ;;  %v1893_v18 = vpop.f32.mrb[5].mxu0 }
 0x1e0   : > { %v1894_v8 = vadd.f32 %v6166_v21, %v1893_v18  ;;  %v5035_v25 = vpop.f32.mrb[6].mxu0  ;;  %5227 = vset.pattern.permute.xlu1 %v7679_v48  ;;  %3040 = vmatmul.mubr.bf16.vlgmr.msra.gmra.mrb[32].mxu0 %v6178_v7 }
 0x1e1   : > { %v1905_v39 = vadd.f32 %v5035_v25, %v6166_v21  ;;  %v1896_v29 = vpop.f32.mrb[7].mxu0  ;;  %643 = vperm.xlu1 %5227, %v6012_v34   ;;  %3049 = vmatprep.mubr.bf16.mxu0 %v7679_v48  ;;  %v2138_v38 = vmax.f32 %v1902_v3, 0.0  ;;  %v1451_v3 = vmul.f32 %v5620_v62, %v6112_v53  ;;  %v738_v53 = vmul.f32 %v5624_v63, %v569_v45 }
 0x1e2   : > { %v1897_v47 = vadd.f32 %v6166_v21, %v1896_v29  ;;  %v574_v54 = vpop.permute.xlu1 %573  ;;  %v2136_v2 = vmax.f32 %v1894_v8, 0.0 }
 0x1e3   : > { %v2139_v43 = vmax.f32 %v1905_v39, 0.0  ;;  %v739_v33 = vmul.f32 %v5624_v63, %v574_v54  ;;  %v1125_v54 = vadd.f32 %v1061_v57, %v737_v26 }
 0x1e4   : > { %v2137_v46 = vmax.f32 %v1897_v47, 0.0 }
 0x1e5   : > { %v6190_v58 = vpack.c.bf16 %v2139_v43, %v2138_v38  ;;  %5228 = vset.pattern.permute.xlu1 %v7680_v41  ;;  %v1583_v43 = vadd.f32 %v6103_v32, %v1512_v5 }
 0x1e6   : > { %v6193_v10 = vpack.c.bf16 %v2137_v46, %v2136_v2  ;;  %v5038_v14 = vpop.f32.mrb[8].mxu0  ;;  %973 = vperm.xlu1 %5228, %v5252_v6   ;;  %v1126_v6 = vadd.f32 %v1062_v17, %v738_v53 }
 0x1e7   : > { %v1918_v12 = vadd.f32 %v5038_v14, %v6166_v21  ;;  %v1909_v52 = vpop.f32.mrb[9].mxu0  ;;  %v922_v59 = vpop.permute.xlu1 %921  ;;  %v5253_v14 = vld [vmem:[%s5446_s19 + $0x1b8] sm:$0xff]  ;;  %v1647_v37 = vmax.f32 %v1583_v43, 0.0 }
 0x1e8   : > { %v1910_v24 = vadd.f32 %v6166_v21, %v1909_v52  ;;  %v1063_v51 = vmul.f32 %v5612_v60, %v922_v59  ;;  %v5039_v15 = vpop.f32.mrb[10].mxu0  ;;  %3050 = vmatmul.mubr.bf16.gmra.mrb[36].mxu0 %v6176_v56 }
 0x1e9   : > { %v1921_v19 = vadd.f32 %v5039_v15, %v6166_v21  ;;  %v1912_v1 = vpop.f32.mrb[11].mxu0  ;;  %3059 = vmatprep.mubr.bf16.mxu0 %v7679_v48  ;;  %v2142_v8 = vmax.f32 %v1918_v12, 0.0 }
 0x1ea   : > { %v1913_v18 = vadd.f32 %v6166_v21, %v1912_v1  ;;  %5229 = vset.pattern.permute.xlu1 %v7679_v48  ;;  %v1127_v27 = vadd.f32 %v1063_v51, %v739_v33  ;;  %v2140_v39 = vmax.f32 %v1910_v24, 0.0 }
 0x1eb   : > { %v2143_v25 = vmax.f32 %v1921_v19, 0.0  ;;  %648 = vperm.xlu1 %5229, %v6028_v13  }
 0x1ec   : > { %v2141_v29 = vmax.f32 %v1913_v18, 0.0  ;;  %v1302_v47 = vpop.permute.xlu1 %1301  ;;  %v1515_v2 = vadd.f32 %v1451_v3, %v1127_v27 }
 0x1ed   : > { %v6216_v35 = vpack.c.bf16 %v2143_v25, %v2142_v8  ;;  %v1449_v49 = vmul.f32 %v5620_v62, %v1302_v47 }
 0x1ee   : > { %v6219_v38 = vpack.c.bf16 %v2141_v29, %v2140_v39  ;;  %v1586_v12 = vadd.f32 %v6103_v32, %v1515_v2  ;;  %v6241_v39 = vld [vmem:[%s5446_s19 + $0x1c0] sm:$0xff] }
 0x1ef   : > { %v1513_v46 = vadd.f32 %v1449_v49, %v1125_v54  ;;  %653 = vperm.xlu1 %5229, %v5253_v14  }
 0x1f0   : > { %3060 = vmatmul.mubr.bf16.gmra.mrb[40].mxu0 %v6193_v10  ;;  %v1306_v16 = vpop.permute.xlu1 %1305  ;;  %v1650_v57 = vmax.f32 %v1586_v12, 0.0 }
 0x1f1   : > { %v1584_v23 = vadd.f32 %v6103_v32, %v1513_v46  ;;  %v1450_v45 = vmul.f32 %v5620_v62, %v1306_v16  ;;  %3069 = vmatprep.mubr.bf16.mxu0 %v7679_v48  ;;  %v1453_v16 = vmul.f32 %v5620_v62, %v6122_v11  ;;  %v1066_v11 = vmul.f32 %v5612_v60, %v5938_v44 }
 0x1f3   : > { %v1648_v52 = vmax.f32 %v1584_v23, 0.0  ;;  %v1514_v59 = vadd.f32 %v1450_v45, %v1126_v6  ;;  %5230 = vset.pattern.permute.xlu1 %v7680_v41 }
 0x1f4   : > { %985 = vperm.xlu1 %5230, %v5253_v14  }
 0x1f5   : > { %v1693_v24 = vpack.c.bf16 %v1648_v52, %v1647_v37  ;;  %v1585_v51 = vadd.f32 %v6103_v32, %v1514_v59  ;;  %v579_v15 = vpop.permute.xlu1 %578  ;;  %v5254_v52 = vld [vmem:[%s5446_s19 + $0x1c8] sm:$0xff] }
 0x1f6   : > { %v740_v59 = vmul.f32 %v5624_v63, %v579_v15 }
 0x1f7   : > { %v1649_v26 = vmax.f32 %v1585_v51, 0.0  ;;  %5064 = vmatprep.mubr.msk.bf16.mxu1 %vm1746_vm0, %v1693_v24  ;;  %v370_v51 = vld [vmem:[%s5446_s19 + $0x1d8] sm:$0xff]  ;;  %s5344_s19 = smov [#allocation3]  }
 0x1f8   : > { %5231 = vset.pattern.permute.xlu1 %v7681_v50  ;;  %3070 = vmatmul.mubr.bf16.gmra.mrb[44].mxu0 %v6190_v58  ;;  %s5264_s20 = sshll.u32 %s5344_s19, 4  ;;  %s5265_s20 = int_to_ptr.vmem [resolvable:$false] %s5264_s20 }
 0x1f9   : > { %v1694_v33 = vpack.c.bf16 %v1650_v57, %v1649_v26  ;;  %1365 = vperm.xlu1 %5231, %v6012_v34   ;;  %3079 = vmatprep.mubr.bf16.mxu0 %v7679_v48  ;;  %s5266_s21 = scalar_lea.vmem %s5265_s20, 512  ;;  %p5267_p1 = scmp.lt.s32.totalorder %s7593_s12, %s5265_s20 }
 0x1fa   : > { %v926_v19 = vpop.permute.xlu1 %925  ;;  %p5268_p2 = scmp.lt.s32.totalorder %s5266_s21, %s5260_s27 }
 0x1fb   : > { %5065 = vmatmul.mubr.msk.bf16.gmra.mrb[4].mxu1 %vm1746_vm0, %v1694_v33  ;;  %v1064_v45 = vmul.f32 %v5612_v60, %v926_v19 }
 0x1fc   : > { %v5042_v1 = vpop.f32.mrb[12].mxu0  ;;  %p5269_p3 = por %p5268_p2, %p5267_p1 }
 0x1fd   : > { %v1934_v3 = vadd.f32 %v5042_v1, %v6166_v21  ;;  %v1925_v18 = vpop.f32.mrb[13].mxu0  ;;  %1369 = vperm.xlu1 %5231, %v6028_v13   ;;  %v584_v13 = vpop.permute.xlu0 %583  ;;  %v1128_v26 = vadd.f32 %v1064_v45, %v740_v59 }
 0x1fe   : > { %v1926_v5 = vadd.f32 %v6166_v21, %v1925_v18  ;;  %v5043_v8 = vpop.f32.mrb[14].mxu0  ;;  %v930_v27 = vpop.permute.xlu1 %929  ;;  %v741_v49 = vmul.f32 %v5624_v63, %v584_v13  ;;  %p5270_p5 = pnand %p5269_p3, %p5263_p0 }
 0x1ff   : > { %v1937_v25 = vadd.f32 %v5043_v8, %v6166_v21  ;;  %v1928_v17 = vpop.f32.mrb[15].mxu0  ;;  %v2146_v29 = vmax.f32 %v1934_v3, 0.0  ;;  %v1065_v2 = vmul.f32 %v5612_v60, %v930_v27 }
 0x200   : > { %v1929_v34 = vadd.f32 %v6166_v21, %v1928_v17  ;;  %3080 = vmatmul.mubr.bf16.gmra.mrb[48].mxu0 %v6219_v38  ;;  %v2144_v54 = vmax.f32 %v1926_v5, 0.0  ;;  %v2232_v17 = vld [vmem:[%s7646_s5 + $0x20] sm:$0xff] }
 0x201   : > { %v2147_v47 = vmax.f32 %v1937_v25, 0.0  ;;  %5232 = vset.pattern.permute.xlu1 %v7679_v48  ;;  %3089 = vmatprep.mubr.bf16.mxu0 %v7679_v48  ;;  %v1129_v6 = vadd.f32 %v1065_v2, %v741_v49  ;;  %v589_v37 = vpop.permute.xlu0 %588  ;;  %v2228_v25 = vld [vmem:[%s7646_s5] sm:$0xff] }
 0x202   : > { %v2145_v53 = vmax.f32 %v1929_v34, 0.0  ;;  %658 = vperm.xlu1 %5232, %v6241_v39   ;;  %v742_v57 = vmul.f32 %v5624_v63, %v589_v37  ;;  %v4914_v13 = vcombine.high %v2228_v25, %v2232_v17 }
 0x203   : > { %v6249_v43 = vpack.c.bf16 %v2147_v47, %v2146_v29  ;;  %v594_v46 = vpop.permute.xlu1 %593  ;;  %v1517_v12 = vadd.f32 %v1453_v16, %v1129_v6  ;;  %v4913_v47 = vcombine.low %v2228_v25, %v2232_v17 }
 0x204   : > { %v6252_v14 = vpack.c.bf16 %v2145_v53, %v2144_v54  ;;  %v1130_v15 = vadd.f32 %v1066_v11, %v742_v57  ;;  %v743_v27 = vmul.f32 %v5624_v63, %v594_v46  ;;  %2654 = vmatprep.subr.bf16.mxu1 %v4914_v13  ;;  %v2236_v57 = vld [vmem:[%s7646_s5 + $0x40] sm:$0xff] }
 0x205   : > { %v1588_v1 = vadd.f32 %v6103_v32, %v1517_v12  ;;  %2655 = vmatpush1.bf16.msra.mxu1 %v4913_v47  ;;  %v2244_v13 = vld [vmem:[%s7646_s5 + $0x80] sm:$0xff] }
 0x206   : > { %5233 = vset.pattern.permute.xlu1 %v7680_v41 }
 0x207   : > { %989 = vperm.xlu1 %5233, %v6241_v39   ;;  %v1652_v8 = vmax.f32 %v1588_v1, 0.0 }
 0x208   : > { %3090 = vmatmul.mubr.bf16.gmra.mrb[52].mxu0 %v6216_v35  ;;  %v938_v23 = vpop.permute.xlu1 %937 }
 0x209   : > { %3099 = vmatprep.mubr.bf16.mxu0 %v7679_v48  ;;  %v1067_v18 = vmul.f32 %v5612_v60, %v938_v23 }
 0x20b   : > { %993 = vperm.xlu1 %5233, %v5254_v52   ;;  %v1131_v53 = vadd.f32 %v1067_v18, %v743_v27 }
 0x20d   : > { %v1314_v24 = vpop.permute.xlu1 %1313 }
 0x20e   : > { %v1452_v33 = vmul.f32 %v5620_v62, %v1314_v24 }
 0x20f   : > { %5234 = vset.pattern.permute.xlu1 %v7679_v48 }
 0x210   : > { %v1516_v19 = vadd.f32 %v1452_v33, %v1128_v26  ;;  %3100 = vmatmul.mubr.bf16.gmra.mrb[56].mxu0 %v6252_v14  ;;  %673 = vperm.xlu1 %5234, %v370_v51  }
 0x211   : > { %v1322_v3 = vpop.permute.xlu1 %1321  ;;  %3109 = vmatprep.mubr.bf16.mxu0 %v7679_v48 }
 0x212   : > { %v1587_v44 = vadd.f32 %v6103_v32, %v1516_v19  ;;  %v1454_v5 = vmul.f32 %v5620_v62, %v1322_v3 }
 0x214   : > { %v1651_v34 = vmax.f32 %v1587_v44, 0.0  ;;  %v1518_v29 = vadd.f32 %v1454_v5, %v1130_v15  ;;  %5235 = vset.pattern.permute.xlu1 %v7680_v41 }
 0x215   : > { %1001 = vperm.xlu1 %5235, %v370_v51   ;;  %v1326_v54 = vpop.permute.xlu1 %1325 }
 0x216   : > { %v1695_v49 = vpack.c.bf16 %v1652_v8, %v1651_v34  ;;  %v1455_v2 = vmul.f32 %v5620_v62, %v1326_v54  ;;  %v1589_v46 = vadd.f32 %v6103_v32, %v1518_v29  ;;  %v2248_v54 = vld [vmem:[%s7646_s5 + $0xa0] sm:$0xff] }
 0x218   : > { %v1519_v16 = vadd.f32 %v1455_v2, %v1131_v53  ;;  %5068 = vmatprep.mubr.msk.bf16.mxu1 %vm1746_vm0, %v1695_v49  ;;  %3110 = vmatmul.mubr.bf16.gmra.mrb[60].mxu0 %v6249_v43  ;;  %v1653_v45 = vmax.f32 %v1589_v46, 0.0  ;;  %v4929_v49 = vcombine.low %v2244_v13, %v2248_v54  ;;  %v4930_v2 = vcombine.high %v2244_v13, %v2248_v54 }
 0x219   : > { %5236 = vset.pattern.permute.xlu1 %v7681_v50  ;;  %3119 = vmatprep.mubr.bf16.mxu0 %v7679_v48  ;;  %v1456_v46 = vmul.f32 %v5620_v62, %v6127_v40 }
 0x21a   : > { %v1590_v6 = vadd.f32 %v6103_v32, %v1519_v16  ;;  %1377 = vperm.xlu1 %5236, %v6241_v39   ;;  %v604_v23 = vpop.permute.xlu1 %603  ;;  %v2240_v39 = vld [vmem:[%s7646_s5 + $0x60] sm:$0xff] }
 0x21b   : > { %v4922_v1 = vcombine.high %v2236_v57, %v2240_v39 }
 0x21c   : > { %v1654_v37 = vmax.f32 %v1590_v6, 0.0 }
 0x21d   : > { %2656 = vmatprep.subr.bf16.mxu1 %v4922_v1 }
 0x21e   : > { %v1696_v12 = vpack.c.bf16 %v1654_v37, %v1653_v45  ;;  %1385 = vperm.xlu1 %5236, %v5957_v61   ;;  %v4921_v61 = vcombine.low %v2236_v57, %v2240_v39  ;;  %v2252_v37 = vld [vmem:[%s7646_s5 + $0xc0] sm:$0xff] }
 0x21f   : > { %v942_v52 = vpop.permute.xlu1 %941 }
 0x220   : > { %5069 = vmatmul.mubr.msk.bf16.gmra.mrb[8].mxu1 %vm1746_vm0, %v1696_v12  ;;  %v1068_v29 = vmul.f32 %v5612_v60, %v942_v52  ;;  %v2256_v12 = vld [vmem:[%s7646_s5 + $0xe0] sm:$0xff] }
 0x221   : > { %v5046_v59 = vpop.f32.mrb[16].mxu0  ;;  %2657 = vmatpush1.bf16.msra.mxu1 %v4921_v61  ;;  %v4938_v40 = vcombine.high %v2252_v37, %v2256_v12 }
 0x222   : > { %v1950_v24 = vadd.f32 %v5046_v59, %v6166_v21  ;;  %v1941_v11 = vpop.f32.mrb[17].mxu0  ;;  %1389 = vperm.xlu1 %5236, %v370_v51   ;;  %v599_v51 = vpop.permute.xlu0 %598  ;;  %2658 = vmatprep.subr.bf16.mxu1 %v4930_v2  ;;  %v4937_v59 = vcombine.low %v2252_v37, %v2256_v12 }
 0x223   : > { %v1942_v26 = vadd.f32 %v6166_v21, %v1941_v11  ;;  %v5047_v33 = vpop.f32.mrb[18].mxu0  ;;  %v744_v34 = vmul.f32 %v5624_v63, %v599_v51  ;;  %v1459_v11 = vmul.f32 %v5620_v62, %v6134_v4 }
 0x224   : > { %v1953_v19 = vadd.f32 %v5047_v33, %v6166_v21  ;;  %v1944_v3 = vpop.f32.mrb[19].mxu0  ;;  %v609_v15 = vpop.permute.xlu1 %608  ;;  %v2150_v44 = vmax.f32 %v1950_v24, 0.0  ;;  %v1069_v24 = vmul.f32 %v5612_v60, %v5953_v30  ;;  %v1070_v30 = vmul.f32 %v5612_v60, %v5978_v42 }
 0x225   : > { %v1945_v18 = vadd.f32 %v6166_v21, %v1944_v3  ;;  %v2148_v8 = vmax.f32 %v1942_v26, 0.0  ;;  %v1132_v16 = vadd.f32 %v1068_v29, %v744_v34  ;;  %2659 = vmatpush1.bf16.msra.mxu1 %v4929_v49  ;;  %v746_v61 = vmul.f32 %v5624_v63, %v609_v15  ;;  %v2264_v15 = vld [vmem:[%s7646_s5 + $0x120] sm:$0xff] }
 0x226   : > { %v2151_v5 = vmax.f32 %v1953_v19, 0.0  ;;  %5239 = vset.pattern.permute.xlu1 %v7679_v48  ;;  %v6319_v53 = vpop.permute.xlu0 %623  ;;  %2660 = vmatprep.subr.bf16.mxu1 %v4938_v40 }
 0x227   : > { %v2149_v27 = vmax.f32 %v1945_v18, 0.0  ;;  %683 = vperm.xlu1 %5239, %v6076_v55   ;;  %v1520_v57 = vadd.f32 %v1456_v46, %v1132_v16  ;;  %v2260_v18 = vld [vmem:[%s7646_s5 + $0x100] sm:$0xff] }
 0x228   : > { %v6305_v25 = vpack.c.bf16 %v2151_v5, %v2150_v44  ;;  %v614_v17 = vpop.permute.xlu1 %613  ;;  %v4945_v44 = vcombine.low %v2260_v18, %v2264_v15  ;;  %v4946_v5 = vcombine.high %v2260_v18, %v2264_v15  ;;  %v749_v18 = vmul.f32 %v5624_v63, %v6319_v53 }
 0x229   : > { %v6309_v47 = vpack.c.bf16 %v2149_v27, %v2148_v8  ;;  %v747_v52 = vmul.f32 %v5624_v63, %v614_v17  ;;  %2661 = vmatpush1.bf16.msra.mxu1 %v4937_v59  ;;  %v1591_v4 = vadd.f32 %v6103_v32, %v1520_v57  ;;  %v1134_v8 = vadd.f32 %v1070_v30, %v746_v61 }
 0x22a   : > { %v6340_v26 = vpop.permute.xlu0 %628  ;;  %2662 = vmatprep.subr.bf16.mxu1 %v4946_v5  ;;  %v2280_v5 = vld [vmem:[%s7646_s5 + $0x1a0] sm:$0xff] }
 0x22b   : > { %3120 = vmatmul.mubr.bf16.gmra.mrb[64].mxu0 %v6309_v47  ;;  %5240 = vset.pattern.permute.xlu1 %v7680_v41  ;;  %v1655_v34 = vmax.f32 %v1591_v4, 0.0 }
 0x22c   : > { %1005 = vperm.xlu1 %5240, %v5969_v9   ;;  %3129 = vmatprep.mubr.bf16.mxu0 %v7679_v48  ;;  %v745_v9 = vmul.f32 %v5624_v63, %v604_v23 }
 0x22d   : > { %v954_v6 = vpop.permute.xlu1 %953  ;;  %2663 = vmatpush1.bf16.msra.mxu1 %v4945_v44  ;;  %v2276_v44 = vld [vmem:[%s7646_s5 + $0x180] sm:$0xff] }
 0x22e   : > { %v1071_v45 = vmul.f32 %v5612_v60, %v954_v6  ;;  %v1133_v33 = vadd.f32 %v1069_v24, %v745_v9  ;;  %v6358_v17 = vpop.permute.xlu0 %638  ;;  %v2272_v9 = vld [vmem:[%s7646_s5 + $0x160] sm:$0xff] }
 0x230   : > { %5241 = vset.pattern.permute.xlu1 %v7679_v48  ;;  %v1135_v39 = vadd.f32 %v1071_v45, %v747_v52 }
 0x231   : > { %688 = vperm.xlu1 %5241, %v6088_v31  }
 0x232   : > { %v1334_v23 = vpop.permute.xlu1 %1333  ;;  %v1523_v19 = vadd.f32 %v1459_v11, %v1135_v39  ;;  %v6365_v45 = vpop.permute.xlu0 %663 }
 0x233   : > { %v1457_v1 = vmul.f32 %v5620_v62, %v1334_v23  ;;  %3130 = vmatmul.mubr.bf16.gmra.mrb[68].mxu0 %v6305_v25 }
 0x234   : > { %3139 = vmatprep.mubr.bf16.mxu0 %v7679_v48  ;;  %v1594_v29 = vadd.f32 %v6103_v32, %v1523_v19 }
 0x235   : > { %v1521_v3 = vadd.f32 %v1457_v1, %v1133_v33  ;;  %693 = vperm.xlu1 %5241, %v6118_v28  }
 0x236   : > { %v1338_v51 = vpop.permute.xlu1 %1337  ;;  %v1658_v16 = vmax.f32 %v1594_v29, 0.0  ;;  %v2288_v29 = vld [vmem:[%s7646_s5 + $0x1e0] sm:$0xff] }
 0x237   : > { %v1592_v42 = vadd.f32 %v6103_v32, %v1521_v3  ;;  %v1458_v27 = vmul.f32 %v5620_v62, %v1338_v51 }
 0x239   : > { %v1656_v13 = vmax.f32 %v1592_v42, 0.0  ;;  %v1522_v54 = vadd.f32 %v1458_v27, %v1134_v8  ;;  %5242 = vset.pattern.permute.xlu1 %v7680_v41  ;;  %v4961_v8 = vcombine.low %v2276_v44, %v2280_v5  ;;  %v4962_v42 = vcombine.high %v2276_v44, %v2280_v5 }
 0x23a   : > { %1017 = vperm.xlu1 %5242, %v6118_v28   ;;  %v2268_v28 = vld [vmem:[%s7646_s5 + $0x140] sm:$0xff] }
 0x23b   : > { %v1697_v49 = vpack.c.bf16 %v1656_v13, %v1655_v34  ;;  %v1593_v2 = vadd.f32 %v6103_v32, %v1522_v54  ;;  %v619_v46 = vpop.permute.xlu1 %618  ;;  %v4954_v40 = vcombine.high %v2268_v28, %v2272_v9  ;;  %v2284_v34 = vld [vmem:[%s7646_s5 + $0x1c0] sm:$0xff] }
 0x23c   : > { %v4969_v54 = vcombine.low %v2284_v34, %v2288_v29 }
 0x23d   : > { %v1657_v6 = vmax.f32 %v1593_v2, 0.0  ;;  %5072 = vmatprep.mubr.msk.bf16.mxu1 %vm1746_vm0, %v1697_v49  ;;  %2664 = vmatprep.subr.bf16.mxu1 %v4954_v40  ;;  %v4970_v49 = vcombine.high %v2284_v34, %v2288_v29  ;;  %v1461_v2 = vmul.f32 %v5620_v62, %v6145_v0 }
 0x23e   : > { %5244 = vset.pattern.permute.xlu1 %v7681_v50  ;;  %v6378_v50 = vpop.permute.xlu0 %668 }
 0x23f   : > { %v1698_v37 = vpack.c.bf16 %v1658_v16, %v1657_v6  ;;  %1397 = vperm.xlu1 %5244, %v6076_v55   ;;  %v4953_v55 = vcombine.low %v2268_v28, %v2272_v9  ;;  %v748_v6 = vmul.f32 %v5624_v63, %v619_v46 }
 0x240   : > { %v958_v12 = vpop.permute.xlu1 %957 }
 0x241   : > { %5073 = vmatmul.mubr.msk.bf16.gmra.mrb[12].mxu1 %vm1746_vm0, %v1698_v37  ;;  %v1072_v16 = vmul.f32 %v5612_v60, %v958_v12  ;;  %v750_v37 = vmul.f32 %v5624_v63, %v6340_v26  ;;  %v6421_v26 = vld [vmem:[%s7646_s5 + $0x10] sm:$0xff] }
 0x242   : > { %v5050_v41 = vpop.f32.mrb[20].mxu0  ;;  %2665 = vmatpush1.bf16.msra.mxu1 %v4953_v55  ;;  %v6385_v3 = vpop.permute.xlu0 %678 }
 0x243   : > { %v1966_v52 = vadd.f32 %v5050_v41, %v6166_v21  ;;  %v1957_v59 = vpop.f32.mrb[21].mxu0  ;;  %1401 = vperm.xlu1 %5244, %v6088_v31   ;;  %2666 = vmatprep.subr.bf16.mxu1 %v4962_v42 }
 0x244   : > { %v1958_v24 = vadd.f32 %v6166_v21, %v1957_v59  ;;  %v5051_v11 = vpop.f32.mrb[22].mxu0  ;;  %v962_v57 = vpop.permute.xlu1 %961 }
 0x245   : > { %v1969_v39 = vadd.f32 %v5051_v11, %v6166_v21  ;;  %v1960_v23 = vpop.f32.mrb[23].mxu0  ;;  %v2154_v61 = vmax.f32 %v1966_v52, 0.0  ;;  %v1073_v15 = vmul.f32 %v5612_v60, %v962_v57  ;;  %v1136_v52 = vadd.f32 %v1072_v16, %v748_v6  ;;  %v2231_v11 = vld [vmem:[%s7646_s5 + $0x18] sm:$0xff] }
 0x246   : > { %v1961_v33 = vadd.f32 %v6166_v21, %v1960_v23  ;;  %v2152_v30 = vmax.f32 %v1958_v24, 0.0  ;;  %2667 = vmatpush1.bf16.msra.mxu1 %v4961_v8  ;;  %v966_v13 = vpop.permute.xlu0 %965  ;;  %v6426_v24 = vld [vmem:[%s7646_s5 + $0x30] sm:$0xff] }
 0x247   : > { %v2155_v1 = vmax.f32 %v1969_v39, 0.0  ;;  %v1137_v53 = vadd.f32 %v1073_v15, %v749_v18  ;;  %2668 = vmatprep.subr.bf16.mxu1 %v4970_v49  ;;  %v1074_v28 = vmul.f32 %v5612_v60, %v966_v13  ;;  %v4917_v23 = vcombine.low %v6421_v26, %v6426_v24 }
 0x248   : > { %v2153_v4 = vmax.f32 %v1961_v33, 0.0  ;;  %v4918_v33 = vcombine.high %v6421_v26, %v6426_v24  ;;  %v2258_v26 = vld [vmem:[%s7646_s5 + $0xf0] sm:$0xff] }
 0x249   : > { %v6383_v31 = vpack.c.bf16 %v2155_v1, %v2154_v61  ;;  %v634_v19 = vpop.permute.xlu1 %633  ;;  %v1525_v41 = vadd.f32 %v1461_v2, %v1137_v53  ;;  %v1138_v55 = vadd.f32 %v1074_v28, %v750_v37  ;;  %v2235_v61 = vld [vmem:[%s7646_s5 + $0x38] sm:$0xff] }
 0x24a   : > { %v6390_v51 = vpack.c.bf16 %v2153_v4, %v2152_v30  ;;  %2669 = vmatpush1.bf16.msra.mxu1 %v4969_v54  ;;  %v4919_v1 = vcombine.low %v2231_v11, %v2235_v61  ;;  %v4920_v30 = vcombine.high %v2231_v11, %v2235_v61  ;;  %v751_v18 = vmul.f32 %v5624_v63, %v634_v19 }
 0x24b   : > { %v1596_v0 = vadd.f32 %v6103_v32, %v1525_v41  ;;  %3360 = vmatprep.subr.bf16.mxu1 %v4918_v33 }
 0x24c   : > { %3140 = vmatmul.mubr.bf16.gmra.mrb[72].mxu0 %v6390_v51  ;;  %3713 = vmatprep.subr.bf16.mxu0 %v4920_v30 }
 0x24d   : > { %3149 = vmatprep.mubr.bf16.mxu0 %v7679_v48  ;;  %v1660_v4 = vmax.f32 %v1596_v0, 0.0  ;;  %3714 = vmatpush1.bf16.msra.mxu0 %v4919_v1  ;;  %v978_v1 = vpop.permute.xlu0 %977 }
 0x24e   : > { %v970_v27 = vpop.permute.xlu1 %969 }
 0x24f   : > { %v1075_v46 = vmul.f32 %v5612_v60, %v970_v27 }
 0x251   : > { %v1139_v8 = vadd.f32 %v1075_v46, %v751_v18  ;;  %v1077_v18 = vmul.f32 %v5612_v60, %v978_v1 }
 0x253   : > { %v1346_v9 = vpop.permute.xlu1 %1345 }
 0x254   : > { %v1460_v59 = vmul.f32 %v5620_v62, %v1346_v9  ;;  %3150 = vmatmul.mubr.bf16.gmra.mrb[76].mxu0 %v6383_v31 }
 0x255   : > { %3159 = vmatprep.mubr.bf16.mxu0 %v7679_v48 }
 0x256   : > { %v1524_v12 = vadd.f32 %v1460_v59, %v1136_v52 }
 0x257   : > { %v1354_v40 = vpop.permute.xlu1 %1353 }
 0x258   : > { %v1595_v57 = vadd.f32 %v6103_v32, %v1524_v12  ;;  %v1462_v39 = vmul.f32 %v5620_v62, %v1354_v40 }
 0x25a   : > { %v1659_v15 = vmax.f32 %v1595_v57, 0.0  ;;  %v1526_v44 = vadd.f32 %v1462_v39, %v1138_v55  ;;  %v752_v39 = vmul.f32 %v5624_v63, %v6358_v17  ;;  %v1464_v17 = vmul.f32 %v5620_v62, %v6153_v20  ;;  %v2243_v20 = vld [vmem:[%s7646_s5 + $0x78] sm:$0xff] }
 0x25b   : > { %v1358_v5 = vpop.permute.xlu1 %1357 }
 0x25c   : > { %v1699_v42 = vpack.c.bf16 %v1660_v4, %v1659_v15  ;;  %v1463_v53 = vmul.f32 %v5620_v62, %v1358_v5  ;;  %v1597_v27 = vadd.f32 %v6103_v32, %v1526_v44  ;;  %v982_v5 = vpop.permute.xlu0 %981 }
 0x25e   : > { %v1527_v34 = vadd.f32 %v1463_v53, %v1139_v8  ;;  %5076 = vmatprep.mubr.msk.bf16.mxu1 %vm1746_vm0, %v1699_v42  ;;  %v1661_v54 = vmax.f32 %v1597_v27, 0.0  ;;  %v2239_v27 = vld [vmem:[%s7646_s5 + $0x58] sm:$0xff] }
 0x260   : > { %v1598_v29 = vadd.f32 %v6103_v32, %v1527_v34  ;;  %v644_v13 = vpop.permute.xlu1 %643  ;;  %v1467_v34 = vmul.f32 %v5620_v62, %v6161_v36 }
 0x261   : > { %v753_v15 = vmul.f32 %v5624_v63, %v644_v13  ;;  %v1078_v13 = vmul.f32 %v5612_v60, %v982_v5 }
 0x262   : > { %v1662_v19 = vmax.f32 %v1598_v29, 0.0 }
 0x263   : > { %v1141_v29 = vadd.f32 %v1077_v18, %v753_v15 }
 0x264   : > { %v1700_v49 = vpack.c.bf16 %v1662_v19, %v1661_v54 }
 0x265   : > { %v974_v2 = vpop.permute.xlu1 %973 }
 0x266   : > { %5077 = vmatmul.mubr.msk.bf16.gmra.mrb[16].mxu1 %vm1746_vm0, %v1700_v49  ;;  %v1076_v33 = vmul.f32 %v5612_v60, %v974_v2  ;;  %v4927_v2 = vcombine.low %v2239_v27, %v2243_v20 }
 0x267   : > { %v5054_v16 = vpop.f32.mrb[24].mxu0 }
 0x268   : > { %v1982_v6 = vadd.f32 %v5054_v16, %v6166_v21  ;;  %v1973_v37 = vpop.f32.mrb[25].mxu0  ;;  %v1140_v30 = vadd.f32 %v1076_v33, %v752_v39  ;;  %v4928_v16 = vcombine.high %v2239_v27, %v2243_v20 }
 0x269   : > { %v1974_v41 = vadd.f32 %v6166_v21, %v1973_v37  ;;  %v5055_v28 = vpop.f32.mrb[26].mxu0 }
 0x26a   : > { %v1985_v9 = vadd.f32 %v5055_v28, %v6166_v21  ;;  %v1976_v52 = vpop.f32.mrb[27].mxu0  ;;  %v649_v59 = vpop.permute.xlu1 %648  ;;  %v2158_v12 = vmax.f32 %v1982_v6, 0.0  ;;  %v1528_v42 = vadd.f32 %v1464_v17, %v1140_v30  ;;  %3715 = vmatprep.subr.bf16.mxu0 %v4928_v16 }
 0x26b   : > { %v1977_v0 = vadd.f32 %v6166_v21, %v1976_v52  ;;  %v2156_v46 = vmax.f32 %v1974_v41, 0.0  ;;  %v754_v19 = vmul.f32 %v5624_v63, %v649_v59  ;;  %3716 = vmatpush1.bf16.msra.mxu0 %v4927_v2 }
 0x26c   : > { %v2159_v55 = vmax.f32 %v1985_v9, 0.0  ;;  %v1599_v36 = vadd.f32 %v6103_v32, %v1528_v42  ;;  %v6482_v9 = vld [vmem:[%s7643_s2] ss:$0 sm:$0xff] }
 0x26d   : > { %v2157_v40 = vmax.f32 %v1977_v0, 0.0  ;;  %v1142_v28 = vadd.f32 %v1078_v13, %v754_v19 }
 0x26e   : > { %v6450_v11 = vpack.c.bf16 %v2159_v55, %v2158_v12  ;;  %v654_v57 = vpop.permute.xlu1 %653  ;;  %v1663_v0 = vmax.f32 %v1599_v36, 0.0 }
 0x26f   : > { %v6455_v61 = vpack.c.bf16 %v2157_v40, %v2156_v46  ;;  %v755_v8 = vmul.f32 %v5624_v63, %v654_v57 }
 0x271   : > { %3160 = vmatmul.mubr.bf16.gmra.mrb[80].mxu0 %v6455_v61 }
 0x272   : > { %3169 = vmatprep.mubr.bf16.mxu0 %v7679_v48 }
 0x273   : > { %v986_v4 = vpop.permute.xlu1 %985 }
 0x274   : > { %v1079_v44 = vmul.f32 %v5612_v60, %v986_v4 }
 0x276   : > { %v1143_v53 = vadd.f32 %v1079_v44, %v755_v8  ;;  %v757_v8 = vmul.f32 %v5624_v63, %v6365_v45 }
 0x278   : > { %v1366_v54 = vpop.permute.xlu1 %1365  ;;  %v1531_v6 = vadd.f32 %v1467_v34, %v1143_v53 }
 0x279   : > { %v1465_v49 = vmul.f32 %v5620_v62, %v1366_v54  ;;  %3170 = vmatmul.mubr.bf16.gmra.mrb[84].mxu0 %v6450_v11 }
 0x27a   : > { %3179 = vmatprep.mubr.bf16.mxu0 %v7679_v48  ;;  %v1602_v12 = vadd.f32 %v6482_v9, %v1531_v6 }
 0x27b   : > { %v1529_v37 = vadd.f32 %v1465_v49, %v1141_v29  ;;  %v1469_v29 = vmul.f32 %v5620_v62, %v6172_v22  ;;  %v2247_v22 = vld [vmem:[%s7646_s5 + $0x98] sm:$0xff] }
 0x27c   : > { %v1370_v41 = vpop.permute.xlu1 %1369  ;;  %v1666_v39 = vmax.f32 %v1602_v12, 0.0  ;;  %v758_v12 = vmul.f32 %v5624_v63, %v6378_v50 }
 0x27d   : > { %v1600_v52 = vadd.f32 %v6482_v9, %v1529_v37  ;;  %v1466_v59 = vmul.f32 %v5620_v62, %v1370_v41  ;;  %v998_v37 = vpop.permute.xlu0 %997 }
 0x27f   : > { %v1664_v55 = vmax.f32 %v1600_v52, 0.0  ;;  %v1530_v32 = vadd.f32 %v1466_v59, %v1142_v28  ;;  %v2251_v28 = vld [vmem:[%s7646_s5 + $0xb8] sm:$0xff] }
 0x280   : > { %v4935_v59 = vcombine.low %v2247_v22, %v2251_v28 }
 0x281   : > { %v1701_v46 = vpack.c.bf16 %v1664_v55, %v1663_v0  ;;  %v1601_v40 = vadd.f32 %v6482_v9, %v1530_v32  ;;  %v659_v57 = vpop.permute.xlu1 %658  ;;  %v4936_v0 = vcombine.high %v2247_v22, %v2251_v28  ;;  %v1082_v55 = vmul.f32 %v5612_v60, %v998_v37  ;;  %v2255_v37 = vld [vmem:[%s7646_s5 + $0xd8] sm:$0xff]  ;;  %v2292_v28 = vld [vmem:[%s7647_s6] sm:$0xff] }
 0x282   : > { %v756_v41 = vmul.f32 %v5624_v63, %v659_v57 }
 0x283   : > { %v1665_v33 = vmax.f32 %v1601_v40, 0.0  ;;  %5080 = vmatprep.mubr.msk.bf16.mxu1 %vm1746_vm0, %v1701_v46  ;;  %3717 = vmatprep.subr.bf16.mxu0 %v4936_v0  ;;  %v2259_v0 = vld [vmem:[%s7646_s5 + $0xf8] sm:$0xff] }
 0x284   : > { %3718 = vmatpush1.bf16.msra.mxu0 %v4935_v59 }
 0x285   : > { %v1702_v1 = vpack.c.bf16 %v1666_v39, %v1665_v33  ;;  %v1146_v33 = vadd.f32 %v1082_v55, %v758_v12 }
 0x286   : > { %v990_v30 = vpop.permute.xlu1 %989 }
 0x287   : > { %5081 = vmatmul.mubr.msk.bf16.gmra.mrb[20].mxu1 %vm1746_vm0, %v1702_v1 }
 0x288   : > { %v5058_v4 = vpop.f32.mrb[28].mxu0 }
 0x289   : > { %v1998_v18 = vadd.f32 %v5058_v4, %v6166_v21  ;;  %v1989_v15 = vpop.f32.mrb[29].mxu0 }
 0x28a   : > { %v1990_v44 = vadd.f32 %v6166_v21, %v1989_v15  ;;  %v5059_v17 = vpop.f32.mrb[30].mxu0  ;;  %v994_v5 = vpop.permute.xlu1 %993 }
 0x28b   : > { %v2001_v42 = vadd.f32 %v5059_v17, %v6166_v21  ;;  %v1081_v53 = vmul.f32 %v5612_v60, %v994_v5  ;;  %v1992_v27 = vpop.f32.mrb[31].mxu0  ;;  %v2162_v13 = vmax.f32 %v1998_v18, 0.0 }
 0x28c   : > { %v1993_v34 = vadd.f32 %v6166_v21, %v1992_v27  ;;  %v2160_v19 = vmax.f32 %v1990_v44, 0.0  ;;  %v1080_v21 = vmul.f32 %v5612_v60, %v990_v30 }
 0x28d   : > { %v2163_v54 = vmax.f32 %v2001_v42, 0.0  ;;  %v1145_v20 = vadd.f32 %v1081_v53, %v757_v8 }
 0x28e   : > { %v2161_v49 = vmax.f32 %v1993_v34, 0.0  ;;  %v1144_v32 = vadd.f32 %v1080_v21, %v756_v41 }
 0x28f   : > { %v6499_v2 = vpack.c.bf16 %v2163_v54, %v2162_v13  ;;  %v1533_v16 = vadd.f32 %v1469_v29, %v1145_v20  ;;  %v674_v36 = vpop.permute.xlu1 %673 }
 0x290   : > { %v6501_v45 = vpack.c.bf16 %v2161_v49, %v2160_v19  ;;  %v759_v18 = vmul.f32 %v5624_v63, %v674_v36  ;;  %v1010_v19 = vpop.permute.xlu0 %1009  ;;  %v6532_v36 = vld [vmem:[%s7645_s4] ss:$0 sm:$0xff] }
 0x291   : > { %v1604_v40 = vadd.f32 %v6482_v9, %v1533_v16 }
 0x292   : > { %3180 = vmatmul.mubr.bf16.gmra.mrb[88].mxu0 %v6501_v45 }
 0x293   : > { %3189 = vmatprep.mubr.bf16.mxu0 %v7679_v48  ;;  %v1668_v4 = vmax.f32 %v1604_v40, 0.0 }
 0x294   : > { %v1002_v6 = vpop.permute.xlu1 %1001  ;;  %v1014_v40 = vpop.permute.xlu0 %1013 }
 0x295   : > { %v1083_v1 = vmul.f32 %v5612_v60, %v1002_v6 }
 0x297   : > { %v1147_v5 = vadd.f32 %v1083_v1, %v759_v18 }
 0x299   : > { %v1378_v52 = vpop.permute.xlu1 %1377 }
 0x29a   : > { %v1468_v46 = vmul.f32 %v5620_v62, %v1378_v52  ;;  %3190 = vmatmul.mubr.bf16.gmra.mrb[92].mxu0 %v6499_v2  ;;  %v7691_v52 = vld [vmem:[#allocation7_spill] sm:$0xff] }
 0x29b   : > { %3199 = vmatprep.mubr.bf16.mxu0 %v7679_v48  ;;  %v2308_v59 = vsub.s32 3, %v7691_v52 }
 0x29c   : > { %v1532_v57 = vadd.f32 %v1468_v46, %v1144_v32  ;;  %v4943_v46 = vcombine.low %v2255_v37, %v2259_v0 }
 0x29d   : > { %v1386_v39 = vpop.permute.xlu1 %1385 }
 0x29e   : > { %v1603_v50 = vadd.f32 %v6482_v9, %v1532_v57  ;;  %v1470_v30 = vmul.f32 %v5620_v62, %v1386_v39  ;;  %v4944_v39 = vcombine.high %v2255_v37, %v2259_v0 }
 0x2a0   : > { %v1667_v15 = vmax.f32 %v1603_v50, 0.0  ;;  %v1534_v44 = vadd.f32 %v1470_v30, %v1146_v33  ;;  %v7692_v50 = vsub.s32 2, %v7691_v52  ;;  %3719 = vmatprep.subr.bf16.mxu0 %v4944_v39 }
 0x2a1   : > { %v1390_v17 = vpop.permute.xlu1 %1389  ;;  %3720 = vmatpush1.bf16.msra.mxu0 %v4943_v46 }
 0x2a2   : > { %v1703_v8 = vpack.c.bf16 %v1668_v4, %v1667_v15  ;;  %v1471_v42 = vmul.f32 %v5620_v62, %v1390_v17  ;;  %v1605_v53 = vadd.f32 %v6482_v9, %v1534_v44  ;;  %v6550_v30 = vrot.slane %v2292_v28, %v7692_v50 }
 0x2a3   : > { %v6552_v44 = vrot.slane %v2292_v28, %v2308_v59 }
 0x2a4   : > { %v1535_v27 = vadd.f32 %v1471_v42, %v1147_v5  ;;  %5084 = vmatprep.mubr.msk.bf16.mxu1 %vm1746_vm0, %v1703_v8  ;;  %v1669_v13 = vmax.f32 %v1605_v53, 0.0  ;;  %v1394_v53 = vpop.permute.xlu0 %1393 }
 0x2a5   : > { %v1472_v37 = vmul.f32 %v5620_v62, %v1394_v53 }
 0x2a6   : > { %v1606_v34 = vadd.f32 %v6482_v9, %v1535_v27  ;;  %v684_v29 = vpop.permute.xlu1 %683 }
 0x2a7   : > { %v761_v59 = vmul.f32 %v5624_v63, %v684_v29 }
 0x2a8   : > { %v1670_v54 = vmax.f32 %v1606_v34, 0.0 }
 0x2aa   : > { %v1704_v20 = vpack.c.bf16 %v1670_v54, %v1669_v13  ;;  %v760_v13 = vmul.f32 %v5624_v63, %v6385_v3  ;;  %v1085_v3 = vmul.f32 %v5612_v60, %v1010_v19 }
 0x2ab   : > { %v1006_v49 = vpop.permute.xlu1 %1005 }
 0x2ac   : > { %5085 = vmatmul.mubr.msk.bf16.gmra.mrb[24].mxu1 %vm1746_vm0, %v1704_v20  ;;  %v1084_v17 = vmul.f32 %v5612_v60, %v1006_v49 }
 0x2ad   : > { %v5062_v16 = vpop.f32.mrb[0].mxu1 }
 0x2ae   : > { %v2014_v6 = vadd.f32 %v6532_v36, %v5062_v16  ;;  %v2005_v21 = vpop.f32.mrb[1].mxu1 }
 0x2af   : > { %v2006_v22 = vadd.f32 %v6532_v36, %v2005_v21  ;;  %v5063_v41 = vpop.f32.mrb[2].mxu1  ;;  %v1148_v21 = vadd.f32 %v1084_v17, %v760_v13 }
 0x2b0   : > { %v2017_v12 = vadd.f32 %v6532_v36, %v5063_v41  ;;  %v2008_v55 = vpop.f32.mrb[3].mxu1  ;;  %v689_v32 = vpop.permute.xlu1 %688  ;;  %v2166_v33 = vmax.f32 %v2014_v6, 0.0 }
 0x2b1   : > { %v2009_v57 = vadd.f32 %v6532_v36, %v2008_v55  ;;  %v2164_v4 = vmax.f32 %v2006_v22, 0.0  ;;  %v762_v53 = vmul.f32 %v5624_v63, %v689_v32 }
 0x2b2   : > { %v2167_v1 = vmax.f32 %v2017_v12, 0.0  ;;  %v1406_v12 = vpop.permute.xlu0 %1405 }
 0x2b3   : > { %v2165_v18 = vmax.f32 %v2009_v57, 0.0  ;;  %v3041_v15 = vpop.f32.mrb[32].mxu0  ;;  %v1536_v57 = vadd.f32 %v1472_v37, %v1148_v21  ;;  %v1475_v50 = vmul.f32 %v5620_v62, %v1406_v12 }
 0x2b4   : > { %v6555_v5 = vpack.c.bf16 %v2167_v1, %v2166_v33  ;;  %v3043_v8 = vpop.f32.mrb[33].mxu0  ;;  %v694_v42 = vpop.permute.xlu1 %693  ;;  %v3042_v54 = vadd.f32 %v3041_v15, %v6550_v30  ;;  %v1149_v15 = vadd.f32 %v1085_v3, %v761_v59 }
 0x2b5   : > { %v6557_v27 = vpack.c.bf16 %v2165_v18, %v2164_v4  ;;  %v3045_v34 = vpop.f32.mrb[34].mxu0  ;;  %v3044_v6 = vadd.f32 %v3043_v8, %v6552_v44  ;;  %v763_v55 = vmul.f32 %v5624_v63, %v694_v42 }
 0x2b6   : > { %v3046_v20 = vadd.f32 %v3045_v34, %v6550_v30  ;;  %v3047_v16 = vpop.f32.mrb[35].mxu0 }
 0x2b7   : > { %v3048_v49 = vadd.f32 %v3047_v16, %v6552_v44  ;;  %3200 = vmatmul.mubr.bf16.gmra.mrb[96].mxu0 %v6557_v27  ;;  %v1086_v16 = vmul.f32 %v5612_v60, %v1014_v40 }
 0x2b8   : > { %v4140_v22 = vmax.f32 %v3042_v54, %v3046_v20  ;;  %3209 = vmatprep.mubr.bf16.mxu0 %v7679_v48  ;;  %v1607_v54 = vadd.f32 %v6482_v9, %v1536_v57 }
 0x2b9   : > { %v4177_v41 = vmax.f32 %v3044_v6, %v3048_v49  ;;  %v1018_v28 = vpop.permute.xlu1 %1017 }
 0x2ba   : > { %v1087_v0 = vmul.f32 %v5612_v60, %v1018_v28  ;;  %v1671_v28 = vmax.f32 %v1607_v54, 0.0 }
 0x2bb   : > { %v3051_v46 = vpop.f32.mrb[36].mxu0 }
 0x2bc   : > { %v3052_v39 = vadd.f32 %v3051_v46, %v6550_v30  ;;  %v3053_v33 = vpop.f32.mrb[37].mxu0  ;;  %v1151_v1 = vadd.f32 %v1087_v0, %v763_v55 }
 0x2bd   : > { %v3054_v4 = vadd.f32 %v3053_v33, %v6552_v44  ;;  %v3055_v18 = vpop.f32.mrb[38].mxu0 }
 0x2be   : > { %v4141_v19 = vmax.f32 %v4140_v22, %v3052_v39  ;;  %v3056_v29 = vadd.f32 %v3055_v18, %v6550_v30  ;;  %v3057_v17 = vpop.f32.mrb[39].mxu0  ;;  %v1398_v8 = vpop.permute.xlu1 %1397  ;;  %v1539_v6 = vadd.f32 %v1475_v50, %v1151_v1  ;;  %v1150_v22 = vadd.f32 %v1086_v16, %v762_v53 }
 0x2bf   : > { %v4178_v42 = vmax.f32 %v4177_v41, %v3054_v4  ;;  %v3058_v34 = vadd.f32 %v3057_v17, %v6552_v44  ;;  %v1473_v13 = vmul.f32 %v5620_v62, %v1398_v8  ;;  %3210 = vmatmul.mubr.bf16.gmra.mrb[100].mxu0 %v6555_v5 }
 0x2c0   : > { %v4142_v20 = vmax.f32 %v4141_v19, %v3056_v29  ;;  %3219 = vmatprep.mubr.bf16.mxu0 %v7679_v48  ;;  %v1610_v0 = vadd.f32 %v6482_v9, %v1539_v6 }
 0x2c1   : > { %v4179_v49 = vmax.f32 %v4178_v42, %v3058_v34  ;;  %v1537_v21 = vadd.f32 %v1473_v13, %v1149_v15 }
 0x2c2   : > { %v1402_v37 = vpop.permute.xlu1 %1401  ;;  %v1674_v18 = vmax.f32 %v1610_v0, 0.0 }
 0x2c3   : > { %v1608_v63 = vadd.f32 %v6482_v9, %v1537_v21  ;;  %v1474_v32 = vmul.f32 %v5620_v62, %v1402_v37  ;;  %v3061_v41 = vpop.f32.mrb[40].mxu0 }
 0x2c4   : > { %v3062_v3 = vadd.f32 %v3061_v41, %v6550_v30  ;;  %v3063_v59 = vpop.f32.mrb[41].mxu0  ;;  %v2242_v41 = vld [vmem:[%s7646_s5 + $0x70] sm:$0xff] }
 0x2c5   : > { %v1672_v12 = vmax.f32 %v1608_v63, 0.0  ;;  %v1538_v55 = vadd.f32 %v1474_v32, %v1150_v22  ;;  %v3064_v60 = vadd.f32 %v3063_v59, %v6552_v44  ;;  %v3065_v40 = vpop.f32.mrb[42].mxu0  ;;  %v2238_v32 = vld [vmem:[%s7646_s5 + $0x50] sm:$0xff] }
 0x2c6   : > { %v4143_v46 = vmax.f32 %v4142_v20, %v3062_v3  ;;  %v3066_v57 = vadd.f32 %v3065_v40, %v6550_v30  ;;  %v3067_v39 = vpop.f32.mrb[43].mxu0 }
 0x2c7   : > { %v1705_v33 = vpack.c.bf16 %v1672_v12, %v1671_v28  ;;  %v1609_v1 = vadd.f32 %v6482_v9, %v1538_v55  ;;  %v4180_v62 = vmax.f32 %v4179_v49, %v3064_v60  ;;  %v3068_v50 = vadd.f32 %v3067_v39, %v6552_v44  ;;  %v2263_v12 = vld [vmem:[%s7646_s5 + $0x118] sm:$0xff] }
 0x2c8   : > { %v4144_v4 = vmax.f32 %v4143_v46, %v3066_v57  ;;  %v4926_v46 = vcombine.high %v2238_v32, %v2242_v41  ;;  %v2267_v57 = vld [vmem:[%s7646_s5 + $0x138] sm:$0xff] }
 0x2c9   : > { %v1673_v15 = vmax.f32 %v1609_v1, 0.0  ;;  %v4181_v19 = vmax.f32 %v4180_v62, %v3068_v50  ;;  %5088 = vmatprep.mubr.msk.bf16.mxu1 %vm1746_vm0, %v1705_v33  ;;  %v2246_v50 = vld [vmem:[%s7646_s5 + $0x90] sm:$0xff] }
 0x2cb   : > { %v1706_v29 = vpack.c.bf16 %v1674_v18, %v1673_v15  ;;  %v3071_v17 = vpop.f32.mrb[44].mxu0  ;;  %v4952_v18 = vcombine.high %v2263_v12, %v2267_v57 }
 0x2cc   : > { %v3072_v8 = vadd.f32 %v3071_v17, %v6550_v30  ;;  %v3073_v53 = vpop.f32.mrb[45].mxu0  ;;  %v4925_v17 = vcombine.low %v2238_v32, %v2242_v41  ;;  %v2266_v32 = vld [vmem:[%s7646_s5 + $0x130] sm:$0xff] }
 0x2cd   : > { %v3074_v42 = vadd.f32 %v3073_v53, %v6552_v44  ;;  %5089 = vmatmul.mubr.msk.bf16.gmra.mrb[28].mxu1 %vm1746_vm0, %v1706_v29  ;;  %v3075_v34 = vpop.f32.mrb[46].mxu0  ;;  %3721 = vmatprep.subr.bf16.mxu0 %v4952_v18 }
 0x2ce   : > { %v4145_v9 = vmax.f32 %v4144_v4, %v3072_v8  ;;  %v3076_v13 = vadd.f32 %v3075_v34, %v6550_v30  ;;  %v5066_v54 = vpop.f32.mrb[4].mxu1  ;;  %v3077_v20 = vpop.f32.mrb[47].mxu0  ;;  %2686 = vmatprep.mubr.bf16.mxu1 %v7679_v48  ;;  %v2250_v4 = vld [vmem:[%s7646_s5 + $0xb0] sm:$0xff]  ;;  %v4951_v8 = vcombine.low %v2263_v12, %v2267_v57 }
 0x2cf   : > { %v4182_v16 = vmax.f32 %v4181_v19, %v3074_v42  ;;  %v2030_v6 = vadd.f32 %v6532_v36, %v5066_v54  ;;  %v3078_v49 = vadd.f32 %v3077_v20, %v6552_v44  ;;  %v2021_v21 = vpop.f32.mrb[5].mxu1  ;;  %v4934_v20 = vcombine.high %v2246_v50, %v2250_v4 }
 0x2d0   : > { %v4146_v37 = vmax.f32 %v4145_v9, %v3076_v13  ;;  %v2022_v22 = vadd.f32 %v6532_v36, %v2021_v21  ;;  %v5067_v63 = vpop.f32.mrb[6].mxu1  ;;  %3722 = vmatpush1.bf16.msra.mxu0 %v4951_v8 }
 0x2d1   : > { %v4183_v28 = vmax.f32 %v4182_v16, %v3078_v49  ;;  %v2033_v3 = vadd.f32 %v6532_v36, %v5067_v63  ;;  %v2024_v59 = vpop.f32.mrb[7].mxu1  ;;  %v2170_v55 = vmax.f32 %v2030_v6, 0.0  ;;  %v2254_v6 = vld [vmem:[%s7646_s5 + $0xd0] sm:$0xff] }
 0x2d2   : > { %v2025_v0 = vadd.f32 %v6532_v36, %v2024_v59  ;;  %v2168_v39 = vmax.f32 %v2022_v22, 0.0  ;;  %v4942_v21 = vcombine.high %v2254_v6, %v2258_v26  ;;  %v2262_v63 = vld [vmem:[%s7646_s5 + $0x110] sm:$0xff]  ;;  %v4941_v12 = vcombine.low %v2254_v6, %v2258_v26 }
 0x2d3   : > { %v2171_v60 = vmax.f32 %v2033_v3, 0.0  ;;  %v3081_v40 = vpop.f32.mrb[48].mxu0 }
 0x2d4   : > { %v2169_v33 = vmax.f32 %v2025_v0, 0.0  ;;  %v3082_v1 = vadd.f32 %v3081_v40, %v6550_v30  ;;  %v3083_v62 = vpop.f32.mrb[49].mxu0  ;;  %v4950_v40 = vcombine.high %v2262_v63, %v2266_v32 }
 0x2d5   : > { %v6621_v15 = vpack.c.bf16 %v2171_v60, %v2170_v55  ;;  %v3084_v19 = vadd.f32 %v3083_v62, %v6552_v44  ;;  %2687 = vmatmul.mubr.bf16.vlgmr.msra.gmra.mrb[32].mxu1 %v6178_v7  ;;  %v3085_v29 = vpop.f32.mrb[50].mxu0 }
 0x2d6   : > { %v6625_v53 = vpack.c.bf16 %v2169_v33, %v2168_v39  ;;  %v4147_v42 = vmax.f32 %v4146_v37, %v3082_v1  ;;  %v3086_v34 = vadd.f32 %v3085_v29, %v6550_v30  ;;  %3361 = vmatpush1.bf16.msra.mxu1 %v4917_v23  ;;  %v3087_v9 = vpop.f32.mrb[51].mxu0  ;;  %2696 = vmatprep.mubr.bf16.mxu1 %v7679_v48 }
 0x2d7   : > { %v4184_v13 = vmax.f32 %v4183_v28, %v3084_v19  ;;  %v3088_v54 = vadd.f32 %v3087_v9, %v6552_v44  ;;  %3362 = vmatprep.subr.bf16.mxu1 %v4926_v46  ;;  %v4933_v23 = vcombine.low %v2246_v50, %v2250_v4  ;;  %v4949_v39 = vcombine.low %v2262_v63, %v2266_v32 }
 0x2d8   : > { %v4148_v16 = vmax.f32 %v4147_v42, %v3086_v34  ;;  %3220 = vmatmul.mubr.bf16.gmra.mrb[104].mxu0 %v6625_v53 }
 0x2d9   : > { %v4185_v24 = vmax.f32 %v4184_v13, %v3088_v54  ;;  %3229 = vmatprep.mubr.bf16.mxu0 %v7679_v48 }
 0x2da   : > { %3363 = vmatpush1.bf16.msra.mxu1 %v4925_v17 }
 0x2db   : > { %v3091_v49 = vpop.f32.mrb[52].mxu0  ;;  %3364 = vmatprep.subr.bf16.mxu1 %v4934_v20 }
 0x2dc   : > { %v3092_v37 = vadd.f32 %v3091_v49, %v6550_v30  ;;  %v3093_v22 = vpop.f32.mrb[53].mxu0 }
 0x2dd   : > { %v3094_v41 = vadd.f32 %v3093_v22, %v6552_v44  ;;  %2697 = vmatmul.mubr.bf16.gmra.mrb[36].mxu1 %v6176_v56  ;;  %v3095_v28 = vpop.f32.mrb[54].mxu0 }
 0x2de   : > { %v4149_v3 = vmax.f32 %v4148_v16, %v3092_v37  ;;  %v3096_v59 = vadd.f32 %v3095_v28, %v6550_v30  ;;  %v3097_v0 = vpop.f32.mrb[55].mxu0  ;;  %2706 = vmatprep.mubr.bf16.mxu1 %v7679_v48  ;;  %3365 = vmatpush1.bf16.msra.mxu1 %v4933_v23 }
 0x2df   : > { %v4186_v55 = vmax.f32 %v4185_v24, %v3094_v41  ;;  %v3098_v60 = vadd.f32 %v3097_v0, %v6552_v44  ;;  %3366 = vmatprep.subr.bf16.mxu1 %v4942_v21 }
 0x2e0   : > { %v4150_v46 = vmax.f32 %v4149_v3, %v3096_v59  ;;  %3230 = vmatmul.mubr.bf16.gmra.mrb[108].mxu0 %v6621_v15 }
 0x2e1   : > { %v4187_v57 = vmax.f32 %v4186_v55, %v3098_v60  ;;  %3239 = vmatprep.mubr.bf16.mxu0 %v7679_v48 }
 0x2e2   : > { %3367 = vmatpush1.bf16.msra.mxu1 %v4941_v12 }
 0x2e3   : > { %v3101_v33 = vpop.f32.mrb[56].mxu0  ;;  %3368 = vmatprep.subr.bf16.mxu1 %v4950_v40 }
 0x2e4   : > { %v3102_v1 = vadd.f32 %v3101_v33, %v6550_v30  ;;  %v3103_v62 = vpop.f32.mrb[57].mxu0 }
 0x2e5   : > { %v3104_v50 = vadd.f32 %v3103_v62, %v6552_v44  ;;  %2707 = vmatmul.mubr.bf16.gmra.mrb[40].mxu1 %v6193_v10  ;;  %v3105_v4 = vpop.f32.mrb[58].mxu0  ;;  %v2270_v62 = vld [vmem:[%s7646_s5 + $0x150] sm:$0xff] }
 0x2e6   : > { %v4151_v18 = vmax.f32 %v4150_v46, %v3102_v1  ;;  %v3106_v19 = vadd.f32 %v3105_v4, %v6550_v30  ;;  %v3107_v29 = vpop.f32.mrb[59].mxu0  ;;  %2716 = vmatprep.mubr.bf16.mxu1 %v7679_v48  ;;  %3369 = vmatpush1.bf16.msra.mxu1 %v4949_v39  ;;  %v2271_v4 = vld [vmem:[%s7646_s5 + $0x158] sm:$0xff] }
 0x2e7   : > { %v4188_v17 = vmax.f32 %v4187_v57, %v3104_v50  ;;  %v3108_v8 = vadd.f32 %v3107_v29, %v6552_v44  ;;  %v2274_v50 = vld [vmem:[%s7646_s5 + $0x170] sm:$0xff] }
 0x2e8   : > { %v4152_v42 = vmax.f32 %v4151_v18, %v3106_v19  ;;  %v4957_v29 = vcombine.low %v2270_v62, %v2274_v50 }
 0x2e9   : > { %v4189_v34 = vmax.f32 %v4188_v17, %v3108_v8  ;;  %v4958_v17 = vcombine.high %v2270_v62, %v2274_v50  ;;  %v2275_v8 = vld [vmem:[%s7646_s5 + $0x178] sm:$0xff]  ;;  %v2282_v62 = vld [vmem:[%s7646_s5 + $0x1b0] sm:$0xff] }
 0x2ea   : > { %v2279_v50 = vld [vmem:[%s7646_s5 + $0x198] sm:$0xff] }
 0x2eb   : > { %v3111_v9 = vpop.f32.mrb[60].mxu0  ;;  %3370 = vmatprep.subr.bf16.mxu1 %v4958_v17 }
 0x2ec   : > { %v3112_v13 = vadd.f32 %v3111_v9, %v6550_v30  ;;  %v3113_v54 = vpop.f32.mrb[61].mxu0  ;;  %3371 = vmatpush1.bf16.msra.mxu1 %v4957_v29  ;;  %v2283_v29 = vld [vmem:[%s7646_s5 + $0x1b8] sm:$0xff] }
 0x2ed   : > { %v3114_v20 = vadd.f32 %v3113_v54, %v6552_v44  ;;  %2717 = vmatmul.mubr.bf16.gmra.mrb[44].mxu1 %v6190_v58  ;;  %v3115_v16 = vpop.f32.mrb[62].mxu0  ;;  %v4960_v54 = vcombine.high %v2271_v4, %v2275_v8 }
 0x2ee   : > { %v4153_v6 = vmax.f32 %v4152_v42, %v3112_v13  ;;  %v3116_v26 = vadd.f32 %v3115_v16, %v6550_v30  ;;  %v3117_v24 = vpop.f32.mrb[63].mxu0  ;;  %2726 = vmatprep.mubr.bf16.mxu1 %v7679_v48  ;;  %v4959_v13 = vcombine.low %v2271_v4, %v2275_v8 }
 0x2ef   : > { %v4190_v23 = vmax.f32 %v4189_v34, %v3114_v20  ;;  %v3118_v49 = vadd.f32 %v3117_v24, %v6552_v44  ;;  %3723 = vmatprep.subr.bf16.mxu0 %v4960_v54 }
 0x2f0   : > { %v4154_v21 = vmax.f32 %v4153_v6, %v3116_v26  ;;  %3724 = vmatpush1.bf16.msra.mxu0 %v4959_v13 }
 0x2f1   : > { %v4191_v37 = vmax.f32 %v4190_v23, %v3118_v49 }
 0x2f3   : > { %v5070_v22 = vpop.f32.mrb[8].mxu1 }
 0x2f4   : > { %v2046_v63 = vadd.f32 %v6532_v36, %v5070_v22  ;;  %v2037_v32 = vpop.f32.mrb[9].mxu1 }
 0x2f5   : > { %v2038_v41 = vadd.f32 %v6532_v36, %v2037_v32  ;;  %v5071_v28 = vpop.f32.mrb[10].mxu1  ;;  %2727 = vmatmul.mubr.bf16.gmra.mrb[48].mxu1 %v6219_v38 }
 0x2f6   : > { %v2049_v3 = vadd.f32 %v6532_v36, %v5071_v28  ;;  %v2040_v59 = vpop.f32.mrb[11].mxu1  ;;  %2736 = vmatprep.mubr.bf16.mxu1 %v7679_v48  ;;  %v2174_v12 = vmax.f32 %v2046_v63, 0.0 }
 0x2f7   : > { %v2041_v0 = vadd.f32 %v6532_v36, %v2040_v59  ;;  %v2172_v60 = vmax.f32 %v2038_v41, 0.0 }
 0x2f8   : > { %v2175_v55 = vmax.f32 %v2049_v3, 0.0 }
 0x2f9   : > { %v2173_v40 = vmax.f32 %v2041_v0, 0.0 }
 0x2fa   : > { %v6673_v46 = vpack.c.bf16 %v2175_v55, %v2174_v12 }
 0x2fb   : > { %v6675_v57 = vpack.c.bf16 %v2173_v40, %v2172_v60 }
 0x2fd   : > { %2737 = vmatmul.mubr.bf16.gmra.mrb[52].mxu1 %v6216_v35  ;;  %3240 = vmatmul.mubr.bf16.gmra.mrb[112].mxu0 %v6675_v57 }
 0x2fe   : > { %v3121_v39 = vpop.f32.mrb[64].mxu0  ;;  %2746 = vmatprep.mubr.bf16.mxu1 %v7679_v48  ;;  %3249 = vmatprep.mubr.bf16.mxu0 %v7679_v48 }
 0x2ff   : > { %v3122_v33 = vadd.f32 %v3121_v39, %v6550_v30  ;;  %v3123_v1 = vpop.f32.mrb[65].mxu0 }
 0x300   : > { %v3124_v18 = vadd.f32 %v3123_v1, %v6552_v44  ;;  %v3125_v19 = vpop.f32.mrb[66].mxu0  ;;  %v2278_v1 = vld [vmem:[%s7646_s5 + $0x190] sm:$0xff] }
 0x301   : > { %v4155_v42 = vmax.f32 %v4154_v21, %v3122_v33  ;;  %v3126_v34 = vadd.f32 %v3125_v19, %v6550_v30  ;;  %v3127_v9 = vpop.f32.mrb[67].mxu0  ;;  %v4966_v19 = vcombine.high %v2278_v1, %v2282_v62 }
 0x302   : > { %v4192_v20 = vmax.f32 %v4191_v37, %v3124_v18  ;;  %v3128_v16 = vadd.f32 %v3127_v9, %v6552_v44  ;;  %v4965_v18 = vcombine.low %v2278_v1, %v2282_v62 }
 0x303   : > { %v4156_v6 = vmax.f32 %v4155_v42, %v3126_v34  ;;  %v4967_v42 = vcombine.low %v2279_v50, %v2283_v29  ;;  %v4968_v34 = vcombine.high %v2279_v50, %v2283_v29  ;;  %3372 = vmatprep.subr.bf16.mxu1 %v4966_v19  ;;  %v2287_v50 = vld [vmem:[%s7646_s5 + $0x1d8] sm:$0xff]  ;;  %v2286_v29 = vld [vmem:[%s7646_s5 + $0x1d0] sm:$0xff] }
 0x304   : > { %v4193_v26 = vmax.f32 %v4192_v20, %v3128_v16  ;;  %3373 = vmatpush1.bf16.msra.mxu1 %v4965_v18 }
 0x305   : > { %2747 = vmatmul.mubr.bf16.gmra.mrb[56].mxu1 %v6252_v14  ;;  %3250 = vmatmul.mubr.bf16.gmra.mrb[116].mxu0 %v6673_v46 }
 0x306   : > { %v3131_v24 = vpop.f32.mrb[68].mxu0  ;;  %2756 = vmatprep.mubr.bf16.mxu1 %v7679_v48  ;;  %3259 = vmatprep.mubr.bf16.mxu0 %v7679_v48 }
 0x307   : > { %v3132_v23 = vadd.f32 %v3131_v24, %v6550_v30  ;;  %v3133_v49 = vpop.f32.mrb[69].mxu0  ;;  %3725 = vmatprep.subr.bf16.mxu0 %v4968_v34 }
 0x308   : > { %v3134_v21 = vadd.f32 %v3133_v49, %v6552_v44  ;;  %v3135_v37 = vpop.f32.mrb[70].mxu0  ;;  %3726 = vmatpush1.bf16.msra.mxu0 %v4967_v42 }
 0x309   : > { %v4157_v22 = vmax.f32 %v4156_v6, %v3132_v23  ;;  %v3136_v63 = vadd.f32 %v3135_v37, %v6550_v30  ;;  %v3137_v32 = vpop.f32.mrb[71].mxu0 }
 0x30a   : > { %v4194_v41 = vmax.f32 %v4193_v26, %v3134_v21  ;;  %v3138_v28 = vadd.f32 %v3137_v32, %v6552_v44 }
 0x30b   : > { %v4158_v3 = vmax.f32 %v4157_v22, %v3136_v63 }
 0x30c   : > { %v4195_v59 = vmax.f32 %v4194_v41, %v3138_v28 }
 0x30d   : > { %2757 = vmatmul.mubr.bf16.gmra.mrb[60].mxu1 %v6249_v43 }
 0x30e   : > { %2766 = vmatprep.mubr.bf16.mxu1 %v7679_v48 }
 0x314   : > { %v5074_v0 = vpop.f32.mrb[12].mxu1 }
 0x315   : > { %v2062_v12 = vadd.f32 %v6532_v36, %v5074_v0  ;;  %v2053_v55 = vpop.f32.mrb[13].mxu1  ;;  %2767 = vmatmul.mubr.bf16.gmra.mrb[64].mxu1 %v6309_v47 }
 0x316   : > { %v2054_v60 = vadd.f32 %v6532_v36, %v2053_v55  ;;  %v5075_v40 = vpop.f32.mrb[14].mxu1  ;;  %2776 = vmatprep.mubr.bf16.mxu1 %v7679_v48 }
 0x317   : > { %v2065_v39 = vadd.f32 %v6532_v36, %v5075_v40  ;;  %v2056_v33 = vpop.f32.mrb[15].mxu1  ;;  %v2178_v17 = vmax.f32 %v2062_v12, 0.0 }
 0x318   : > { %v2057_v4 = vadd.f32 %v6532_v36, %v2056_v33  ;;  %v2176_v9 = vmax.f32 %v2054_v60, 0.0 }
 0x319   : > { %v2179_v8 = vmax.f32 %v2065_v39, 0.0 }
 0x31a   : > { %v2177_v13 = vmax.f32 %v2057_v4, 0.0  ;;  %v2291_v4 = vld [vmem:[%s7646_s5 + $0x1f8] sm:$0xff] }
 0x31b   : > { %v6725_v54 = vpack.c.bf16 %v2179_v8, %v2178_v17  ;;  %v4976_v18 = vcombine.high %v2287_v50, %v2291_v4  ;;  %v4975_v19 = vcombine.low %v2287_v50, %v2291_v4  ;;  %v2290_v17 = vld [vmem:[%s7646_s5 + $0x1f0] sm:$0xff] }
 0x31c   : > { %v6727_v20 = vpack.c.bf16 %v2177_v13, %v2176_v9  ;;  %v4973_v8 = vcombine.low %v2286_v29, %v2290_v17  ;;  %v4974_v42 = vcombine.high %v2286_v29, %v2290_v17 }
 0x31d   : > { %2777 = vmatmul.mubr.bf16.gmra.mrb[68].mxu1 %v6305_v25  ;;  %3727 = vmatprep.subr.bf16.mxu0 %v4976_v18 }
 0x31e   : > { %3260 = vmatmul.mubr.bf16.gmra.mrb[120].mxu0 %v6727_v20  ;;  %2786 = vmatprep.mubr.bf16.mxu1 %v7679_v48 }
 0x31f   : > { %v3141_v16 = vpop.f32.mrb[72].mxu0  ;;  %3269 = vmatprep.mubr.bf16.mxu0 %v7679_v48  ;;  %3728 = vmatpush1.bf16.msra.mxu0 %v4975_v19 }
 0x320   : > { %v3142_v6 = vadd.f32 %v3141_v16, %v6550_v30  ;;  %v3143_v26 = vpop.f32.mrb[73].mxu0  ;;  %3374 = vmatprep.subr.bf16.mxu1 %v4974_v42 }
 0x321   : > { %v3144_v24 = vadd.f32 %v3143_v26, %v6552_v44  ;;  %v3145_v23 = vpop.f32.mrb[74].mxu0  ;;  %3375 = vmatpush1.bf16.msra.mxu1 %v4973_v8 }
 0x322   : > { %v4159_v49 = vmax.f32 %v4158_v3, %v3142_v6  ;;  %v3146_v21 = vadd.f32 %v3145_v23, %v6550_v30  ;;  %v3147_v37 = vpop.f32.mrb[75].mxu0 }
 0x323   : > { %v4196_v22 = vmax.f32 %v4195_v59, %v3144_v24  ;;  %v3148_v63 = vadd.f32 %v3147_v37, %v6552_v44 }
 0x324   : > { %v4160_v32 = vmax.f32 %v4159_v49, %v3146_v21 }
 0x325   : > { %v4197_v41 = vmax.f32 %v4196_v22, %v3148_v63  ;;  %2787 = vmatmul.mubr.bf16.gmra.mrb[72].mxu1 %v6390_v51 }
 0x326   : > { %3270 = vmatmul.mubr.bf16.gmra.mrb[124].mxu0 %v6725_v54  ;;  %2796 = vmatprep.mubr.bf16.mxu1 %v7679_v48 }
 0x327   : > { %v3151_v28 = vpop.f32.mrb[76].mxu0  ;;  %3279 = vmatprep.mubr.bf16.mxu0 %v7679_v48 }
 0x328   : > { %v3152_v0 = vadd.f32 %v3151_v28, %v6550_v30  ;;  %v3153_v3 = vpop.f32.mrb[77].mxu0 }
 0x329   : > { %v3154_v12 = vadd.f32 %v3153_v3, %v6552_v44  ;;  %v3155_v55 = vpop.f32.mrb[78].mxu0 }
 0x32a   : > { %v4161_v59 = vmax.f32 %v4160_v32, %v3152_v0  ;;  %v3156_v60 = vadd.f32 %v3155_v55, %v6550_v30  ;;  %v3157_v40 = vpop.f32.mrb[79].mxu0 }
 0x32b   : > { %v4198_v39 = vmax.f32 %v4197_v41, %v3154_v12  ;;  %v3158_v33 = vadd.f32 %v3157_v40, %v6552_v44 }
 0x32c   : > { %v4162_v1 = vmax.f32 %v4161_v59, %v3156_v60 }
 0x32d   : > { %v4199_v62 = vmax.f32 %v4198_v39, %v3158_v33  ;;  %2797 = vmatmul.mubr.bf16.gmra.mrb[76].mxu1 %v6383_v31 }
 0x32e   : > { %2806 = vmatprep.mubr.bf16.mxu1 %v7679_v48 }
 0x335   : > { %2807 = vmatmul.mubr.bf16.gmra.mrb[80].mxu1 %v6455_v61 }
 0x336   : > { %2816 = vmatprep.mubr.bf16.mxu1 %v7679_v48 }
 0x339   : > { %v5078_v34 = vpop.f32.mrb[16].mxu1 }
 0x33a   : > { %v2078_v9 = vadd.f32 %v6532_v36, %v5078_v34  ;;  %v2069_v13 = vpop.f32.mrb[17].mxu1 }
 0x33b   : > { %v2070_v16 = vadd.f32 %v6532_v36, %v2069_v13  ;;  %v5079_v6 = vpop.f32.mrb[18].mxu1 }
 0x33c   : > { %v2081_v26 = vadd.f32 %v6532_v36, %v5079_v6  ;;  %v2072_v24 = vpop.f32.mrb[19].mxu1  ;;  %v2182_v49 = vmax.f32 %v2078_v9, 0.0 }
 0x33d   : > { %v2073_v23 = vadd.f32 %v6532_v36, %v2072_v24  ;;  %2817 = vmatmul.mubr.bf16.gmra.mrb[84].mxu1 %v6450_v11  ;;  %v2180_v37 = vmax.f32 %v2070_v16, 0.0 }
 0x33e   : > { %v2183_v21 = vmax.f32 %v2081_v26, 0.0  ;;  %2826 = vmatprep.mubr.bf16.mxu1 %v7679_v48 }
 0x33f   : > { %v2181_v22 = vmax.f32 %v2073_v23, 0.0 }
 0x340   : > { %v6767_v63 = vpack.c.bf16 %v2183_v21, %v2182_v49 }
 0x341   : > { %v6769_v32 = vpack.c.bf16 %v2181_v22, %v2180_v37 }
 0x343   : > { %3280 = vmatmul.mubr.bf16.gmra.mrb[128].mxu0 %v6769_v32 }
 0x344   : > { %v3161_v41 = vpop.f32.mrb[80].mxu0  ;;  %3289 = vmatprep.mubr.bf16.mxu0 %v7679_v48 }
 0x345   : > { %v3162_v28 = vadd.f32 %v3161_v41, %v6550_v30  ;;  %2827 = vmatmul.mubr.bf16.gmra.mrb[88].mxu1 %v6501_v45  ;;  %v3163_v0 = vpop.f32.mrb[81].mxu0 }
 0x346   : > { %v3164_v3 = vadd.f32 %v3163_v0, %v6552_v44  ;;  %v3165_v12 = vpop.f32.mrb[82].mxu0  ;;  %2836 = vmatprep.mubr.bf16.mxu1 %v7679_v48 }
 0x347   : > { %v4163_v55 = vmax.f32 %v4162_v1, %v3162_v28  ;;  %v3166_v59 = vadd.f32 %v3165_v12, %v6550_v30  ;;  %v3167_v60 = vpop.f32.mrb[83].mxu0 }
 0x348   : > { %v4200_v40 = vmax.f32 %v4199_v62, %v3164_v3  ;;  %v3168_v39 = vadd.f32 %v3167_v60, %v6552_v44 }
 0x349   : > { %v4164_v33 = vmax.f32 %v4163_v55, %v3166_v59 }
 0x34a   : > { %v4201_v50 = vmax.f32 %v4200_v40, %v3168_v39 }
 0x34b   : > { %3290 = vmatmul.mubr.bf16.gmra.mrb[132].mxu0 %v6767_v63 }
 0x34c   : > { %v3171_v4 = vpop.f32.mrb[84].mxu0  ;;  %3299 = vmatprep.mubr.bf16.mxu0 %v7679_v48 }
 0x34d   : > { %v3172_v18 = vadd.f32 %v3171_v4, %v6550_v30  ;;  %2837 = vmatmul.mubr.bf16.gmra.mrb[92].mxu1 %v6499_v2  ;;  %v3173_v19 = vpop.f32.mrb[85].mxu0 }
 0x34e   : > { %v3174_v1 = vadd.f32 %v3173_v19, %v6552_v44  ;;  %v3175_v29 = vpop.f32.mrb[86].mxu0  ;;  %2846 = vmatprep.mubr.bf16.mxu1 %v7679_v48 }
 0x34f   : > { %v4165_v62 = vmax.f32 %v4164_v33, %v3172_v18  ;;  %v3176_v17 = vadd.f32 %v3175_v29, %v6550_v30  ;;  %v3177_v8 = vpop.f32.mrb[87].mxu0 }
 0x350   : > { %v4202_v42 = vmax.f32 %v4201_v50, %v3174_v1  ;;  %v3178_v34 = vadd.f32 %v3177_v8, %v6552_v44 }
 0x351   : > { %v4166_v9 = vmax.f32 %v4165_v62, %v3176_v17 }
 0x352   : > { %v4203_v13 = vmax.f32 %v4202_v42, %v3178_v34 }
 0x355   : > { %2847 = vmatmul.mubr.bf16.gmra.mrb[96].mxu1 %v6557_v27 }
 0x356   : > { %2856 = vmatprep.mubr.bf16.mxu1 %v7679_v48 }
 0x35a   : > { %v5082_v16 = vpop.f32.mrb[20].mxu1 }
 0x35b   : > { %v2094_v6 = vadd.f32 %v6532_v36, %v5082_v16  ;;  %v2085_v26 = vpop.f32.mrb[21].mxu1 }
 0x35c   : > { %v2086_v24 = vadd.f32 %v6532_v36, %v2085_v26  ;;  %v5083_v23 = vpop.f32.mrb[22].mxu1 }
 0x35d   : > { %v2097_v49 = vadd.f32 %v6532_v36, %v5083_v23  ;;  %v2088_v21 = vpop.f32.mrb[23].mxu1  ;;  %2857 = vmatmul.mubr.bf16.gmra.mrb[100].mxu1 %v6555_v5  ;;  %v2186_v22 = vmax.f32 %v2094_v6, 0.0 }
 0x35e   : > { %v2089_v37 = vadd.f32 %v6532_v36, %v2088_v21  ;;  %2866 = vmatprep.mubr.bf16.mxu1 %v7679_v48  ;;  %v2184_v28 = vmax.f32 %v2086_v24, 0.0 }
 0x35f   : > { %v2187_v41 = vmax.f32 %v2097_v49, 0.0 }
 0x360   : > { %v2185_v0 = vmax.f32 %v2089_v37, 0.0 }
 0x361   : > { %v6795_v3 = vpack.c.bf16 %v2187_v41, %v2186_v22 }
 0x362   : > { %v6797_v12 = vpack.c.bf16 %v2185_v0, %v2184_v28 }
 0x364   : > { %3300 = vmatmul.mubr.bf16.gmra.mrb[136].mxu0 %v6797_v12 }
 0x365   : > { %2867 = vmatmul.mubr.bf16.gmra.mrb[104].mxu1 %v6625_v53  ;;  %v3181_v55 = vpop.f32.mrb[88].mxu0  ;;  %3309 = vmatprep.mubr.bf16.mxu0 %v7679_v48 }
 0x366   : > { %v3182_v59 = vadd.f32 %v3181_v55, %v6550_v30  ;;  %v3183_v60 = vpop.f32.mrb[89].mxu0  ;;  %2876 = vmatprep.mubr.bf16.mxu1 %v7679_v48 }
 0x367   : > { %v3184_v40 = vadd.f32 %v3183_v60, %v6552_v44  ;;  %v3185_v39 = vpop.f32.mrb[90].mxu0 }
 0x368   : > { %v4167_v33 = vmax.f32 %v4166_v9, %v3182_v59  ;;  %v3186_v50 = vadd.f32 %v3185_v39, %v6550_v30  ;;  %v3187_v4 = vpop.f32.mrb[91].mxu0 }
 0x369   : > { %v4204_v18 = vmax.f32 %v4203_v13, %v3184_v40  ;;  %v3188_v19 = vadd.f32 %v3187_v4, %v6552_v44 }
 0x36a   : > { %v4168_v1 = vmax.f32 %v4167_v33, %v3186_v50 }
 0x36b   : > { %v4205_v29 = vmax.f32 %v4204_v18, %v3188_v19 }
 0x36c   : > { %3310 = vmatmul.mubr.bf16.gmra.mrb[140].mxu0 %v6795_v3 }
 0x36d   : > { %2877 = vmatmul.mubr.bf16.gmra.mrb[108].mxu1 %v6621_v15  ;;  %v3191_v62 = vpop.f32.mrb[92].mxu0  ;;  %3319 = vmatprep.mubr.bf16.mxu0 %v7679_v48 }
 0x36e   : > { %v3192_v17 = vadd.f32 %v3191_v62, %v6550_v30  ;;  %v3193_v8 = vpop.f32.mrb[93].mxu0  ;;  %2886 = vmatprep.mubr.bf16.mxu1 %v7679_v48 }
 0x36f   : > { %v3194_v42 = vadd.f32 %v3193_v8, %v6552_v44  ;;  %v3195_v34 = vpop.f32.mrb[94].mxu0 }
 0x370   : > { %v4169_v9 = vmax.f32 %v4168_v1, %v3192_v17  ;;  %v3196_v13 = vadd.f32 %v3195_v34, %v6550_v30  ;;  %v3197_v16 = vpop.f32.mrb[95].mxu0 }
 0x371   : > { %v4206_v6 = vmax.f32 %v4205_v29, %v3194_v42  ;;  %v3198_v26 = vadd.f32 %v3197_v16, %v6552_v44 }
 0x372   : > { %v6815_v24 = vmax.f32 %v4169_v9, %v3196_v13 }
 0x373   : > { %v6817_v23 = vmax.f32 %v4206_v6, %v3198_v26 }
 0x375   : > { %2887 = vmatmul.mubr.bf16.gmra.mrb[112].mxu1 %v6675_v57 }
 0x376   : > { %2896 = vmatprep.mubr.bf16.mxu1 %v7679_v48 }
 0x37d   : > { %2897 = vmatmul.mubr.bf16.gmra.mrb[116].mxu1 %v6673_v46 }
 0x37e   : > { %2906 = vmatprep.mubr.bf16.mxu1 %v7679_v48 }
 0x37f   : > { %v5086_v49 = vpop.f32.mrb[24].mxu1 }
 0x380   : > { %v2110_v21 = vadd.f32 %v6532_v36, %v5086_v49  ;;  %v2101_v37 = vpop.f32.mrb[25].mxu1 }
 0x381   : > { %v2102_v22 = vadd.f32 %v6532_v36, %v2101_v37  ;;  %v5087_v41 = vpop.f32.mrb[26].mxu1 }
 0x382   : > { %v2113_v28 = vadd.f32 %v6532_v36, %v5087_v41  ;;  %v2104_v0 = vpop.f32.mrb[27].mxu1  ;;  %v2190_v59 = vmax.f32 %v2110_v21, 0.0 }
 0x383   : > { %v2105_v55 = vadd.f32 %v6532_v36, %v2104_v0  ;;  %v2188_v40 = vmax.f32 %v2102_v22, 0.0 }
 0x384   : > { %v2191_v60 = vmax.f32 %v2113_v28, 0.0 }
 0x385   : > { %v2189_v39 = vmax.f32 %v2105_v55, 0.0  ;;  %2907 = vmatmul.mubr.bf16.gmra.mrb[120].mxu1 %v6727_v20 }
 0x386   : > { %v6828_v33 = vpack.c.bf16 %v2191_v60, %v2190_v59  ;;  %2916 = vmatprep.mubr.bf16.mxu1 %v7679_v48 }
 0x387   : > { %v6831_v50 = vpack.c.bf16 %v2189_v39, %v2188_v40 }
 0x389   : > { %3320 = vmatmul.mubr.bf16.gmra.mrb[144].mxu0 %v6831_v50 }
 0x38a   : > { %v3201_v4 = vpop.f32.mrb[96].mxu0  ;;  %3329 = vmatprep.mubr.bf16.mxu0 %v7679_v48 }
 0x38b   : > { %v3203_v18 = vpop.f32.mrb[97].mxu0  ;;  %v3202_v1 = vadd.f32 %v3201_v4, %v6550_v30  ;;  %v5257_v4 = vld [vmem:[%s7645_s4] ss:$0 sm:$0xff] }
 0x38c   : > { %v3205_v19 = vpop.f32.mrb[98].mxu0  ;;  %v3204_v17 = vadd.f32 %v3203_v18, %v6552_v44 }
 0x38d   : > { %v3206_v29 = vadd.f32 %v3205_v19, %v6550_v30  ;;  %2917 = vmatmul.mubr.bf16.gmra.mrb[124].mxu1 %v6725_v54  ;;  %v3207_v62 = vpop.f32.mrb[99].mxu0 }
 0x38e   : > { %v3208_v8 = vadd.f32 %v3207_v62, %v6552_v44  ;;  %2926 = vmatprep.mubr.bf16.mxu1 %v7679_v48 }
 0x38f   : > { %v4436_v42 = vmax.f32 %v3202_v1, %v3206_v29 }
 0x390   : > { %v4473_v34 = vmax.f32 %v3204_v17, %v3208_v8 }
 0x391   : > { %3330 = vmatmul.mubr.bf16.gmra.mrb[148].mxu0 %v6828_v33 }
 0x392   : > { %v3211_v9 = vpop.f32.mrb[100].mxu0  ;;  %3339 = vmatprep.mubr.bf16.mxu0 %v7679_v48 }
 0x393   : > { %v3212_v13 = vadd.f32 %v3211_v9, %v6550_v30  ;;  %v3213_v16 = vpop.f32.mrb[101].mxu0 }
 0x394   : > { %v3214_v6 = vadd.f32 %v3213_v16, %v6552_v44  ;;  %v3215_v26 = vpop.f32.mrb[102].mxu0 }
 0x395   : > { %v4437_v49 = vmax.f32 %v4436_v42, %v3212_v13  ;;  %v3216_v21 = vadd.f32 %v3215_v26, %v6550_v30  ;;  %2927 = vmatmul.mubr.bf16.gmra.mrb[128].mxu1 %v6769_v32  ;;  %v3217_v37 = vpop.f32.mrb[103].mxu0 }
 0x396   : > { %v4474_v22 = vmax.f32 %v4473_v34, %v3214_v6  ;;  %v3218_v41 = vadd.f32 %v3217_v37, %v6552_v44  ;;  %2936 = vmatprep.mubr.bf16.mxu1 %v7679_v48  ;;  %v7693_v34 = vsub.s32 0, %v7691_v52  ;;  %v7694_v6 = vsub.s32 1, %v7691_v52 }
 0x397   : > { %v4438_v28 = vmax.f32 %v4437_v49, %v3216_v21 }
 0x398   : > { %v4475_v0 = vmax.f32 %v4474_v22, %v3218_v41 }
 0x39d   : > { %2937 = vmatmul.mubr.bf16.gmra.mrb[132].mxu1 %v6767_v63 }
 0x39e   : > { %2946 = vmatprep.mubr.bf16.mxu1 %v7679_v48 }
 0x3a0   : > { %v5090_v55 = vpop.f32.mrb[28].mxu1 }
 0x3a1   : > { %v2126_v59 = vadd.f32 %v6532_v36, %v5090_v55  ;;  %v2117_v60 = vpop.f32.mrb[29].mxu1 }
 0x3a2   : > { %v2118_v40 = vadd.f32 %v6532_v36, %v2117_v60  ;;  %v5091_v39 = vpop.f32.mrb[30].mxu1  ;;  %v5258_v36 = vld [vmem:[%s7647_s6] sm:$0xff] }
 0x3a3   : > { %v2129_v18 = vadd.f32 %v5257_v4, %v5091_v39  ;;  %v2120_v19 = vpop.f32.mrb[31].mxu1  ;;  %v2194_v29 = vmax.f32 %v2126_v59, 0.0  ;;  %v6865_v9 = vrot.slane %v5258_v36, %v7693_v34  ;;  %v6871_v26 = vrot.slane %v5258_v36, %v7694_v6 }
 0x3a4   : > { %v2121_v1 = vadd.f32 %v5257_v4, %v2120_v19  ;;  %v2192_v17 = vmax.f32 %v2118_v40, 0.0 }
 0x3a5   : > { %v2195_v62 = vmax.f32 %v2129_v18, 0.0  ;;  %2947 = vmatmul.mubr.bf16.gmra.mrb[136].mxu1 %v6797_v12 }
 0x3a6   : > { %v2193_v8 = vmax.f32 %v2121_v1, 0.0  ;;  %2956 = vmatprep.mubr.bf16.mxu1 %v7679_v48 }
 0x3a7   : > { %v6858_v42 = vpack.c.bf16 %v2195_v62, %v2194_v29 }
 0x3a8   : > { %v6867_v13 = vpack.c.bf16 %v2193_v8, %v2192_v17  ;;  %v2688_v16 = vpop.f32.mrb[32].mxu1 }
 0x3a9   : > { %v2690_v49 = vpop.f32.mrb[33].mxu1  ;;  %v2689_v37 = vadd.f32 %v2688_v16, %v6865_v9 }
 0x3aa   : > { %v2692_v21 = vpop.f32.mrb[34].mxu1  ;;  %3340 = vmatmul.mubr.bf16.gmra.mrb[152].mxu0 %v6867_v13  ;;  %v2691_v59 = vadd.f32 %v2690_v49, %v6871_v26 }
 0x3ab   : > { %v2693_v22 = vadd.f32 %v2692_v21, %v6865_v9  ;;  %v2694_v41 = vpop.f32.mrb[35].mxu1  ;;  %v3221_v55 = vpop.f32.mrb[104].mxu0  ;;  %3349 = vmatprep.mubr.bf16.mxu0 %v7679_v48 }
 0x3ac   : > { %v2695_v60 = vadd.f32 %v2694_v41, %v6871_v26  ;;  %v3222_v40 = vadd.f32 %v3221_v55, %v6550_v30  ;;  %v3223_v39 = vpop.f32.mrb[105].mxu0 }
 0x3ad   : > { %v4066_v4 = vmax.f32 %v2689_v37, %v2693_v22  ;;  %v3224_v18 = vadd.f32 %v3223_v39, %v6552_v44  ;;  %2957 = vmatmul.mubr.bf16.gmra.mrb[140].mxu1 %v6795_v3  ;;  %v3225_v19 = vpop.f32.mrb[106].mxu0 }
 0x3ae   : > { %v4103_v1 = vmax.f32 %v2691_v59, %v2695_v60  ;;  %v4439_v29 = vmax.f32 %v4438_v28, %v3222_v40  ;;  %v3226_v62 = vadd.f32 %v3225_v19, %v6550_v30  ;;  %v3227_v17 = vpop.f32.mrb[107].mxu0  ;;  %2966 = vmatprep.mubr.bf16.mxu1 %v7679_v48 }
 0x3af   : > { %v4476_v8 = vmax.f32 %v4475_v0, %v3224_v18  ;;  %v3228_v36 = vadd.f32 %v3227_v17, %v6552_v44 }
 0x3b0   : > { %v4440_v34 = vmax.f32 %v4439_v29, %v3226_v62  ;;  %v2698_v16 = vpop.f32.mrb[36].mxu1 }
 0x3b1   : > { %v4477_v6 = vmax.f32 %v4476_v8, %v3228_v36  ;;  %v2699_v49 = vadd.f32 %v2698_v16, %v6865_v9  ;;  %v2700_v21 = vpop.f32.mrb[37].mxu1 }
 0x3b2   : > { %v2701_v37 = vadd.f32 %v2700_v21, %v6871_v26  ;;  %v2702_v22 = vpop.f32.mrb[38].mxu1  ;;  %3350 = vmatmul.mubr.bf16.gmra.mrb[156].mxu0 %v6858_v42 }
 0x3b3   : > { %v4067_v28 = vmax.f32 %v4066_v4, %v2699_v49  ;;  %v2703_v41 = vadd.f32 %v2702_v22, %v6865_v9  ;;  %v2704_v55 = vpop.f32.mrb[39].mxu1  ;;  %v3231_v59 = vpop.f32.mrb[108].mxu0  ;;  %3745 = vmatprep.mubr.bf16.mxu0 %v7679_v48 }
 0x3b4   : > { %v4104_v0 = vmax.f32 %v4103_v1, %v2701_v37  ;;  %v2705_v60 = vadd.f32 %v2704_v55, %v6871_v26  ;;  %v3232_v40 = vadd.f32 %v3231_v59, %v6550_v30  ;;  %v3233_v39 = vpop.f32.mrb[109].mxu0 }
 0x3b5   : > { %v4068_v18 = vmax.f32 %v4067_v28, %v2703_v41  ;;  %v3234_v19 = vadd.f32 %v3233_v39, %v6552_v44  ;;  %2967 = vmatmul.mubr.bf16.gmra.mrb[144].mxu1 %v6831_v50  ;;  %v3235_v29 = vpop.f32.mrb[110].mxu0 }
 0x3b6   : > { %v4105_v62 = vmax.f32 %v4104_v0, %v2705_v60  ;;  %v6894_v4 = vmax.f32 %v4440_v34, %v3232_v40  ;;  %v6897_v17 = vadd.f32 %v3235_v29, %v6550_v30  ;;  %v3237_v8 = vpop.f32.mrb[111].mxu0  ;;  %2976 = vmatprep.mubr.bf16.mxu1 %v7679_v48 }
 0x3b7   : > { %v6900_v1 = vmax.f32 %v4477_v6, %v3234_v19  ;;  %v6903_v36 = vadd.f32 %v3237_v8, %v6552_v44 }
 0x3b8   : > { %v4442_v16 = vmax.f32 %v6894_v4, %v6897_v17  ;;  %v2708_v49 = vpop.f32.mrb[40].mxu1 }
 0x3b9   : > { %v4479_v21 = vmax.f32 %v6900_v1, %v6903_v36  ;;  %v2709_v34 = vadd.f32 %v2708_v49, %v6865_v9  ;;  %v2710_v37 = vpop.f32.mrb[41].mxu1 }
 0x3ba   : > { %v2711_v22 = vadd.f32 %v2710_v37, %v6871_v26  ;;  %v2712_v28 = vpop.f32.mrb[42].mxu1  ;;  %3746 = vmatmul.mubr.bf16.vlgmr.msra.gmra.mrb[160].mxu0 %v6178_v7 }
 0x3bb   : > { %v4069_v6 = vmax.f32 %v4068_v18, %v2709_v34  ;;  %v2713_v41 = vadd.f32 %v2712_v28, %v6865_v9  ;;  %v2714_v55 = vpop.f32.mrb[43].mxu1  ;;  %3755 = vmatprep.mubr.bf16.mxu0 %v7679_v48 }
 0x3bc   : > { %v4106_v59 = vmax.f32 %v4105_v62, %v2711_v22  ;;  %v2715_v0 = vadd.f32 %v2714_v55, %v6871_v26 }
 0x3bd   : > { %v4070_v60 = vmax.f32 %v4069_v6, %v2713_v41  ;;  %2977 = vmatmul.mubr.bf16.gmra.mrb[148].mxu1 %v6828_v33 }
 0x3be   : > { %v4107_v40 = vmax.f32 %v4106_v59, %v2715_v0  ;;  %2986 = vmatprep.mubr.bf16.mxu1 %v7679_v48 }
 0x3c0   : > { %v2718_v39 = vpop.f32.mrb[44].mxu1 }
 0x3c1   : > { %v2719_v19 = vadd.f32 %v2718_v39, %v6865_v9  ;;  %v2720_v29 = vpop.f32.mrb[45].mxu1 }
 0x3c2   : > { %v2721_v18 = vadd.f32 %v2720_v29, %v6871_v26  ;;  %v2722_v4 = vpop.f32.mrb[46].mxu1  ;;  %3756 = vmatmul.mubr.bf16.gmra.mrb[164].mxu0 %v6176_v56 }
 0x3c3   : > { %v4071_v17 = vmax.f32 %v4070_v60, %v2719_v19  ;;  %v2723_v62 = vadd.f32 %v2722_v4, %v6865_v9  ;;  %v2724_v8 = vpop.f32.mrb[47].mxu1  ;;  %3765 = vmatprep.mubr.bf16.mxu0 %v7679_v48 }
 0x3c4   : > { %v4108_v49 = vmax.f32 %v4107_v40, %v2721_v18  ;;  %v2725_v34 = vadd.f32 %v2724_v8, %v6871_v26 }
 0x3c5   : > { %v4072_v37 = vmax.f32 %v4071_v17, %v2723_v62  ;;  %2987 = vmatmul.mubr.bf16.gmra.mrb[152].mxu1 %v6867_v13 }
 0x3c6   : > { %v4109_v22 = vmax.f32 %v4108_v49, %v2725_v34  ;;  %2996 = vmatprep.mubr.bf16.mxu1 %v7679_v48 }
 0x3c8   : > { %v2728_v28 = vpop.f32.mrb[48].mxu1 }
 0x3c9   : > { %v2729_v6 = vadd.f32 %v2728_v28, %v6865_v9  ;;  %v2730_v41 = vpop.f32.mrb[49].mxu1 }
 0x3ca   : > { %v2731_v55 = vadd.f32 %v2730_v41, %v6871_v26  ;;  %v2732_v59 = vpop.f32.mrb[50].mxu1  ;;  %3766 = vmatmul.mubr.bf16.gmra.mrb[168].mxu0 %v6193_v10 }
 0x3cb   : > { %v4073_v0 = vmax.f32 %v4072_v37, %v2729_v6  ;;  %v2733_v60 = vadd.f32 %v2732_v59, %v6865_v9  ;;  %v2734_v40 = vpop.f32.mrb[51].mxu1  ;;  %3775 = vmatprep.mubr.bf16.mxu0 %v7679_v48 }
 0x3cc   : > { %v4110_v39 = vmax.f32 %v4109_v22, %v2731_v55  ;;  %v2735_v19 = vadd.f32 %v2734_v40, %v6871_v26 }
 0x3cd   : > { %v4074_v29 = vmax.f32 %v4073_v0, %v2733_v60  ;;  %2997 = vmatmul.mubr.bf16.gmra.mrb[156].mxu1 %v6858_v42 }
 0x3ce   : > { %v4111_v18 = vmax.f32 %v4110_v39, %v2735_v19  ;;  %3392 = vmatprep.mubr.bf16.mxu1 %v7679_v48 }
 0x3d0   : > { %v2738_v4 = vpop.f32.mrb[52].mxu1  ;;  %v3241_v17 = vpop.f32.mrb[112].mxu0 }
 0x3d1   : > { %v2739_v62 = vadd.f32 %v2738_v4, %v6865_v9  ;;  %v3242_v8 = vadd.f32 %v3241_v17, %v6550_v30  ;;  %v2740_v49 = vpop.f32.mrb[53].mxu1  ;;  %v3243_v34 = vpop.f32.mrb[113].mxu0 }
 0x3d2   : > { %v2741_v37 = vadd.f32 %v2740_v49, %v6871_v26  ;;  %v3244_v22 = vadd.f32 %v3243_v34, %v6552_v44  ;;  %v2742_v28 = vpop.f32.mrb[54].mxu1  ;;  %v3245_v6 = vpop.f32.mrb[114].mxu0  ;;  %3776 = vmatmul.mubr.bf16.gmra.mrb[172].mxu0 %v6190_v58 }
 0x3d3   : > { %v4075_v41 = vmax.f32 %v4074_v29, %v2739_v62  ;;  %v4443_v55 = vmax.f32 %v4442_v16, %v3242_v8  ;;  %v2743_v59 = vadd.f32 %v2742_v28, %v6865_v9  ;;  %v3246_v0 = vadd.f32 %v3245_v6, %v6550_v30  ;;  %v2744_v60 = vpop.f32.mrb[55].mxu1  ;;  %v3247_v40 = vpop.f32.mrb[115].mxu0  ;;  %3785 = vmatprep.mubr.bf16.mxu0 %v7679_v48 }
 0x3d4   : > { %v4112_v39 = vmax.f32 %v4111_v18, %v2741_v37  ;;  %v4480_v19 = vmax.f32 %v4479_v21, %v3244_v22  ;;  %v2745_v4 = vadd.f32 %v2744_v60, %v6871_v26  ;;  %v3248_v17 = vadd.f32 %v3247_v40, %v6552_v44 }
 0x3d5   : > { %v4076_v49 = vmax.f32 %v4075_v41, %v2743_v59  ;;  %v4444_v29 = vmax.f32 %v4443_v55, %v3246_v0  ;;  %3393 = vmatmul.mubr.bf16.vlgmr.msra.gmra.mrb[160].mxu1 %v6178_v7 }
 0x3d6   : > { %v4113_v16 = vmax.f32 %v4112_v39, %v2745_v4  ;;  %v4481_v62 = vmax.f32 %v4480_v19, %v3248_v17  ;;  %3402 = vmatprep.mubr.bf16.mxu1 %v7679_v48 }
 0x3d8   : > { %v2748_v8 = vpop.f32.mrb[56].mxu1  ;;  %v3251_v34 = vpop.f32.mrb[116].mxu0 }
 0x3d9   : > { %v2749_v18 = vadd.f32 %v2748_v8, %v6865_v9  ;;  %v3252_v37 = vadd.f32 %v3251_v34, %v6550_v30  ;;  %v2750_v1 = vpop.f32.mrb[57].mxu1  ;;  %v3253_v36 = vpop.f32.mrb[117].mxu0 }
 0x3da   : > { %v2751_v21 = vadd.f32 %v2750_v1, %v6871_v26  ;;  %v3254_v22 = vadd.f32 %v3253_v36, %v6552_v44  ;;  %v2752_v28 = vpop.f32.mrb[58].mxu1  ;;  %v3255_v6 = vpop.f32.mrb[118].mxu0  ;;  %3786 = vmatmul.mubr.bf16.gmra.mrb[176].mxu0 %v6219_v38 }
 0x3db   : > { %v4077_v7 = vmax.f32 %v4076_v49, %v2749_v18  ;;  %v6953_v41 = vmax.f32 %v4444_v29, %v3252_v37  ;;  %v2753_v55 = vadd.f32 %v2752_v28, %v6865_v9  ;;  %v6957_v59 = vadd.f32 %v3255_v6, %v6550_v30  ;;  %v2754_v0 = vpop.f32.mrb[59].mxu1  ;;  %v3257_v60 = vpop.f32.mrb[119].mxu0  ;;  %3795 = vmatprep.mubr.bf16.mxu0 %v7679_v48 }
 0x3dc   : > { %v4114_v40 = vmax.f32 %v4113_v16, %v2751_v21  ;;  %v6960_v39 = vmax.f32 %v4481_v62, %v3254_v22  ;;  %v2755_v19 = vadd.f32 %v2754_v0, %v6871_v26  ;;  %v3258_v4 = vadd.f32 %v3257_v60, %v6552_v44 }
 0x3dd   : > { %v4078_v17 = vmax.f32 %v4077_v7, %v2753_v55  ;;  %v4446_v49 = vmax.f32 %v6953_v41, %v6957_v59  ;;  %3403 = vmatmul.mubr.bf16.gmra.mrb[164].mxu1 %v6176_v56 }
 0x3de   : > { %v4115_v29 = vmax.f32 %v4114_v40, %v2755_v19  ;;  %v4483_v8 = vmax.f32 %v6960_v39, %v3258_v4  ;;  %3412 = vmatprep.mubr.bf16.mxu1 %v7679_v48 }
 0x3e0   : > { %v2758_v34 = vpop.f32.mrb[60].mxu1 }
 0x3e1   : > { %v2759_v16 = vadd.f32 %v2758_v34, %v6865_v9  ;;  %v2760_v62 = vpop.f32.mrb[61].mxu1 }
 0x3e2   : > { %v2761_v18 = vadd.f32 %v2760_v62, %v6871_v26  ;;  %v2762_v37 = vpop.f32.mrb[62].mxu1  ;;  %3796 = vmatmul.mubr.bf16.gmra.mrb[180].mxu0 %v6216_v35 }
 0x3e3   : > { %v4079_v1 = vmax.f32 %v4078_v17, %v2759_v16  ;;  %v2763_v36 = vadd.f32 %v2762_v37, %v6865_v9  ;;  %v2764_v21 = vpop.f32.mrb[63].mxu1  ;;  %3805 = vmatprep.mubr.bf16.mxu0 %v7679_v48 }
 0x3e4   : > { %v4116_v56 = vmax.f32 %v4115_v29, %v2761_v18  ;;  %v2765_v22 = vadd.f32 %v2764_v21, %v6871_v26 }
 0x3e5   : > { %v4080_v28 = vmax.f32 %v4079_v1, %v2763_v36  ;;  %3413 = vmatmul.mubr.bf16.gmra.mrb[168].mxu1 %v6193_v10 }
 0x3e6   : > { %v4117_v6 = vmax.f32 %v4116_v56, %v2765_v22  ;;  %3422 = vmatprep.mubr.bf16.mxu1 %v7679_v48 }
 0x3e8   : > { %v2768_v7 = vpop.f32.mrb[64].mxu1 }
 0x3e9   : > { %v2769_v41 = vadd.f32 %v2768_v7, %v6865_v9  ;;  %v2770_v55 = vpop.f32.mrb[65].mxu1 }
 0x3ea   : > { %v2771_v59 = vadd.f32 %v2770_v55, %v6871_v26  ;;  %v2772_v0 = vpop.f32.mrb[66].mxu1  ;;  %3806 = vmatmul.mubr.bf16.gmra.mrb[184].mxu0 %v6252_v14 }
 0x3eb   : > { %v4081_v60 = vmax.f32 %v4080_v28, %v2769_v41  ;;  %v2773_v40 = vadd.f32 %v2772_v0, %v6865_v9  ;;  %v2774_v39 = vpop.f32.mrb[67].mxu1  ;;  %3815 = vmatprep.mubr.bf16.mxu0 %v7679_v48 }
 0x3ec   : > { %v4118_v19 = vmax.f32 %v4117_v6, %v2771_v59  ;;  %v2775_v10 = vadd.f32 %v2774_v39, %v6871_v26 }
 0x3ed   : > { %v4082_v4 = vmax.f32 %v4081_v60, %v2773_v40  ;;  %3423 = vmatmul.mubr.bf16.gmra.mrb[172].mxu1 %v6190_v58 }
 0x3ee   : > { %v4119_v17 = vmax.f32 %v4118_v19, %v2775_v10  ;;  %3432 = vmatprep.mubr.bf16.mxu1 %v7679_v48 }
 0x3f0   : > { %v2778_v29 = vpop.f32.mrb[68].mxu1 }
 0x3f1   : > { %v2779_v34 = vadd.f32 %v2778_v29, %v6865_v9  ;;  %v2780_v16 = vpop.f32.mrb[69].mxu1  ;;  %v3261_v62 = vpop.f32.mrb[120].mxu0 }
 0x3f2   : > { %v2781_v18 = vadd.f32 %v2780_v16, %v6871_v26  ;;  %v3262_v37 = vadd.f32 %v3261_v62, %v6550_v30  ;;  %v2782_v1 = vpop.f32.mrb[70].mxu1  ;;  %v3263_v36 = vpop.f32.mrb[121].mxu0  ;;  %3816 = vmatmul.mubr.bf16.gmra.mrb[188].mxu0 %v6249_v43 }
 0x3f3   : > { %v4083_v21 = vmax.f32 %v4082_v4, %v2779_v34  ;;  %v2783_v56 = vadd.f32 %v2782_v1, %v6865_v9  ;;  %v3264_v58 = vadd.f32 %v3263_v36, %v6552_v44  ;;  %v2784_v22 = vpop.f32.mrb[71].mxu1  ;;  %v3265_v28 = vpop.f32.mrb[122].mxu0  ;;  %3825 = vmatprep.mubr.bf16.mxu0 %v7679_v48 }
 0x3f4   : > { %v4120_v6 = vmax.f32 %v4119_v17, %v2781_v18  ;;  %v4447_v7 = vmax.f32 %v4446_v49, %v3262_v37  ;;  %v2785_v41 = vadd.f32 %v2784_v22, %v6871_v26  ;;  %v3266_v55 = vadd.f32 %v3265_v28, %v6550_v30  ;;  %v3267_v59 = vpop.f32.mrb[123].mxu0 }
 0x3f5   : > { %v4084_v0 = vmax.f32 %v4083_v21, %v2783_v56  ;;  %v4484_v60 = vmax.f32 %v4483_v8, %v3264_v58  ;;  %v3268_v40 = vadd.f32 %v3267_v59, %v6552_v44  ;;  %3433 = vmatmul.mubr.bf16.gmra.mrb[176].mxu1 %v6219_v38 }
 0x3f6   : > { %v4121_v39 = vmax.f32 %v4120_v6, %v2785_v41  ;;  %v4448_v19 = vmax.f32 %v4447_v7, %v3266_v55  ;;  %3442 = vmatprep.mubr.bf16.mxu1 %v7679_v48 }
 0x3f7   : > { %v4485_v10 = vmax.f32 %v4484_v60, %v3268_v40 }
 0x3f8   : > { %v2788_v4 = vpop.f32.mrb[72].mxu1 }
 0x3f9   : > { %v2789_v17 = vadd.f32 %v2788_v4, %v6865_v9  ;;  %v2790_v49 = vpop.f32.mrb[73].mxu1  ;;  %v3271_v29 = vpop.f32.mrb[124].mxu0 }
 0x3fa   : > { %v2791_v34 = vadd.f32 %v2790_v49, %v6871_v26  ;;  %v3272_v16 = vadd.f32 %v3271_v29, %v6550_v30  ;;  %v2792_v62 = vpop.f32.mrb[74].mxu1  ;;  %v3273_v8 = vpop.f32.mrb[125].mxu0  ;;  %3826 = vmatmul.mubr.bf16.gmra.mrb[192].mxu0 %v6309_v47 }
 0x3fb   : > { %v4085_v18 = vmax.f32 %v4084_v0, %v2789_v17  ;;  %v2793_v38 = vadd.f32 %v2792_v62, %v6865_v9  ;;  %v3274_v37 = vadd.f32 %v3273_v8, %v6552_v44  ;;  %v2794_v1 = vpop.f32.mrb[75].mxu1  ;;  %v3275_v36 = vpop.f32.mrb[126].mxu0  ;;  %3835 = vmatprep.mubr.bf16.mxu0 %v7679_v48 }
 0x3fc   : > { %v4122_v21 = vmax.f32 %v4121_v39, %v2791_v34  ;;  %v7004_v56 = vmax.f32 %v4448_v19, %v3272_v16  ;;  %v2795_v58 = vadd.f32 %v2794_v1, %v6871_v26  ;;  %v7008_v22 = vadd.f32 %v3275_v36, %v6550_v30  ;;  %v3277_v28 = vpop.f32.mrb[127].mxu0 }
 0x3fd   : > { %v4086_v6 = vmax.f32 %v4085_v18, %v2793_v38  ;;  %v7010_v7 = vmax.f32 %v4485_v10, %v3274_v37  ;;  %v7013_v41 = vadd.f32 %v3277_v28, %v6552_v44  ;;  %3443 = vmatmul.mubr.bf16.gmra.mrb[180].mxu1 %v6216_v35 }
 0x3fe   : > { %v4123_v55 = vmax.f32 %v4122_v21, %v2795_v58  ;;  %v4450_v59 = vmax.f32 %v7004_v56, %v7008_v22  ;;  %3452 = vmatprep.mubr.bf16.mxu1 %v7679_v48 }
 0x3ff   : > { %v4487_v0 = vmax.f32 %v7010_v7, %v7013_v41 }
 0x400   : > { %v2798_v60 = vpop.f32.mrb[76].mxu1 }
 0x401   : > { %v2799_v40 = vadd.f32 %v2798_v60, %v6865_v9  ;;  %v2800_v39 = vpop.f32.mrb[77].mxu1 }
 0x402   : > { %v2801_v19 = vadd.f32 %v2800_v39, %v6871_v26  ;;  %v2802_v10 = vpop.f32.mrb[78].mxu1  ;;  %3836 = vmatmul.mubr.bf16.gmra.mrb[196].mxu0 %v6305_v25 }
 0x403   : > { %v4087_v4 = vmax.f32 %v4086_v6, %v2799_v40  ;;  %v2803_v35 = vadd.f32 %v2802_v10, %v6865_v9  ;;  %v2804_v17 = vpop.f32.mrb[79].mxu1  ;;  %3845 = vmatprep.mubr.bf16.mxu0 %v7679_v48 }
 0x404   : > { %v4124_v49 = vmax.f32 %v4123_v55, %v2801_v19  ;;  %v2805_v29 = vadd.f32 %v2804_v17, %v6871_v26 }
 0x405   : > { %v4088_v34 = vmax.f32 %v4087_v4, %v2803_v35  ;;  %3453 = vmatmul.mubr.bf16.gmra.mrb[184].mxu1 %v6252_v14 }
 0x406   : > { %v4125_v16 = vmax.f32 %v4124_v49, %v2805_v29  ;;  %3462 = vmatprep.mubr.bf16.mxu1 %v7679_v48 }
 0x408   : > { %v2808_v62 = vpop.f32.mrb[80].mxu1 }
 0x409   : > { %v2809_v8 = vadd.f32 %v2808_v62, %v6865_v9  ;;  %v2810_v18 = vpop.f32.mrb[81].mxu1 }
 0x40a   : > { %v2811_v38 = vadd.f32 %v2810_v18, %v6871_v26  ;;  %v2812_v37 = vpop.f32.mrb[82].mxu1  ;;  %3846 = vmatmul.mubr.bf16.gmra.mrb[200].mxu0 %v6390_v51 }
 0x40b   : > { %v4089_v1 = vmax.f32 %v4088_v34, %v2809_v8  ;;  %v2813_v36 = vadd.f32 %v2812_v37, %v6865_v9  ;;  %v2814_v21 = vpop.f32.mrb[83].mxu1  ;;  %3855 = vmatprep.mubr.bf16.mxu0 %v7679_v48 }
 0x40c   : > { %v4126_v56 = vmax.f32 %v4125_v16, %v2811_v38  ;;  %v2815_v14 = vadd.f32 %v2814_v21, %v6871_v26 }
 0x40d   : > { %v4090_v58 = vmax.f32 %v4089_v1, %v2813_v36  ;;  %3463 = vmatmul.mubr.bf16.gmra.mrb[188].mxu1 %v6249_v43 }
 0x40e   : > { %v4127_v22 = vmax.f32 %v4126_v56, %v2815_v14  ;;  %3472 = vmatprep.mubr.bf16.mxu1 %v7679_v48 }
 0x410   : > { %v2818_v28 = vpop.f32.mrb[84].mxu1 }
 0x411   : > { %v2819_v6 = vadd.f32 %v2818_v28, %v6865_v9  ;;  %v2820_v7 = vpop.f32.mrb[85].mxu1 }
 0x412   : > { %v2821_v41 = vadd.f32 %v2820_v7, %v6871_v26  ;;  %v2822_v55 = vpop.f32.mrb[86].mxu1  ;;  %3856 = vmatmul.mubr.bf16.gmra.mrb[204].mxu0 %v6383_v31 }
 0x413   : > { %v4091_v60 = vmax.f32 %v4090_v58, %v2819_v6  ;;  %v2823_v40 = vadd.f32 %v2822_v55, %v6865_v9  ;;  %v2824_v39 = vpop.f32.mrb[87].mxu1  ;;  %3865 = vmatprep.mubr.bf16.mxu0 %v7679_v48 }
 0x414   : > { %v4128_v19 = vmax.f32 %v4127_v22, %v2821_v41  ;;  %v2825_v43 = vadd.f32 %v2824_v39, %v6871_v26 }
 0x415   : > { %v4092_v10 = vmax.f32 %v4091_v60, %v2823_v40  ;;  %3473 = vmatmul.mubr.bf16.gmra.mrb[192].mxu1 %v6309_v47 }
 0x416   : > { %v4129_v4 = vmax.f32 %v4128_v19, %v2825_v43  ;;  %v3281_v35 = vpop.f32.mrb[128].mxu0  ;;  %3482 = vmatprep.mubr.bf16.mxu1 %v7679_v48 }
 0x417   : > { %v3282_v17 = vadd.f32 %v3281_v35, %v6550_v30  ;;  %v3283_v49 = vpop.f32.mrb[129].mxu0 }
 0x418   : > { %v3284_v29 = vadd.f32 %v3283_v49, %v6552_v44  ;;  %v2828_v34 = vpop.f32.mrb[88].mxu1  ;;  %v3285_v16 = vpop.f32.mrb[130].mxu0 }
 0x419   : > { %v4451_v62 = vmax.f32 %v4450_v59, %v3282_v17  ;;  %v2829_v8 = vadd.f32 %v2828_v34, %v6865_v9  ;;  %v3286_v18 = vadd.f32 %v3285_v16, %v6550_v30  ;;  %v2830_v38 = vpop.f32.mrb[89].mxu1  ;;  %v3287_v37 = vpop.f32.mrb[131].mxu0 }
 0x41a   : > { %v4488_v1 = vmax.f32 %v4487_v0, %v3284_v29  ;;  %v2831_v47 = vadd.f32 %v2830_v38, %v6871_v26  ;;  %v3288_v36 = vadd.f32 %v3287_v37, %v6552_v44  ;;  %v2832_v21 = vpop.f32.mrb[90].mxu1  ;;  %3866 = vmatmul.mubr.bf16.gmra.mrb[208].mxu0 %v6455_v61 }
 0x41b   : > { %v4093_v56 = vmax.f32 %v4092_v10, %v2829_v8  ;;  %v4452_v14 = vmax.f32 %v4451_v62, %v3286_v18  ;;  %v2833_v58 = vadd.f32 %v2832_v21, %v6865_v9  ;;  %v2834_v22 = vpop.f32.mrb[91].mxu1  ;;  %3875 = vmatprep.mubr.bf16.mxu0 %v7679_v48 }
 0x41c   : > { %v4130_v59 = vmax.f32 %v4129_v4, %v2831_v47  ;;  %v4489_v28 = vmax.f32 %v4488_v1, %v3288_v36  ;;  %v2835_v6 = vadd.f32 %v2834_v22, %v6871_v26 }
 0x41d   : > { %v4094_v7 = vmax.f32 %v4093_v56, %v2833_v58  ;;  %3483 = vmatmul.mubr.bf16.gmra.mrb[196].mxu1 %v6305_v25 }
 0x41e   : > { %v4131_v0 = vmax.f32 %v4130_v59, %v2835_v6  ;;  %v3291_v41 = vpop.f32.mrb[132].mxu0  ;;  %3492 = vmatprep.mubr.bf16.mxu1 %v7679_v48 }
 0x41f   : > { %v3292_v55 = vadd.f32 %v3291_v41, %v6550_v30  ;;  %v3293_v60 = vpop.f32.mrb[133].mxu0 }
 0x420   : > { %v3294_v40 = vadd.f32 %v3293_v60, %v6552_v44  ;;  %v2838_v39 = vpop.f32.mrb[92].mxu1  ;;  %v3295_v19 = vpop.f32.mrb[134].mxu0 }
 0x421   : > { %v4453_v43 = vmax.f32 %v4452_v14, %v3292_v55  ;;  %v2839_v10 = vadd.f32 %v2838_v39, %v6865_v9  ;;  %v3296_v4 = vadd.f32 %v3295_v19, %v6550_v30  ;;  %v2840_v35 = vpop.f32.mrb[93].mxu1  ;;  %v3297_v17 = vpop.f32.mrb[135].mxu0 }
 0x422   : > { %v7061_v49 = vmax.f32 %v4489_v28, %v3294_v40  ;;  %v2841_v25 = vadd.f32 %v2840_v35, %v6871_v26  ;;  %v3298_v29 = vadd.f32 %v3297_v17, %v6552_v44  ;;  %v2842_v34 = vpop.f32.mrb[94].mxu1  ;;  %3876 = vmatmul.mubr.bf16.gmra.mrb[212].mxu0 %v6450_v11 }
 0x423   : > { %v4095_v16 = vmax.f32 %v4094_v7, %v2839_v10  ;;  %v4454_v62 = vmax.f32 %v4453_v43, %v3296_v4  ;;  %v2843_v8 = vadd.f32 %v2842_v34, %v6865_v9  ;;  %v2844_v18 = vpop.f32.mrb[95].mxu1  ;;  %3885 = vmatprep.mubr.bf16.mxu0 %v7679_v48 }
 0x424   : > { %v4132_v38 = vmax.f32 %v4131_v0, %v2841_v25  ;;  %v4491_v37 = vmax.f32 %v7061_v49, %v3298_v29  ;;  %v2845_v1 = vadd.f32 %v2844_v18, %v6871_v26 }
 0x425   : > { %v7070_v47 = vmax.f32 %v4095_v16, %v2843_v8  ;;  %3493 = vmatmul.mubr.bf16.gmra.mrb[200].mxu1 %v6390_v51 }
 0x426   : > { %v7073_v36 = vmax.f32 %v4132_v38, %v2845_v1  ;;  %3502 = vmatprep.mubr.bf16.mxu1 %v7679_v48 }
 0x428   : > { %v2848_v21 = vpop.f32.mrb[96].mxu1 }
 0x429   : > { %v2850_v56 = vpop.f32.mrb[97].mxu1  ;;  %v2849_v58 = vadd.f32 %v2848_v21, %v6865_v9 }
 0x42a   : > { %v2852_v14 = vpop.f32.mrb[98].mxu1  ;;  %3886 = vmatmul.mubr.bf16.gmra.mrb[216].mxu0 %v6501_v45  ;;  %v2851_v28 = vadd.f32 %v2850_v56, %v6871_v26 }
 0x42b   : > { %v2853_v22 = vadd.f32 %v2852_v14, %v6865_v9  ;;  %v2854_v59 = vpop.f32.mrb[99].mxu1  ;;  %3895 = vmatprep.mubr.bf16.mxu0 %v7679_v48 }
 0x42c   : > { %v2855_v51 = vadd.f32 %v2854_v59, %v6871_v26 }
 0x42d   : > { %v4362_v6 = vmax.f32 %v2849_v58, %v2853_v22  ;;  %3503 = vmatmul.mubr.bf16.gmra.mrb[204].mxu1 %v6383_v31 }
 0x42e   : > { %v4399_v7 = vmax.f32 %v2851_v28, %v2855_v51  ;;  %3512 = vmatprep.mubr.bf16.mxu1 %v7679_v48 }
 0x430   : > { %v2858_v0 = vpop.f32.mrb[100].mxu1 }
 0x431   : > { %v2859_v41 = vadd.f32 %v2858_v0, %v6865_v9  ;;  %v2860_v55 = vpop.f32.mrb[101].mxu1 }
 0x432   : > { %v2861_v60 = vadd.f32 %v2860_v55, %v6871_v26  ;;  %v2862_v40 = vpop.f32.mrb[102].mxu1  ;;  %3896 = vmatmul.mubr.bf16.gmra.mrb[220].mxu0 %v6499_v2 }
 0x433   : > { %v4363_v39 = vmax.f32 %v4362_v6, %v2859_v41  ;;  %v2863_v19 = vadd.f32 %v2862_v40, %v6865_v9  ;;  %v2864_v43 = vpop.f32.mrb[103].mxu1  ;;  %3905 = vmatprep.mubr.bf16.mxu0 %v7679_v48 }
 0x434   : > { %v4400_v10 = vmax.f32 %v4399_v7, %v2861_v60  ;;  %v2865_v31 = vadd.f32 %v2864_v43, %v6871_v26 }
 0x435   : > { %v4364_v4 = vmax.f32 %v4363_v39, %v2863_v19  ;;  %3513 = vmatmul.mubr.bf16.gmra.mrb[208].mxu1 %v6455_v61 }
 0x436   : > { %v4401_v35 = vmax.f32 %v4400_v10, %v2865_v31  ;;  %3522 = vmatprep.mubr.bf16.mxu1 %v7679_v48 }
 0x437   : > { %v3301_v17 = vpop.f32.mrb[136].mxu0 }
 0x438   : > { %v3302_v49 = vadd.f32 %v3301_v17, %v6550_v30  ;;  %v2868_v25 = vpop.f32.mrb[104].mxu1  ;;  %v3303_v29 = vpop.f32.mrb[137].mxu0 }
 0x439   : > { %v2869_v34 = vadd.f32 %v2868_v25, %v6865_v9  ;;  %v3304_v16 = vadd.f32 %v3303_v29, %v6552_v44  ;;  %v2870_v8 = vpop.f32.mrb[105].mxu1  ;;  %v3305_v18 = vpop.f32.mrb[138].mxu0 }
 0x43a   : > { %v4455_v38 = vmax.f32 %v4454_v62, %v3302_v49  ;;  %v2871_v1 = vadd.f32 %v2870_v8, %v6871_v26  ;;  %v3306_v21 = vadd.f32 %v3305_v18, %v6550_v30  ;;  %v2872_v61 = vpop.f32.mrb[106].mxu1  ;;  %v3307_v56 = vpop.f32.mrb[139].mxu0  ;;  %3906 = vmatmul.mubr.bf16.gmra.mrb[224].mxu0 %v6557_v27 }
 0x43b   : > { %v4365_v14 = vmax.f32 %v4364_v4, %v2869_v34  ;;  %v4492_v58 = vmax.f32 %v4491_v37, %v3304_v16  ;;  %v2873_v22 = vadd.f32 %v2872_v61, %v6865_v9  ;;  %v3308_v59 = vadd.f32 %v3307_v56, %v6552_v44  ;;  %v2874_v28 = vpop.f32.mrb[107].mxu1  ;;  %3915 = vmatprep.mubr.bf16.mxu0 %v7679_v48 }
 0x43c   : > { %v4402_v51 = vmax.f32 %v4401_v35, %v2871_v1  ;;  %v4456_v6 = vmax.f32 %v4455_v38, %v3306_v21  ;;  %v2875_v62 = vadd.f32 %v2874_v28, %v6871_v26 }
 0x43d   : > { %v4366_v7 = vmax.f32 %v4365_v14, %v2873_v22  ;;  %v4493_v0 = vmax.f32 %v4492_v58, %v3308_v59  ;;  %3523 = vmatmul.mubr.bf16.gmra.mrb[212].mxu1 %v6450_v11 }
 0x43e   : > { %v4403_v41 = vmax.f32 %v4402_v51, %v2875_v62  ;;  %3532 = vmatprep.mubr.bf16.mxu1 %v7679_v48 }
 0x43f   : > { %v3311_v55 = vpop.f32.mrb[140].mxu0 }
 0x440   : > { %v3312_v37 = vadd.f32 %v3311_v55, %v6550_v30  ;;  %v2878_v60 = vpop.f32.mrb[108].mxu1  ;;  %v3313_v40 = vpop.f32.mrb[141].mxu0 }
 0x441   : > { %v2879_v39 = vadd.f32 %v2878_v60, %v6865_v9  ;;  %v3314_v19 = vadd.f32 %v3313_v40, %v6552_v44  ;;  %v2880_v43 = vpop.f32.mrb[109].mxu1  ;;  %v3315_v10 = vpop.f32.mrb[142].mxu0 }
 0x442   : > { %v7107_v31 = vmax.f32 %v4456_v6, %v3312_v37  ;;  %v2881_v4 = vadd.f32 %v2880_v43, %v6871_v26  ;;  %v7111_v11 = vadd.f32 %v3315_v10, %v6550_v30  ;;  %v2882_v35 = vpop.f32.mrb[110].mxu1  ;;  %v3317_v17 = vpop.f32.mrb[143].mxu0  ;;  %3916 = vmatmul.mubr.bf16.gmra.mrb[228].mxu0 %v6555_v5 }
 0x443   : > { %v4367_v49 = vmax.f32 %v4366_v7, %v2879_v39  ;;  %v7114_v25 = vmax.f32 %v4493_v0, %v3314_v19  ;;  %v2883_v29 = vadd.f32 %v2882_v35, %v6865_v9  ;;  %v7118_v34 = vadd.f32 %v3317_v17, %v6552_v44  ;;  %v2884_v16 = vpop.f32.mrb[111].mxu1  ;;  %3925 = vmatprep.mubr.bf16.mxu0 %v7679_v48 }
 0x444   : > { %v4404_v8 = vmax.f32 %v4403_v41, %v2881_v4  ;;  %v4458_v18 = vmax.f32 %v7107_v31, %v7111_v11  ;;  %v2885_v38 = vadd.f32 %v2884_v16, %v6871_v26 }
 0x445   : > { %v4368_v1 = vmax.f32 %v4367_v49, %v2883_v29  ;;  %v4495_v21 = vmax.f32 %v7114_v25, %v7118_v34  ;;  %3533 = vmatmul.mubr.bf16.gmra.mrb[216].mxu1 %v6501_v45 }
 0x446   : > { %v4405_v61 = vmax.f32 %v4404_v8, %v2885_v38  ;;  %3542 = vmatprep.mubr.bf16.mxu1 %v7679_v48 }
 0x448   : > { %v2888_v56 = vpop.f32.mrb[112].mxu1 }
 0x449   : > { %v2889_v14 = vadd.f32 %v2888_v56, %v6865_v9  ;;  %v2890_v58 = vpop.f32.mrb[113].mxu1 }
 0x44a   : > { %v2891_v22 = vadd.f32 %v2890_v58, %v6871_v26  ;;  %v2892_v59 = vpop.f32.mrb[114].mxu1  ;;  %3926 = vmatmul.mubr.bf16.gmra.mrb[232].mxu0 %v6625_v53 }
 0x44b   : > { %v4369_v28 = vmax.f32 %v4368_v1, %v2889_v14  ;;  %v2893_v51 = vadd.f32 %v2892_v59, %v6865_v9  ;;  %v2894_v6 = vpop.f32.mrb[115].mxu1  ;;  %3935 = vmatprep.mubr.bf16.mxu0 %v7679_v48 }
 0x44c   : > { %v4406_v62 = vmax.f32 %v4405_v61, %v2891_v22  ;;  %v2895_v45 = vadd.f32 %v2894_v6, %v6871_v26 }
 0x44d   : > { %v4370_v7 = vmax.f32 %v4369_v28, %v2893_v51  ;;  %3543 = vmatmul.mubr.bf16.gmra.mrb[220].mxu1 %v6499_v2 }
 0x44e   : > { %v4407_v0 = vmax.f32 %v4406_v62, %v2895_v45  ;;  %3552 = vmatprep.mubr.bf16.mxu1 %v7679_v48 }
 0x450   : > { %v2898_v41 = vpop.f32.mrb[116].mxu1 }
 0x451   : > { %v2899_v55 = vadd.f32 %v2898_v41, %v6865_v9  ;;  %v2900_v37 = vpop.f32.mrb[117].mxu1 }
 0x452   : > { %v2901_v60 = vadd.f32 %v2900_v37, %v6871_v26  ;;  %v2902_v40 = vpop.f32.mrb[118].mxu1  ;;  %3936 = vmatmul.mubr.bf16.gmra.mrb[236].mxu0 %v6621_v15 }
 0x453   : > { %v4371_v39 = vmax.f32 %v4370_v7, %v2899_v55  ;;  %v2903_v19 = vadd.f32 %v2902_v40, %v6865_v9  ;;  %v2904_v43 = vpop.f32.mrb[119].mxu1  ;;  %3945 = vmatprep.mubr.bf16.mxu0 %v7679_v48 }
 0x454   : > { %v4408_v10 = vmax.f32 %v4407_v0, %v2901_v60  ;;  %v2905_v2 = vadd.f32 %v2904_v43, %v6871_v26 }
 0x455   : > { %v4372_v31 = vmax.f32 %v4371_v39, %v2903_v19  ;;  %3553 = vmatmul.mubr.bf16.gmra.mrb[224].mxu1 %v6557_v27 }
 0x456   : > { %v4409_v4 = vmax.f32 %v4408_v10, %v2905_v2  ;;  %3562 = vmatprep.mubr.bf16.mxu1 %v7679_v48 }
 0x458   : > { %v2908_v11 = vpop.f32.mrb[120].mxu1 }
 0x459   : > { %v2909_v35 = vadd.f32 %v2908_v11, %v6865_v9  ;;  %v2910_v17 = vpop.f32.mrb[121].mxu1 }
 0x45a   : > { %v2911_v49 = vadd.f32 %v2910_v17, %v6871_v26  ;;  %v2912_v25 = vpop.f32.mrb[122].mxu1  ;;  %3946 = vmatmul.mubr.bf16.gmra.mrb[240].mxu0 %v6675_v57 }
 0x45b   : > { %v4373_v29 = vmax.f32 %v4372_v31, %v2909_v35  ;;  %v2913_v34 = vadd.f32 %v2912_v25, %v6865_v9  ;;  %v2914_v16 = vpop.f32.mrb[123].mxu1  ;;  %3955 = vmatprep.mubr.bf16.mxu0 %v7679_v48 }
 0x45c   : > { %v4410_v8 = vmax.f32 %v4409_v4, %v2911_v49  ;;  %v2915_v27 = vadd.f32 %v2914_v16, %v6871_v26  ;;  %v3321_v38 = vpop.f32.mrb[144].mxu0 }
 0x45d   : > { %v4374_v1 = vmax.f32 %v4373_v29, %v2913_v34  ;;  %v3322_v61 = vadd.f32 %v3321_v38, %v6550_v30  ;;  %v3323_v56 = vpop.f32.mrb[145].mxu0  ;;  %3563 = vmatmul.mubr.bf16.gmra.mrb[228].mxu1 %v6555_v5 }
 0x45e   : > { %v4411_v14 = vmax.f32 %v4410_v8, %v2915_v27  ;;  %v3324_v58 = vadd.f32 %v3323_v56, %v6552_v44  ;;  %v3325_v22 = vpop.f32.mrb[146].mxu0  ;;  %3572 = vmatprep.mubr.bf16.mxu1 %v7679_v48 }
 0x45f   : > { %v4459_v59 = vmax.f32 %v4458_v18, %v3322_v61  ;;  %v3326_v28 = vadd.f32 %v3325_v22, %v6550_v30  ;;  %v3327_v51 = vpop.f32.mrb[147].mxu0 }
 0x460   : > { %v4496_v6 = vmax.f32 %v4495_v21, %v3324_v58  ;;  %v3328_v62 = vadd.f32 %v3327_v51, %v6552_v44  ;;  %v2918_v45 = vpop.f32.mrb[124].mxu1 }
 0x461   : > { %v4460_v7 = vmax.f32 %v4459_v59, %v3326_v28  ;;  %v2919_v0 = vadd.f32 %v2918_v45, %v6865_v9  ;;  %v2920_v41 = vpop.f32.mrb[125].mxu1 }
 0x462   : > { %v4497_v55 = vmax.f32 %v4496_v6, %v3328_v62  ;;  %v2921_v5 = vadd.f32 %v2920_v41, %v6871_v26  ;;  %v2922_v37 = vpop.f32.mrb[126].mxu1  ;;  %3956 = vmatmul.mubr.bf16.gmra.mrb[244].mxu0 %v6673_v46 }
 0x463   : > { %v4375_v60 = vmax.f32 %v4374_v1, %v2919_v0  ;;  %v2923_v18 = vadd.f32 %v2922_v37, %v6865_v9  ;;  %v2924_v40 = vpop.f32.mrb[127].mxu1  ;;  %3965 = vmatprep.mubr.bf16.mxu0 %v7679_v48 }
 0x464   : > { %v4412_v21 = vmax.f32 %v4411_v14, %v2921_v5  ;;  %v2925_v39 = vadd.f32 %v2924_v40, %v6871_v26  ;;  %v3331_v19 = vpop.f32.mrb[148].mxu0 }
 0x465   : > { %v4376_v43 = vmax.f32 %v4375_v60, %v2923_v18  ;;  %v3332_v10 = vadd.f32 %v3331_v19, %v6550_v30  ;;  %v3333_v2 = vpop.f32.mrb[149].mxu0  ;;  %3573 = vmatmul.mubr.bf16.gmra.mrb[232].mxu1 %v6625_v53 }
 0x466   : > { %v4413_v31 = vmax.f32 %v4412_v21, %v2925_v39  ;;  %v3334_v4 = vadd.f32 %v3333_v2, %v6552_v44  ;;  %v3335_v11 = vpop.f32.mrb[150].mxu0  ;;  %3582 = vmatprep.mubr.bf16.mxu1 %v7679_v48 }
 0x467   : > { %v4461_v35 = vmax.f32 %v4460_v7, %v3332_v10  ;;  %v3336_v17 = vadd.f32 %v3335_v11, %v6550_v30  ;;  %v3337_v49 = vpop.f32.mrb[151].mxu0 }
 0x468   : > { %v7167_v25 = vmax.f32 %v4497_v55, %v3334_v4  ;;  %v3338_v29 = vadd.f32 %v3337_v49, %v6552_v44  ;;  %v2928_v34 = vpop.f32.mrb[128].mxu1 }
 0x469   : > { %v4462_v16 = vmax.f32 %v4461_v35, %v3336_v17  ;;  %v2929_v8 = vadd.f32 %v2928_v34, %v6865_v9  ;;  %v2930_v27 = vpop.f32.mrb[129].mxu1 }
 0x46a   : > { %v4499_v53 = vmax.f32 %v7167_v25, %v3338_v29  ;;  %v2931_v38 = vadd.f32 %v2930_v27, %v6871_v26  ;;  %v2932_v1 = vpop.f32.mrb[130].mxu1  ;;  %3966 = vmatmul.mubr.bf16.gmra.mrb[248].mxu0 %v6727_v20  ;;  %v4171_v25 = vrot.slane %v6815_v24, 4 }
 0x46b   : > { %v4377_v61 = vmax.f32 %v4376_v43, %v2929_v8  ;;  %v2933_v56 = vadd.f32 %v2932_v1, %v6865_v9  ;;  %v2934_v14 = vpop.f32.mrb[131].mxu1  ;;  %3975 = vmatprep.mubr.bf16.mxu0 %v7679_v48 }
 0x46c   : > { %v4414_v58 = vmax.f32 %v4413_v31, %v2931_v38  ;;  %v2935_v22 = vadd.f32 %v2934_v14, %v6871_v26 }
 0x46d   : > { %v4378_v59 = vmax.f32 %v4377_v61, %v2933_v56  ;;  %3583 = vmatmul.mubr.bf16.gmra.mrb[236].mxu1 %v6621_v15 }
 0x46e   : > { %v4415_v28 = vmax.f32 %v4414_v58, %v2935_v22  ;;  %3592 = vmatprep.mubr.bf16.mxu1 %v7679_v48  ;;  %v4208_v58 = vrot.slane %v6817_v23, 4 }
 0x470   : > { %v2938_v51 = vpop.f32.mrb[132].mxu1 }
 0x471   : > { %v2939_v6 = vadd.f32 %v2938_v51, %v6865_v9  ;;  %v2940_v62 = vpop.f32.mrb[133].mxu1 }
 0x472   : > { %v2941_v45 = vadd.f32 %v2940_v62, %v6871_v26  ;;  %v2942_v7 = vpop.f32.mrb[134].mxu1  ;;  %3976 = vmatmul.mubr.bf16.gmra.mrb[252].mxu0 %v6725_v54 }
 0x473   : > { %v4379_v0 = vmax.f32 %v4378_v59, %v2939_v6  ;;  %v2943_v41 = vadd.f32 %v2942_v7, %v6865_v9  ;;  %v2944_v55 = vpop.f32.mrb[135].mxu1  ;;  %3985 = vmatprep.mubr.bf16.mxu0 %v7679_v48 }
 0x474   : > { %v4416_v5 = vmax.f32 %v4415_v28, %v2941_v45  ;;  %v2945_v15 = vadd.f32 %v2944_v55, %v6871_v26  ;;  %v4209_v55 = vmax.f32 %v6817_v23, %v4208_v58 }
 0x475   : > { %v4380_v37 = vmax.f32 %v4379_v0, %v2943_v41  ;;  %3593 = vmatmul.mubr.bf16.gmra.mrb[240].mxu1 %v6675_v57 }
 0x476   : > { %v4417_v60 = vmax.f32 %v4416_v5, %v2945_v15  ;;  %3602 = vmatprep.mubr.bf16.mxu1 %v7679_v48 }
 0x478   : > { %v2948_v18 = vpop.f32.mrb[136].mxu1 }
 0x479   : > { %v2949_v40 = vadd.f32 %v2948_v18, %v6865_v9  ;;  %v2950_v21 = vpop.f32.mrb[137].mxu1 }
 0x47a   : > { %v2951_v39 = vadd.f32 %v2950_v21, %v6871_v26  ;;  %v2952_v19 = vpop.f32.mrb[138].mxu1  ;;  %3986 = vmatmul.mubr.bf16.gmra.mrb[0].mxu0 %v6769_v32 }
 0x47b   : > { %v4381_v43 = vmax.f32 %v4380_v37, %v2949_v40  ;;  %v2953_v10 = vadd.f32 %v2952_v19, %v6865_v9  ;;  %v2954_v2 = vpop.f32.mrb[139].mxu1  ;;  %3995 = vmatprep.mubr.bf16.mxu0 %v7679_v48 }
 0x47c   : > { %v4418_v31 = vmax.f32 %v4417_v60, %v2951_v39  ;;  %v2955_v57 = vadd.f32 %v2954_v2, %v6871_v26 }
 0x47d   : > { %v4382_v4 = vmax.f32 %v4381_v43, %v2953_v10  ;;  %v3341_v11 = vpop.f32.mrb[152].mxu0  ;;  %3603 = vmatmul.mubr.bf16.gmra.mrb[244].mxu1 %v6673_v46  ;;  %v2320_v43 = vsub.s32 6, %v7691_v52 }
 0x47e   : > { %v4419_v35 = vmax.f32 %v4418_v31, %v2955_v57  ;;  %v3342_v17 = vadd.f32 %v3341_v11, %v6550_v30  ;;  %v3343_v49 = vpop.f32.mrb[153].mxu0  ;;  %3612 = vmatprep.mubr.bf16.mxu1 %v7679_v48  ;;  %v2324_v31 = vsub.s32 7, %v7691_v52  ;;  %v4210_v57 = vrot.slane %v4209_v55, 2 }
 0x47f   : > { %v3344_v29 = vadd.f32 %v3343_v49, %v6552_v44  ;;  %v3345_v34 = vpop.f32.mrb[154].mxu0 }
 0x480   : > { %v4463_v8 = vmax.f32 %v4462_v16, %v3342_v17  ;;  %v3346_v27 = vadd.f32 %v3345_v34, %v6550_v30  ;;  %v2958_v38 = vpop.f32.mrb[140].mxu1  ;;  %v3347_v1 = vpop.f32.mrb[155].mxu0  ;;  %v4172_v16 = vmax.f32 %v6815_v24, %v4171_v25 }
 0x481   : > { %v4500_v61 = vmax.f32 %v4499_v53, %v3344_v29  ;;  %v2959_v56 = vadd.f32 %v2958_v38, %v6865_v9  ;;  %v3348_v46 = vadd.f32 %v3347_v1, %v6552_v44  ;;  %v2960_v14 = vpop.f32.mrb[141].mxu1 }
 0x482   : > { %v4464_v22 = vmax.f32 %v4463_v8, %v3346_v27  ;;  %v2961_v59 = vadd.f32 %v2960_v14, %v6871_v26  ;;  %v2962_v28 = vpop.f32.mrb[142].mxu1  ;;  %3996 = vmatmul.mubr.bf16.gmra.mrb[4].mxu0 %v6767_v63  ;;  %v4173_v37 = vrot.slane %v4172_v16, 2  ;;  %v7226_v27 = vld [vmem:[%s7647_s6] sm:$0xff]  ;;  %v4211_v14 = vmax.f32 %v4209_v55, %v4210_v57 }
 0x483   : > { %v4383_v51 = vmax.f32 %v4382_v4, %v2959_v56  ;;  %v4501_v6 = vmax.f32 %v4500_v61, %v3348_v46  ;;  %v2963_v62 = vadd.f32 %v2962_v28, %v6865_v9  ;;  %v2964_v53 = vpop.f32.mrb[143].mxu1  ;;  %4005 = vmatprep.mubr.bf16.mxu0 %v7679_v48  ;;  %v7229_v38 = vrot.slane %v7226_v27, %v2320_v43 }
 0x484   : > { %v4420_v45 = vmax.f32 %v4419_v35, %v2961_v59  ;;  %v2965_v7 = vadd.f32 %v2964_v53, %v6871_v26  ;;  %v7233_v46 = vrot.slane %v7226_v27, %v2324_v31 }
 0x485   : > { %v4384_v0 = vmax.f32 %v4383_v51, %v2963_v62  ;;  %v3351_v41 = vpop.f32.mrb[156].mxu0  ;;  %3613 = vmatmul.mubr.bf16.gmra.mrb[248].mxu1 %v6727_v20 }
 0x486   : > { %v4421_v5 = vmax.f32 %v4420_v45, %v2965_v7  ;;  %v3352_v15 = vadd.f32 %v3351_v41, %v6550_v30  ;;  %v3353_v24 = vpop.f32.mrb[157].mxu0  ;;  %3622 = vmatprep.mubr.bf16.mxu1 %v7679_v48 }
 0x487   : > { %v3354_v60 = vadd.f32 %v3353_v24, %v6552_v44  ;;  %v3355_v18 = vpop.f32.mrb[158].mxu0 }
 0x488   : > { %v4465_v40 = vmax.f32 %v4464_v22, %v3352_v15  ;;  %v3356_v21 = vadd.f32 %v3355_v18, %v6550_v30  ;;  %v2968_v39 = vpop.f32.mrb[144].mxu1  ;;  %v3357_v19 = vpop.f32.mrb[159].mxu0  ;;  %v4174_v30 = vmax.f32 %v4172_v16, %v4173_v37  ;;  %v4212_v15 = vrot.slane %v4211_v14, 1 }
 0x489   : > { %v4502_v20 = vmax.f32 %v4501_v6, %v3354_v60  ;;  %v2969_v23 = vadd.f32 %v2968_v39, %v6865_v9  ;;  %v3358_v10 = vadd.f32 %v3357_v19, %v6552_v44  ;;  %v2970_v2 = vpop.f32.mrb[145].mxu1 }
 0x48a   : > { %v4466_v4 = vmax.f32 %v4465_v40, %v3356_v21  ;;  %v2971_v11 = vadd.f32 %v2970_v2, %v6871_v26  ;;  %v2972_v35 = vpop.f32.mrb[146].mxu1  ;;  %4006 = vmatmul.mubr.bf16.gmra.mrb[8].mxu0 %v6797_v12  ;;  %v4175_v51 = vrot.slane %v4174_v30, 1 }
 0x48b   : > { %v4385_v17 = vmax.f32 %v4384_v0, %v2969_v23  ;;  %v4503_v49 = vmax.f32 %v4502_v20, %v3358_v10  ;;  %v2973_v25 = vadd.f32 %v2972_v35, %v6865_v9  ;;  %v2974_v29 = vpop.f32.mrb[147].mxu1  ;;  %4015 = vmatprep.mubr.bf16.mxu0 %v7679_v48 }
 0x48c   : > { %v4467_v34 = vrot.slane %v4466_v4, 4  ;;  %v4422_v44 = vmax.f32 %v4421_v5, %v2971_v11  ;;  %v2975_v8 = vadd.f32 %v2974_v29, %v6871_v26 }
 0x48d   : > { %v4504_v1 = vrot.slane %v4503_v49, 4  ;;  %v4386_v61 = vmax.f32 %v4385_v17, %v2973_v25  ;;  %3623 = vmatmul.mubr.bf16.gmra.mrb[252].mxu1 %v6725_v54  ;;  %v3747_v56 = vpop.f32.mrb[160].mxu0  ;;  %v4213_v25 = vmax.f32 %v4211_v14, %v4212_v15  ;;  %v4134_v15 = vrot.slane %v7073_v36, 4 }
 0x48e   : > { %v4468_v58 = vmax.f32 %v4466_v4, %v4467_v34  ;;  %v4423_v22 = vmax.f32 %v4422_v44, %v2975_v8  ;;  %v3749_v59 = vpop.f32.mrb[161].mxu0  ;;  %3632 = vmatprep.mubr.bf16.mxu1 %v7679_v48  ;;  %v3748_v62 = vadd.f32 %v3747_v56, %v7229_v38  ;;  %v4176_v4 = vmax.f32 %v4174_v30, %v4175_v51 }
 0x48f   : > { %v4505_v28 = vmax.f32 %v4503_v49, %v4504_v1  ;;  %v3751_v16 = vpop.f32.mrb[162].mxu0  ;;  %v3750_v0 = vadd.f32 %v3749_v59, %v7233_v46 }
 0x490   : > { %v4469_v6 = vrot.slane %v4468_v58, 2  ;;  %v3752_v53 = vadd.f32 %v3751_v16, %v7229_v38  ;;  %v2978_v45 = vpop.f32.mrb[148].mxu1  ;;  %v3753_v54 = vpop.f32.mrb[163].mxu0 }
 0x491   : > { %v4506_v7 = vrot.slane %v4505_v28, 2  ;;  %v2979_v41 = vadd.f32 %v2978_v45, %v6865_v9  ;;  %v3754_v55 = vadd.f32 %v3753_v54, %v7233_v46  ;;  %v2980_v5 = vpop.f32.mrb[149].mxu1 }
 0x492   : > { %v4470_v24 = vmax.f32 %v4468_v58, %v4469_v6  ;;  %v4288_v37 = vmax.f32 %v3748_v62, %v3752_v53  ;;  %v2981_v60 = vadd.f32 %v2980_v5, %v6871_v26  ;;  %v2982_v18 = vpop.f32.mrb[150].mxu1  ;;  %4016 = vmatmul.mubr.bf16.gmra.mrb[12].mxu0 %v6795_v3 }
 0x493   : > { %v4507_v40 = vmax.f32 %v4505_v28, %v4506_v7  ;;  %v4387_v21 = vmax.f32 %v4386_v61, %v2979_v41  ;;  %v4325_v39 = vmax.f32 %v3750_v0, %v3754_v55  ;;  %v2983_v19 = vadd.f32 %v2982_v18, %v6865_v9  ;;  %v2984_v43 = vpop.f32.mrb[151].mxu1  ;;  %4025 = vmatprep.mubr.bf16.mxu0 %v7679_v48 }
 0x494   : > { %v4471_v20 = vrot.slane %v4470_v24, 1  ;;  %v4424_v23 = vmax.f32 %v4423_v22, %v2981_v60  ;;  %v2985_v10 = vadd.f32 %v2984_v43, %v6871_v26  ;;  %v4097_v7 = vrot.slane %v7070_v47, 4 }
 0x495   : > { %v4508_v2 = vrot.slane %v4507_v40, 1  ;;  %v4388_v31 = vmax.f32 %v4387_v21, %v2983_v19  ;;  %3633 = vmatmul.mubr.bf16.gmra.mrb[0].mxu1 %v6769_v32  ;;  %v3757_v57 = vpop.f32.mrb[164].mxu0 }
 0x496   : > { %v4472_v11 = vmax.f32 %v4470_v24, %v4471_v20  ;;  %v4425_v35 = vmax.f32 %v4424_v23, %v2985_v10  ;;  %v3758_v17 = vadd.f32 %v3757_v57, %v7229_v38  ;;  %v3759_v49 = vpop.f32.mrb[165].mxu0  ;;  %3642 = vmatprep.mubr.bf16.mxu1 %v7679_v48  ;;  %v4098_v21 = vmax.f32 %v7070_v47, %v4097_v7 }
 0x497   : > { %v4509_v29 = vmax.f32 %v4507_v40, %v4508_v2  ;;  %v3760_v34 = vadd.f32 %v3759_v49, %v7233_v46  ;;  %v3761_v44 = vpop.f32.mrb[166].mxu0  ;;  %v2312_v47 = vsub.s32 4, %v7691_v52 }
 0x498   : > { %v4289_v8 = vmax.f32 %v4288_v37, %v3758_v17  ;;  %v3762_v1 = vadd.f32 %v3761_v44, %v7229_v38  ;;  %v2988_v61 = vpop.f32.mrb[152].mxu1  ;;  %v3763_v32 = vpop.f32.mrb[167].mxu0  ;;  %v7252_v56 = vsel %vm4658_vm1, %v4176_v4, %v4472_v11 }
 0x499   : > { %v4326_v30 = vmax.f32 %v4325_v39, %v3760_v34  ;;  %v2989_v58 = vadd.f32 %v2988_v61, %v6865_v9  ;;  %v3764_v22 = vadd.f32 %v3763_v32, %v7233_v46  ;;  %v2990_v59 = vpop.f32.mrb[153].mxu1  ;;  %v7257_v14 = vsel %vm4658_vm1, %v4213_v25, %v4509_v29 }
 0x49a   : > { %v4290_v28 = vmax.f32 %v4289_v8, %v3762_v1  ;;  %v2991_v16 = vadd.f32 %v2990_v59, %v6871_v26  ;;  %v2992_v51 = vpop.f32.mrb[154].mxu1  ;;  %4026 = vmatmul.mubr.bf16.gmra.mrb[16].mxu0 %v6831_v50  ;;  %v4680_v6 = vcombine.low %v7252_v56, %v7257_v14  ;;  %v2316_v29 = vsub.s32 5, %v7691_v52 }
 0x49b   : > { %v4389_v62 = vmax.f32 %v4388_v31, %v2989_v58  ;;  %v4327_v53 = vmax.f32 %v4326_v30, %v3764_v22  ;;  %v2993_v45 = vadd.f32 %v2992_v51, %v6865_v9  ;;  %v2994_v54 = vpop.f32.mrb[155].mxu1  ;;  %4035 = vmatprep.mubr.bf16.mxu0 %v7679_v48  ;;  %v4135_v31 = vmax.f32 %v7073_v36, %v4134_v15 }
 0x49c   : > { %v4426_v0 = vmax.f32 %v4425_v35, %v2991_v16  ;;  %v2995_v41 = vadd.f32 %v2994_v54, %v6871_v26  ;;  %v4099_v34 = vrot.slane %v4098_v21, 2  ;;  %v7289_v51 = vrot.slane %v7226_v27, %v2312_v47 }
 0x49d   : > { %v4390_v55 = vmax.f32 %v4389_v62, %v2993_v45  ;;  %3643 = vmatmul.mubr.bf16.gmra.mrb[4].mxu1 %v6767_v63  ;;  %v3767_v5 = vpop.f32.mrb[168].mxu0  ;;  %v4136_v61 = vrot.slane %v4135_v31, 2 }
 0x49e   : > { %v4427_v24 = vmax.f32 %v4426_v0, %v2995_v41  ;;  %v3768_v37 = vadd.f32 %v3767_v5, %v7229_v38  ;;  %v3769_v60 = vpop.f32.mrb[169].mxu0  ;;  %3652 = vmatprep.mubr.bf16.mxu1 %v7679_v48 }
 0x49f   : > { %v3770_v18 = vadd.f32 %v3769_v60, %v7233_v46  ;;  %v3771_v40 = vpop.f32.mrb[170].mxu0  ;;  %v4137_v15 = vmax.f32 %v4135_v31, %v4136_v61 }
 0x4a0   : > { %v4291_v39 = vmax.f32 %v4290_v28, %v3768_v37  ;;  %v3772_v19 = vadd.f32 %v3771_v40, %v7229_v38  ;;  %v2998_v43 = vpop.f32.mrb[156].mxu1  ;;  %v3773_v20 = vpop.f32.mrb[171].mxu0 }
 0x4a1   : > { %v4328_v63 = vmax.f32 %v4327_v53, %v3770_v18  ;;  %v2999_v23 = vadd.f32 %v2998_v43, %v6865_v9  ;;  %v3774_v10 = vadd.f32 %v3773_v20, %v7233_v46  ;;  %v3000_v2 = vpop.f32.mrb[157].mxu1 }
 0x4a2   : > { %v4292_v57 = vmax.f32 %v4291_v39, %v3772_v19  ;;  %v3001_v4 = vadd.f32 %v3000_v2, %v6871_v26  ;;  %v3002_v11 = vpop.f32.mrb[158].mxu1  ;;  %4036 = vmatmul.mubr.bf16.gmra.mrb[20].mxu0 %v6828_v33 }
 0x4a3   : > { %v4391_v35 = vmax.f32 %v4390_v55, %v2999_v23  ;;  %v4329_v17 = vmax.f32 %v4328_v63, %v3774_v10  ;;  %v3003_v49 = vadd.f32 %v3002_v11, %v6865_v9  ;;  %v3004_v25 = vpop.f32.mrb[159].mxu1  ;;  %4045 = vmatprep.mubr.bf16.mxu0 %v7679_v48  ;;  %v5343_v9 = vmov 1983009808  }
 0x4a4   : > { %v4428_v44 = vmax.f32 %v4427_v24, %v3001_v4  ;;  %v3005_v36 = vadd.f32 %v3004_v25, %v6871_v26  ;;  %v4682_v22 = vunpack.c.l.s4 %v5343_v9  ;;  %v7292_v26 = vrot.slane %v7226_v27, %v2316_v29 }
 0x4a5   : > { %v4392_v8 = vmax.f32 %v4391_v35, %v3003_v49  ;;  %3653 = vmatmul.mubr.bf16.gmra.mrb[8].mxu1 %v6797_v12  ;;  %v3777_v1 = vpop.f32.mrb[172].mxu0  ;;  %v4100_v12 = vmax.f32 %v4098_v21, %v4099_v34 }
 0x4a6   : > { %v4429_v32 = vmax.f32 %v4428_v44, %v3005_v36  ;;  %v3778_v30 = vadd.f32 %v3777_v1, %v7229_v38  ;;  %v3779_v58 = vpop.f32.mrb[173].mxu0  ;;  %3662 = vmatprep.mubr.bf16.mxu1 %v7679_v48  ;;  %v4683_v27 = vunpack.c.0.s8 %v4682_v22 }
 0x4a7   : > { %v4393_v59 = vrot.slane %v4392_v8, 4  ;;  %v3780_v28 = vadd.f32 %v3779_v58, %v7233_v46  ;;  %v3781_v16 = vpop.f32.mrb[174].mxu0  ;;  %v4101_v43 = vrot.slane %v4100_v12, 1 }
 0x4a8   : > { %v4430_v62 = vrot.slane %v4429_v32, 4  ;;  %v4293_v53 = vmax.f32 %v4292_v57, %v3778_v30  ;;  %v3782_v45 = vadd.f32 %v3781_v16, %v7229_v38  ;;  %v3394_v54 = vpop.f32.mrb[160].mxu1  ;;  %v3783_v7 = vpop.f32.mrb[175].mxu0  ;;  %v4138_v57 = vrot.slane %v4137_v15, 1 }
 0x4a9   : > { %v4394_v0 = vmax.f32 %v4392_v8, %v4393_v59  ;;  %v4330_v41 = vmax.f32 %v4329_v17, %v3780_v28  ;;  %v3784_v55 = vadd.f32 %v3783_v7, %v7233_v46  ;;  %v3396_v5 = vpop.f32.mrb[161].mxu1  ;;  %v3395_v40 = vadd.f32 %v3394_v54, %v7289_v51 }
 0x4aa   : > { %v4431_v24 = vmax.f32 %v4429_v32, %v4430_v62  ;;  %v4294_v37 = vmax.f32 %v4293_v53, %v3782_v45  ;;  %v3398_v60 = vpop.f32.mrb[162].mxu1  ;;  %4046 = vmatmul.mubr.bf16.gmra.mrb[24].mxu0 %v6867_v13  ;;  %v3397_v63 = vadd.f32 %v3396_v5, %v7292_v26  ;;  %v7307_v29 = vsub.s32 %v4683_v27, %v7691_v52 }
 0x4ab   : > { %v4395_v18 = vrot.slane %v4394_v0, 2  ;;  %v4331_v21 = vmax.f32 %v4330_v41, %v3784_v55  ;;  %v3399_v39 = vadd.f32 %v3398_v60, %v7289_v51  ;;  %v3400_v19 = vpop.f32.mrb[163].mxu1  ;;  %4055 = vmatprep.mubr.bf16.mxu0 %v7679_v48  ;;  %v4102_v34 = vmax.f32 %v4100_v12, %v4101_v43 }
 0x4ac   : > { %v4432_v20 = vrot.slane %v4431_v24, 2  ;;  %v3401_v23 = vadd.f32 %v3400_v19, %v7292_v26  ;;  %v4139_v22 = vmax.f32 %v4137_v15, %v4138_v57 }
 0x4ad   : > { %v4396_v10 = vmax.f32 %v4394_v0, %v4395_v18  ;;  %v4214_v2 = vmax.f32 %v3395_v40, %v3399_v39  ;;  %3663 = vmatmul.mubr.bf16.gmra.mrb[12].mxu1 %v6795_v3  ;;  %v3787_v31 = vpop.f32.mrb[176].mxu0 }
 0x4ae   : > { %v4433_v4 = vmax.f32 %v4431_v24, %v4432_v20  ;;  %v4251_v11 = vmax.f32 %v3397_v63, %v3401_v23  ;;  %v3788_v47 = vadd.f32 %v3787_v31, %v7229_v38  ;;  %v3789_v35 = vpop.f32.mrb[177].mxu0  ;;  %3672 = vmatprep.mubr.bf16.mxu1 %v7679_v48 }
 0x4af   : > { %v4397_v17 = vrot.slane %v4396_v10, 1  ;;  %v3790_v49 = vadd.f32 %v3789_v35, %v7233_v46  ;;  %v3791_v25 = vpop.f32.mrb[178].mxu0 }
 0x4b0   : > { %v4434_v44 = vrot.slane %v4433_v4, 1  ;;  %v4295_v3 = vmax.f32 %v4294_v37, %v3788_v47  ;;  %v3792_v36 = vadd.f32 %v3791_v25, %v7229_v38  ;;  %v3404_v8 = vpop.f32.mrb[164].mxu1  ;;  %v3793_v1 = vpop.f32.mrb[179].mxu0 }
 0x4b1   : > { %v4398_v61 = vmax.f32 %v4396_v10, %v4397_v17  ;;  %v4332_v32 = vmax.f32 %v4331_v21, %v3790_v49  ;;  %v3405_v30 = vadd.f32 %v3404_v8, %v7289_v51  ;;  %v3794_v58 = vadd.f32 %v3793_v1, %v7233_v46  ;;  %v3406_v9 = vpop.f32.mrb[165].mxu1 }
 0x4b2   : > { %v4435_v59 = vmax.f32 %v4433_v4, %v4434_v44  ;;  %v4296_v28 = vmax.f32 %v4295_v3, %v3792_v36  ;;  %v3407_v52 = vadd.f32 %v3406_v9, %v7292_v26  ;;  %v3408_v16 = vpop.f32.mrb[166].mxu1  ;;  %4056 = vmatmul.mubr.bf16.gmra.mrb[28].mxu0 %v6858_v42 }
 0x4b3   : > { %v4215_v12 = vmax.f32 %v4214_v2, %v3405_v30  ;;  %v4333_v62 = vmax.f32 %v4332_v32, %v3794_v58  ;;  %v3409_v53 = vadd.f32 %v3408_v16, %v7289_v51  ;;  %v3410_v45 = vpop.f32.mrb[167].mxu1  ;;  %v4659_v54 = vsel %vm4658_vm1, %v4102_v34, %v4398_v61 }
 0x4b4   : > { %v4252_v7 = vmax.f32 %v4251_v11, %v3407_v52  ;;  %v3411_v0 = vadd.f32 %v3410_v45, %v7292_v26  ;;  %v4660_v41 = vsel %vm4658_vm1, %v4139_v22, %v4435_v59 }
 0x4b5   : > { %v4216_v55 = vmax.f32 %v4215_v12, %v3409_v53  ;;  %3673 = vmatmul.mubr.bf16.gmra.mrb[16].mxu1 %v6831_v50  ;;  %v3797_v5 = vpop.f32.mrb[180].mxu0  ;;  %v4679_v15 = vcombine.low %v4659_v54, %v4660_v41  ;;  %v4694_v50 = vrot.slane %v4680_v6, %v7307_v29 }
 0x4b6   : > { %v4253_v24 = vmax.f32 %v4252_v7, %v3411_v0  ;;  %v3798_v37 = vadd.f32 %v3797_v5, %v7229_v38  ;;  %v3799_v60 = vpop.f32.mrb[181].mxu0  ;;  %3682 = vmatprep.mubr.bf16.mxu1 %v7679_v48 }
 0x4b7   : > { %v3800_v27 = vadd.f32 %v3799_v60, %v7233_v46  ;;  %v3801_v18 = vpop.f32.mrb[182].mxu0  ;;  %v4687_v40 = vrot.slane %v4679_v15, %v7307_v29 }
 0x4b8   : > { %v4297_v21 = vmax.f32 %v4296_v28, %v3798_v37  ;;  %v3802_v39 = vadd.f32 %v3801_v18, %v7229_v38  ;;  %v3414_v19 = vpop.f32.mrb[168].mxu1  ;;  %v3803_v43 = vpop.f32.mrb[183].mxu0 }
 0x4b9   : > { %v4334_v20 = vmax.f32 %v4333_v62, %v3800_v27  ;;  %v3415_v63 = vadd.f32 %v3414_v19, %v7289_v51  ;;  %v3804_v23 = vadd.f32 %v3803_v43, %v7233_v46  ;;  %v3416_v10 = vpop.f32.mrb[169].mxu1  ;;  %v4695_v2 = vcombine.low %v4687_v40, %v4694_v50 }
 0x4ba   : > { %v4298_v31 = vmax.f32 %v4297_v21, %v3802_v39  ;;  %v3417_v57 = vadd.f32 %v3416_v10, %v7292_v26  ;;  %v3418_v4 = vpop.f32.mrb[170].mxu1 }
 0x4bb   : > { %v4217_v11 = vmax.f32 %v4216_v55, %v3415_v63  ;;  %v4335_v47 = vmax.f32 %v4334_v20, %v3804_v23  ;;  %v3419_v56 = vadd.f32 %v3418_v4, %v7289_v51  ;;  %v3420_v14 = vpop.f32.mrb[171].mxu1  ;;  %4776 = vst [vmem:[%s7335_s8] sm:$0xff] %v4695_v2 }
 0x4bc   : > { %v4254_v6 = vmax.f32 %v4253_v24, %v3417_v57  ;;  %v3421_v35 = vadd.f32 %v3420_v14, %v7292_v26 }
 0x4bd   : > { %v4218_v17 = vmax.f32 %v4217_v11, %v3419_v56  ;;  %3683 = vmatmul.mubr.bf16.gmra.mrb[20].mxu1 %v6828_v33  ;;  %v3807_v49 = vpop.f32.mrb[184].mxu0 }
 0x4be   : > { %v4255_v25 = vmax.f32 %v4254_v6, %v3421_v35  ;;  %v3808_v34 = vadd.f32 %v3807_v49, %v7229_v38  ;;  %v3809_v44 = vpop.f32.mrb[185].mxu0  ;;  %3692 = vmatprep.mubr.bf16.mxu1 %v7679_v48 }
 0x4bf   : > { %v3810_v3 = vadd.f32 %v3809_v44, %v7233_v46  ;;  %v3811_v36 = vpop.f32.mrb[186].mxu0 }
 0x4c0   : > { %v4299_v8 = vmax.f32 %v4298_v31, %v3808_v34  ;;  %v3812_v1 = vadd.f32 %v3811_v36, %v7229_v38  ;;  %v3424_v61 = vpop.f32.mrb[172].mxu1  ;;  %v3813_v32 = vpop.f32.mrb[187].mxu0 }
 0x4c1   : > { %v4336_v30 = vmax.f32 %v4335_v47, %v3810_v3  ;;  %v3425_v58 = vadd.f32 %v3424_v61, %v7289_v51  ;;  %v3814_v33 = vadd.f32 %v3813_v32, %v7233_v46  ;;  %v3426_v9 = vpop.f32.mrb[173].mxu1 }
 0x4c2   : > { %v4300_v22 = vmax.f32 %v4299_v8, %v3812_v1  ;;  %v3427_v59 = vadd.f32 %v3426_v9, %v7292_v26  ;;  %v3428_v28 = vpop.f32.mrb[174].mxu1 }
 0x4c3   : > { %v4219_v52 = vmax.f32 %v4218_v17, %v3425_v58  ;;  %v4337_v16 = vmax.f32 %v4336_v30, %v3814_v33  ;;  %v3429_v12 = vadd.f32 %v3428_v28, %v7289_v51  ;;  %v3430_v62 = vpop.f32.mrb[175].mxu1 }
 0x4c4   : > { %v4256_v53 = vmax.f32 %v4255_v25, %v3427_v59  ;;  %v3431_v45 = vadd.f32 %v3430_v62, %v7292_v26 }
 0x4c5   : > { %v4220_v54 = vmax.f32 %v4219_v52, %v3429_v12  ;;  %3693 = vmatmul.mubr.bf16.gmra.mrb[24].mxu1 %v6867_v13  ;;  %v3817_v7 = vpop.f32.mrb[188].mxu0 }
 0x4c6   : > { %v4257_v0 = vmax.f32 %v4256_v53, %v3431_v45  ;;  %v3818_v41 = vadd.f32 %v3817_v7, %v7229_v38  ;;  %v3819_v55 = vpop.f32.mrb[189].mxu0  ;;  %3702 = vmatprep.mubr.bf16.mxu1 %v7679_v48 }
 0x4c7   : > { %v3820_v5 = vadd.f32 %v3819_v55, %v7233_v46  ;;  %v3821_v15 = vpop.f32.mrb[190].mxu0 }
 0x4c8   : > { %v4301_v24 = vmax.f32 %v4300_v22, %v3818_v41  ;;  %v3822_v37 = vadd.f32 %v3821_v15, %v7229_v38  ;;  %v3434_v60 = vpop.f32.mrb[176].mxu1  ;;  %v3823_v27 = vpop.f32.mrb[191].mxu0 }
 0x4c9   : > { %v4338_v18 = vmax.f32 %v4337_v16, %v3820_v5  ;;  %v3435_v40 = vadd.f32 %v3434_v60, %v7289_v51  ;;  %v3824_v13 = vadd.f32 %v3823_v27, %v7233_v46  ;;  %v3436_v50 = vpop.f32.mrb[177].mxu1 }
 0x4ca   : > { %v4302_v21 = vmax.f32 %v4301_v24, %v3822_v37  ;;  %v3437_v39 = vadd.f32 %v3436_v50, %v7292_v26  ;;  %v3438_v19 = vpop.f32.mrb[178].mxu1 }
 0x4cb   : > { %v4221_v43 = vmax.f32 %v4220_v54, %v3435_v40  ;;  %v4339_v48 = vmax.f32 %v4338_v18, %v3824_v13  ;;  %v3439_v20 = vadd.f32 %v3438_v19, %v7289_v51  ;;  %v3440_v63 = vpop.f32.mrb[179].mxu1 }
 0x4cc   : > { %v4258_v23 = vmax.f32 %v4257_v0, %v3437_v39  ;;  %v3441_v10 = vadd.f32 %v3440_v63, %v7292_v26 }
 0x4cd   : > { %v4222_v2 = vmax.f32 %v4221_v43, %v3439_v20  ;;  %3703 = vmatmul.mubr.bf16.gmra.mrb[28].mxu1 %v6858_v42  ;;  %v3827_v31 = vpop.f32.mrb[192].mxu0 }
 0x4ce   : > { %v4259_v57 = vmax.f32 %v4258_v23, %v3441_v10  ;;  %v3828_v4 = vadd.f32 %v3827_v31, %v7229_v38  ;;  %v3829_v11 = vpop.f32.mrb[193].mxu0 }
 0x4cf   : > { %v3830_v47 = vadd.f32 %v3829_v11, %v7233_v46  ;;  %v3831_v56 = vpop.f32.mrb[194].mxu0 }
 0x4d0   : > { %v4303_v14 = vmax.f32 %v4302_v21, %v3828_v4  ;;  %v3832_v6 = vadd.f32 %v3831_v56, %v7229_v38  ;;  %v3444_v35 = vpop.f32.mrb[180].mxu1  ;;  %v3833_v17 = vpop.f32.mrb[195].mxu0 }
 0x4d1   : > { %v4340_v49 = vmax.f32 %v4339_v48, %v3830_v47  ;;  %v3445_v25 = vadd.f32 %v3444_v35, %v7289_v51  ;;  %v3834_v34 = vadd.f32 %v3833_v17, %v7233_v46  ;;  %v3446_v44 = vpop.f32.mrb[181].mxu1 }
 0x4d2   : > { %v4304_v42 = vmax.f32 %v4303_v14, %v3832_v6  ;;  %v3447_v3 = vadd.f32 %v3446_v44, %v7292_v26  ;;  %v3448_v36 = vpop.f32.mrb[182].mxu1 }
 0x4d3   : > { %v4223_v8 = vmax.f32 %v4222_v2, %v3445_v25  ;;  %v4341_v1 = vmax.f32 %v4340_v49, %v3834_v34  ;;  %v3449_v61 = vadd.f32 %v3448_v36, %v7289_v51  ;;  %v3450_v32 = vpop.f32.mrb[183].mxu1 }
 0x4d4   : > { %v4260_v30 = vmax.f32 %v4259_v57, %v3447_v3  ;;  %v3451_v58 = vadd.f32 %v3450_v32, %v7292_v26 }
 0x4d5   : > { %v4224_v33 = vmax.f32 %v4223_v8, %v3449_v61  ;;  %v3837_v9 = vpop.f32.mrb[196].mxu0 }
 0x4d6   : > { %v4261_v22 = vmax.f32 %v4260_v30, %v3451_v58  ;;  %v3838_v59 = vadd.f32 %v3837_v9, %v7229_v38  ;;  %v3839_v28 = vpop.f32.mrb[197].mxu0 }
 0x4d7   : > { %v3840_v52 = vadd.f32 %v3839_v28, %v7233_v46  ;;  %v3841_v16 = vpop.f32.mrb[198].mxu0 }
 0x4d8   : > { %v4305_v12 = vmax.f32 %v4304_v42, %v3838_v59  ;;  %v3842_v62 = vadd.f32 %v3841_v16, %v7229_v38  ;;  %v3454_v53 = vpop.f32.mrb[184].mxu1  ;;  %v3843_v45 = vpop.f32.mrb[199].mxu0 }
 0x4d9   : > { %v4342_v54 = vmax.f32 %v4341_v1, %v3840_v52  ;;  %v3455_v7 = vadd.f32 %v3454_v53, %v7289_v51  ;;  %v3844_v0 = vadd.f32 %v3843_v45, %v7233_v46  ;;  %v3456_v41 = vpop.f32.mrb[185].mxu1 }
 0x4da   : > { %v4306_v55 = vmax.f32 %v4305_v12, %v3842_v62  ;;  %v3457_v5 = vadd.f32 %v3456_v41, %v7292_v26  ;;  %v3458_v15 = vpop.f32.mrb[186].mxu1 }
 0x4db   : > { %v4225_v24 = vmax.f32 %v4224_v33, %v3455_v7  ;;  %v4343_v37 = vmax.f32 %v4342_v54, %v3844_v0  ;;  %v3459_v60 = vadd.f32 %v3458_v15, %v7289_v51  ;;  %v3460_v27 = vpop.f32.mrb[187].mxu1 }
 0x4dc   : > { %v4262_v18 = vmax.f32 %v4261_v22, %v3457_v5  ;;  %v3461_v40 = vadd.f32 %v3460_v27, %v7292_v26 }
 0x4dd   : > { %v4226_v13 = vmax.f32 %v4225_v24, %v3459_v60  ;;  %v3847_v50 = vpop.f32.mrb[200].mxu0 }
 0x4de   : > { %v4263_v21 = vmax.f32 %v4262_v18, %v3461_v40  ;;  %v3848_v39 = vadd.f32 %v3847_v50, %v7229_v38  ;;  %v3849_v19 = vpop.f32.mrb[201].mxu0 }
 0x4df   : > { %v3850_v43 = vadd.f32 %v3849_v19, %v7233_v46  ;;  %v3851_v48 = vpop.f32.mrb[202].mxu0 }
 0x4e0   : > { %v4307_v20 = vmax.f32 %v4306_v55, %v3848_v39  ;;  %v3852_v63 = vadd.f32 %v3851_v48, %v7229_v38  ;;  %v3464_v23 = vpop.f32.mrb[188].mxu1  ;;  %v3853_v10 = vpop.f32.mrb[203].mxu0 }
 0x4e1   : > { %v4344_v2 = vmax.f32 %v4343_v37, %v3850_v43  ;;  %v3465_v31 = vadd.f32 %v3464_v23, %v7289_v51  ;;  %v3854_v57 = vadd.f32 %v3853_v10, %v7233_v46  ;;  %v3466_v4 = vpop.f32.mrb[189].mxu1 }
 0x4e2   : > { %v4308_v11 = vmax.f32 %v4307_v20, %v3852_v63  ;;  %v3467_v47 = vadd.f32 %v3466_v4, %v7292_v26  ;;  %v3468_v56 = vpop.f32.mrb[190].mxu1 }
 0x4e3   : > { %v4227_v14 = vmax.f32 %v4226_v13, %v3465_v31  ;;  %v4345_v6 = vmax.f32 %v4344_v2, %v3854_v57  ;;  %v3469_v35 = vadd.f32 %v3468_v56, %v7289_v51  ;;  %v3470_v17 = vpop.f32.mrb[191].mxu1 }
 0x4e4   : > { %v4264_v49 = vmax.f32 %v4263_v21, %v3467_v47  ;;  %v3471_v25 = vadd.f32 %v3470_v17, %v7292_v26 }
 0x4e5   : > { %v4228_v34 = vmax.f32 %v4227_v14, %v3469_v35  ;;  %v3857_v44 = vpop.f32.mrb[204].mxu0 }
 0x4e6   : > { %v4265_v42 = vmax.f32 %v4264_v49, %v3471_v25  ;;  %v3858_v3 = vadd.f32 %v3857_v44, %v7229_v38  ;;  %v3859_v36 = vpop.f32.mrb[205].mxu0 }
 0x4e7   : > { %v3860_v8 = vadd.f32 %v3859_v36, %v7233_v46  ;;  %v3861_v1 = vpop.f32.mrb[206].mxu0 }
 0x4e8   : > { %v4309_v61 = vmax.f32 %v4308_v11, %v3858_v3  ;;  %v3862_v32 = vadd.f32 %v3861_v1, %v7229_v38  ;;  %v3474_v30 = vpop.f32.mrb[192].mxu1  ;;  %v3863_v58 = vpop.f32.mrb[207].mxu0 }
 0x4e9   : > { %v4346_v33 = vmax.f32 %v4345_v6, %v3860_v8  ;;  %v3475_v9 = vadd.f32 %v3474_v30, %v7289_v51  ;;  %v3864_v22 = vadd.f32 %v3863_v58, %v7233_v46  ;;  %v3476_v59 = vpop.f32.mrb[193].mxu1 }
 0x4ea   : > { %v4310_v28 = vmax.f32 %v4309_v61, %v3862_v32  ;;  %v3477_v52 = vadd.f32 %v3476_v59, %v7292_v26  ;;  %v3478_v16 = vpop.f32.mrb[194].mxu1 }
 0x4eb   : > { %v4229_v12 = vmax.f32 %v4228_v34, %v3475_v9  ;;  %v4347_v62 = vmax.f32 %v4346_v33, %v3864_v22  ;;  %v3479_v53 = vadd.f32 %v3478_v16, %v7289_v51  ;;  %v3480_v45 = vpop.f32.mrb[195].mxu1 }
 0x4ec   : > { %v4266_v54 = vmax.f32 %v4265_v42, %v3477_v52  ;;  %v3481_v7 = vadd.f32 %v3480_v45, %v7292_v26 }
 0x4ed   : > { %v4230_v0 = vmax.f32 %v4229_v12, %v3479_v53  ;;  %v3867_v41 = vpop.f32.mrb[208].mxu0 }
 0x4ee   : > { %v4267_v55 = vmax.f32 %v4266_v54, %v3481_v7  ;;  %v3868_v5 = vadd.f32 %v3867_v41, %v7229_v38  ;;  %v3869_v15 = vpop.f32.mrb[209].mxu0 }
 0x4ef   : > { %v3870_v24 = vadd.f32 %v3869_v15, %v7233_v46  ;;  %v3871_v37 = vpop.f32.mrb[210].mxu0 }
 0x4f0   : > { %v4311_v60 = vmax.f32 %v4310_v28, %v3868_v5  ;;  %v3872_v27 = vadd.f32 %v3871_v37, %v7229_v38  ;;  %v3484_v18 = vpop.f32.mrb[196].mxu1  ;;  %v3873_v40 = vpop.f32.mrb[211].mxu0 }
 0x4f1   : > { %v4348_v13 = vmax.f32 %v4347_v62, %v3870_v24  ;;  %v3485_v50 = vadd.f32 %v3484_v18, %v7289_v51  ;;  %v3874_v21 = vadd.f32 %v3873_v40, %v7233_v46  ;;  %v3486_v39 = vpop.f32.mrb[197].mxu1 }
 0x4f2   : > { %v4312_v19 = vmax.f32 %v4311_v60, %v3872_v27  ;;  %v3487_v43 = vadd.f32 %v3486_v39, %v7292_v26  ;;  %v3488_v48 = vpop.f32.mrb[198].mxu1 }
 0x4f3   : > { %v4231_v20 = vmax.f32 %v4230_v0, %v3485_v50  ;;  %v4349_v63 = vmax.f32 %v4348_v13, %v3874_v21  ;;  %v3489_v23 = vadd.f32 %v3488_v48, %v7289_v51  ;;  %v3490_v10 = vpop.f32.mrb[199].mxu1 }
 0x4f4   : > { %v4268_v2 = vmax.f32 %v4267_v55, %v3487_v43  ;;  %v3491_v31 = vadd.f32 %v3490_v10, %v7292_v26 }
 0x4f5   : > { %v4232_v57 = vmax.f32 %v4231_v20, %v3489_v23  ;;  %v3877_v4 = vpop.f32.mrb[212].mxu0 }
 0x4f6   : > { %v4269_v11 = vmax.f32 %v4268_v2, %v3491_v31  ;;  %v3878_v47 = vadd.f32 %v3877_v4, %v7229_v38  ;;  %v3879_v56 = vpop.f32.mrb[213].mxu0 }
 0x4f7   : > { %v3880_v14 = vadd.f32 %v3879_v56, %v7233_v46  ;;  %v3881_v6 = vpop.f32.mrb[214].mxu0 }
 0x4f8   : > { %v4313_v35 = vmax.f32 %v4312_v19, %v3878_v47  ;;  %v3882_v17 = vadd.f32 %v3881_v6, %v7229_v38  ;;  %v3494_v49 = vpop.f32.mrb[200].mxu1  ;;  %v3883_v25 = vpop.f32.mrb[215].mxu0 }
 0x4f9   : > { %v4350_v34 = vmax.f32 %v4349_v63, %v3880_v14  ;;  %v3495_v44 = vadd.f32 %v3494_v49, %v7289_v51  ;;  %v3884_v42 = vadd.f32 %v3883_v25, %v7233_v46  ;;  %v3496_v3 = vpop.f32.mrb[201].mxu1 }
 0x4fa   : > { %v4314_v36 = vmax.f32 %v4313_v35, %v3882_v17  ;;  %v3497_v8 = vadd.f32 %v3496_v3, %v7292_v26  ;;  %v3498_v1 = vpop.f32.mrb[202].mxu1 }
 0x4fb   : > { %v4233_v61 = vmax.f32 %v4232_v57, %v3495_v44  ;;  %v4351_v32 = vmax.f32 %v4350_v34, %v3884_v42  ;;  %v3499_v30 = vadd.f32 %v3498_v1, %v7289_v51  ;;  %v3500_v58 = vpop.f32.mrb[203].mxu1 }
 0x4fc   : > { %v4270_v33 = vmax.f32 %v4269_v11, %v3497_v8  ;;  %v3501_v9 = vadd.f32 %v3500_v58, %v7292_v26 }
 0x4fd   : > { %v4234_v22 = vmax.f32 %v4233_v61, %v3499_v30  ;;  %v3887_v59 = vpop.f32.mrb[216].mxu0 }
 0x4fe   : > { %v4271_v28 = vmax.f32 %v4270_v33, %v3501_v9  ;;  %v3888_v52 = vadd.f32 %v3887_v59, %v7229_v38  ;;  %v3889_v16 = vpop.f32.mrb[217].mxu0 }
 0x4ff   : > { %v3890_v12 = vadd.f32 %v3889_v16, %v7233_v46  ;;  %v3891_v62 = vpop.f32.mrb[218].mxu0 }
 0x500   : > { %v4315_v53 = vmax.f32 %v4314_v36, %v3888_v52  ;;  %v3892_v45 = vadd.f32 %v3891_v62, %v7229_v38  ;;  %v3504_v54 = vpop.f32.mrb[204].mxu1  ;;  %v3893_v7 = vpop.f32.mrb[219].mxu0 }
 0x501   : > { %v4352_v0 = vmax.f32 %v4351_v32, %v3890_v12  ;;  %v3505_v41 = vadd.f32 %v3504_v54, %v7289_v51  ;;  %v3894_v55 = vadd.f32 %v3893_v7, %v7233_v46  ;;  %v3506_v5 = vpop.f32.mrb[205].mxu1 }
 0x502   : > { %v4316_v15 = vmax.f32 %v4315_v53, %v3892_v45  ;;  %v3507_v24 = vadd.f32 %v3506_v5, %v7292_v26  ;;  %v3508_v37 = vpop.f32.mrb[206].mxu1 }
 0x503   : > { %v4235_v60 = vmax.f32 %v4234_v22, %v3505_v41  ;;  %v4353_v27 = vmax.f32 %v4352_v0, %v3894_v55  ;;  %v3509_v18 = vadd.f32 %v3508_v37, %v7289_v51  ;;  %v3510_v40 = vpop.f32.mrb[207].mxu1 }
 0x504   : > { %v4272_v13 = vmax.f32 %v4271_v28, %v3507_v24  ;;  %v3511_v50 = vadd.f32 %v3510_v40, %v7292_v26 }
 0x505   : > { %v4236_v21 = vmax.f32 %v4235_v60, %v3509_v18  ;;  %v3897_v39 = vpop.f32.mrb[220].mxu0 }
 0x506   : > { %v4273_v19 = vmax.f32 %v4272_v13, %v3511_v50  ;;  %v3898_v43 = vadd.f32 %v3897_v39, %v7229_v38  ;;  %v3899_v48 = vpop.f32.mrb[221].mxu0 }
 0x507   : > { %v3900_v20 = vadd.f32 %v3899_v48, %v7233_v46  ;;  %v3901_v63 = vpop.f32.mrb[222].mxu0 }
 0x508   : > { %v4317_v23 = vmax.f32 %v4316_v15, %v3898_v43  ;;  %v3902_v10 = vadd.f32 %v3901_v63, %v7229_v38  ;;  %v3514_v2 = vpop.f32.mrb[208].mxu1  ;;  %v3903_v31 = vpop.f32.mrb[223].mxu0 }
 0x509   : > { %v4354_v57 = vmax.f32 %v4353_v27, %v3900_v20  ;;  %v3515_v4 = vadd.f32 %v3514_v2, %v7289_v51  ;;  %v3904_v11 = vadd.f32 %v3903_v31, %v7233_v46  ;;  %v3516_v47 = vpop.f32.mrb[209].mxu1 }
 0x50a   : > { %v7421_v56 = vmax.f32 %v4317_v23, %v3902_v10  ;;  %v3517_v14 = vadd.f32 %v3516_v47, %v7292_v26  ;;  %v3518_v6 = vpop.f32.mrb[210].mxu1 }
 0x50b   : > { %v4237_v35 = vmax.f32 %v4236_v21, %v3515_v4  ;;  %v7424_v17 = vmax.f32 %v4354_v57, %v3904_v11  ;;  %v3519_v49 = vadd.f32 %v3518_v6, %v7289_v51  ;;  %v3520_v25 = vpop.f32.mrb[211].mxu1 }
 0x50c   : > { %v4274_v34 = vmax.f32 %v4273_v19, %v3517_v14  ;;  %v3521_v44 = vadd.f32 %v3520_v25, %v7292_v26 }
 0x50d   : > { %v4238_v42 = vmax.f32 %v4237_v35, %v3519_v49  ;;  %v3907_v3 = vpop.f32.mrb[224].mxu0 }
 0x50e   : > { %v4275_v36 = vmax.f32 %v4274_v34, %v3521_v44  ;;  %v3909_v8 = vpop.f32.mrb[225].mxu0  ;;  %v3908_v61 = vadd.f32 %v3907_v3, %v7229_v38 }
 0x50f   : > { %v3911_v1 = vpop.f32.mrb[226].mxu0  ;;  %v3910_v33 = vadd.f32 %v3909_v8, %v7233_v46 }
 0x510   : > { %v3912_v32 = vadd.f32 %v3911_v1, %v7229_v38  ;;  %v3524_v30 = vpop.f32.mrb[212].mxu1  ;;  %v3913_v58 = vpop.f32.mrb[227].mxu0 }
 0x511   : > { %v3525_v9 = vadd.f32 %v3524_v30, %v7289_v51  ;;  %v3914_v22 = vadd.f32 %v3913_v58, %v7233_v46  ;;  %v3526_v59 = vpop.f32.mrb[213].mxu1 }
 0x512   : > { %v4584_v28 = vmax.f32 %v3908_v61, %v3912_v32  ;;  %v3527_v52 = vadd.f32 %v3526_v59, %v7292_v26  ;;  %v3528_v16 = vpop.f32.mrb[214].mxu1 }
 0x513   : > { %v4239_v12 = vmax.f32 %v4238_v42, %v3525_v9  ;;  %v4621_v62 = vmax.f32 %v3910_v33, %v3914_v22  ;;  %v3529_v53 = vadd.f32 %v3528_v16, %v7289_v51  ;;  %v3530_v45 = vpop.f32.mrb[215].mxu1 }
 0x514   : > { %v4276_v54 = vmax.f32 %v4275_v36, %v3527_v52  ;;  %v3531_v7 = vadd.f32 %v3530_v45, %v7292_v26 }
 0x515   : > { %v4240_v0 = vmax.f32 %v4239_v12, %v3529_v53  ;;  %v3917_v41 = vpop.f32.mrb[228].mxu0 }
 0x516   : > { %v4277_v55 = vmax.f32 %v4276_v54, %v3531_v7  ;;  %v3918_v5 = vadd.f32 %v3917_v41, %v7229_v38  ;;  %v3919_v15 = vpop.f32.mrb[229].mxu0 }
 0x517   : > { %v3920_v24 = vadd.f32 %v3919_v15, %v7233_v46  ;;  %v3921_v37 = vpop.f32.mrb[230].mxu0 }
 0x518   : > { %v4585_v60 = vmax.f32 %v4584_v28, %v3918_v5  ;;  %v3922_v27 = vadd.f32 %v3921_v37, %v7229_v38  ;;  %v3534_v18 = vpop.f32.mrb[216].mxu1  ;;  %v3923_v40 = vpop.f32.mrb[231].mxu0 }
 0x519   : > { %v4622_v13 = vmax.f32 %v4621_v62, %v3920_v24  ;;  %v3535_v50 = vadd.f32 %v3534_v18, %v7289_v51  ;;  %v3924_v21 = vadd.f32 %v3923_v40, %v7233_v46  ;;  %v3536_v39 = vpop.f32.mrb[217].mxu1 }
 0x51a   : > { %v4586_v19 = vmax.f32 %v4585_v60, %v3922_v27  ;;  %v3537_v43 = vadd.f32 %v3536_v39, %v7292_v26  ;;  %v3538_v48 = vpop.f32.mrb[218].mxu1 }
 0x51b   : > { %v4241_v20 = vmax.f32 %v4240_v0, %v3535_v50  ;;  %v4623_v63 = vmax.f32 %v4622_v13, %v3924_v21  ;;  %v3539_v23 = vadd.f32 %v3538_v48, %v7289_v51  ;;  %v3540_v10 = vpop.f32.mrb[219].mxu1 }
 0x51c   : > { %v4278_v2 = vmax.f32 %v4277_v55, %v3537_v43  ;;  %v3541_v31 = vadd.f32 %v3540_v10, %v7292_v26 }
 0x51d   : > { %v4242_v57 = vmax.f32 %v4241_v20, %v3539_v23  ;;  %v3927_v4 = vpop.f32.mrb[232].mxu0 }
 0x51e   : > { %v4279_v11 = vmax.f32 %v4278_v2, %v3541_v31  ;;  %v3928_v47 = vadd.f32 %v3927_v4, %v7229_v38  ;;  %v3929_v14 = vpop.f32.mrb[233].mxu0 }
 0x51f   : > { %v3930_v6 = vadd.f32 %v3929_v14, %v7233_v46  ;;  %v3931_v35 = vpop.f32.mrb[234].mxu0 }
 0x520   : > { %v4587_v49 = vmax.f32 %v4586_v19, %v3928_v47  ;;  %v3932_v25 = vadd.f32 %v3931_v35, %v7229_v38  ;;  %v3544_v34 = vpop.f32.mrb[220].mxu1  ;;  %v3933_v44 = vpop.f32.mrb[235].mxu0 }
 0x521   : > { %v4624_v42 = vmax.f32 %v4623_v63, %v3930_v6  ;;  %v3545_v3 = vadd.f32 %v3544_v34, %v7289_v51  ;;  %v3934_v36 = vadd.f32 %v3933_v44, %v7233_v46  ;;  %v3546_v8 = vpop.f32.mrb[221].mxu1 }
 0x522   : > { %v4588_v1 = vmax.f32 %v4587_v49, %v3932_v25  ;;  %v3547_v61 = vadd.f32 %v3546_v8, %v7292_v26  ;;  %v3548_v32 = vpop.f32.mrb[222].mxu1 }
 0x523   : > { %v4243_v30 = vmax.f32 %v4242_v57, %v3545_v3  ;;  %v4625_v58 = vmax.f32 %v4624_v42, %v3934_v36  ;;  %v3549_v33 = vadd.f32 %v3548_v32, %v7289_v51  ;;  %v3550_v9 = vpop.f32.mrb[223].mxu1 }
 0x524   : > { %v4280_v22 = vmax.f32 %v4279_v11, %v3547_v61  ;;  %v3551_v59 = vadd.f32 %v3550_v9, %v7292_v26 }
 0x525   : > { %v7452_v28 = vmax.f32 %v4243_v30, %v3549_v33  ;;  %v3937_v52 = vpop.f32.mrb[236].mxu0 }
 0x526   : > { %v7454_v16 = vmax.f32 %v4280_v22, %v3551_v59  ;;  %v3938_v12 = vadd.f32 %v3937_v52, %v7229_v38  ;;  %v3939_v62 = vpop.f32.mrb[237].mxu0 }
 0x527   : > { %v3940_v53 = vadd.f32 %v3939_v62, %v7233_v46  ;;  %v3941_v45 = vpop.f32.mrb[238].mxu0 }
 0x528   : > { %v4589_v54 = vmax.f32 %v4588_v1, %v3938_v12  ;;  %v3942_v7 = vadd.f32 %v3941_v45, %v7229_v38  ;;  %v3554_v0 = vpop.f32.mrb[224].mxu1  ;;  %v3943_v41 = vpop.f32.mrb[239].mxu0 }
 0x529   : > { %v4626_v55 = vmax.f32 %v4625_v58, %v3940_v53  ;;  %v3944_v5 = vadd.f32 %v3943_v41, %v7233_v46  ;;  %v3556_v15 = vpop.f32.mrb[225].mxu1  ;;  %v3555_v60 = vadd.f32 %v3554_v0, %v7289_v51 }
 0x52a   : > { %v4590_v24 = vmax.f32 %v4589_v54, %v3942_v7  ;;  %v3558_v37 = vpop.f32.mrb[226].mxu1  ;;  %v3557_v13 = vadd.f32 %v3556_v15, %v7292_v26 }
 0x52b   : > { %v4627_v27 = vmax.f32 %v4626_v55, %v3944_v5  ;;  %v3559_v18 = vadd.f32 %v3558_v37, %v7289_v51  ;;  %v3560_v40 = vpop.f32.mrb[227].mxu1 }
 0x52c   : > { %v3561_v50 = vadd.f32 %v3560_v40, %v7292_v26 }
 0x52d   : > { %v4510_v21 = vmax.f32 %v3555_v60, %v3559_v18  ;;  %v3947_v39 = vpop.f32.mrb[240].mxu0 }
 0x52e   : > { %v4547_v19 = vmax.f32 %v3557_v13, %v3561_v50  ;;  %v3948_v43 = vadd.f32 %v3947_v39, %v7229_v38  ;;  %v3949_v48 = vpop.f32.mrb[241].mxu0 }
 0x52f   : > { %v3950_v20 = vadd.f32 %v3949_v48, %v7233_v46  ;;  %v3951_v63 = vpop.f32.mrb[242].mxu0 }
 0x530   : > { %v4591_v23 = vmax.f32 %v4590_v24, %v3948_v43  ;;  %v3952_v10 = vadd.f32 %v3951_v63, %v7229_v38  ;;  %v3564_v2 = vpop.f32.mrb[228].mxu1  ;;  %v3953_v31 = vpop.f32.mrb[243].mxu0 }
 0x531   : > { %v4628_v57 = vmax.f32 %v4627_v27, %v3950_v20  ;;  %v3565_v4 = vadd.f32 %v3564_v2, %v7289_v51  ;;  %v3954_v11 = vadd.f32 %v3953_v31, %v7233_v46  ;;  %v3566_v47 = vpop.f32.mrb[229].mxu1 }
 0x532   : > { %v4592_v14 = vmax.f32 %v4591_v23, %v3952_v10  ;;  %v3567_v6 = vadd.f32 %v3566_v47, %v7292_v26  ;;  %v3568_v35 = vpop.f32.mrb[230].mxu1 }
 0x533   : > { %v4511_v49 = vmax.f32 %v4510_v21, %v3565_v4  ;;  %v4629_v25 = vmax.f32 %v4628_v57, %v3954_v11  ;;  %v3569_v34 = vadd.f32 %v3568_v35, %v7289_v51  ;;  %v3570_v44 = vpop.f32.mrb[231].mxu1 }
 0x534   : > { %v4548_v42 = vmax.f32 %v4547_v19, %v3567_v6  ;;  %v3571_v3 = vadd.f32 %v3570_v44, %v7292_v26 }
 0x535   : > { %v4512_v36 = vmax.f32 %v4511_v49, %v3569_v34  ;;  %v3957_v8 = vpop.f32.mrb[244].mxu0 }
 0x536   : > { %v4549_v1 = vmax.f32 %v4548_v42, %v3571_v3  ;;  %v3958_v61 = vadd.f32 %v3957_v8, %v7229_v38  ;;  %v3959_v32 = vpop.f32.mrb[245].mxu0 }
 0x537   : > { %v3960_v30 = vadd.f32 %v3959_v32, %v7233_v46  ;;  %v3961_v58 = vpop.f32.mrb[246].mxu0 }
 0x538   : > { %v4593_v33 = vmax.f32 %v4592_v14, %v3958_v61  ;;  %v3962_v9 = vadd.f32 %v3961_v58, %v7229_v38  ;;  %v3574_v22 = vpop.f32.mrb[232].mxu1  ;;  %v3963_v59 = vpop.f32.mrb[247].mxu0 }
 0x539   : > { %v4630_v52 = vmax.f32 %v4629_v25, %v3960_v30  ;;  %v3575_v12 = vadd.f32 %v3574_v22, %v7289_v51  ;;  %v3964_v62 = vadd.f32 %v3963_v59, %v7233_v46  ;;  %v3576_v53 = vpop.f32.mrb[233].mxu1 }
 0x53a   : > { %v4594_v45 = vmax.f32 %v4593_v33, %v3962_v9  ;;  %v3577_v54 = vadd.f32 %v3576_v53, %v7292_v26  ;;  %v3578_v7 = vpop.f32.mrb[234].mxu1 }
 0x53b   : > { %v4513_v0 = vmax.f32 %v4512_v36, %v3575_v12  ;;  %v4631_v41 = vmax.f32 %v4630_v52, %v3964_v62  ;;  %v3579_v55 = vadd.f32 %v3578_v7, %v7289_v51  ;;  %v3580_v5 = vpop.f32.mrb[235].mxu1 }
 0x53c   : > { %v4550_v15 = vmax.f32 %v4549_v1, %v3577_v54  ;;  %v3581_v24 = vadd.f32 %v3580_v5, %v7292_v26 }
 0x53d   : > { %v4514_v37 = vmax.f32 %v4513_v0, %v3579_v55  ;;  %v3967_v60 = vpop.f32.mrb[248].mxu0 }
 0x53e   : > { %v4551_v27 = vmax.f32 %v4550_v15, %v3581_v24  ;;  %v3968_v18 = vadd.f32 %v3967_v60, %v7229_v38  ;;  %v3969_v40 = vpop.f32.mrb[249].mxu0 }
 0x53f   : > { %v3970_v13 = vadd.f32 %v3969_v40, %v7233_v46  ;;  %v3971_v50 = vpop.f32.mrb[250].mxu0 }
 0x540   : > { %v4595_v21 = vmax.f32 %v4594_v45, %v3968_v18  ;;  %v3972_v39 = vadd.f32 %v3971_v50, %v7229_v38  ;;  %v3584_v19 = vpop.f32.mrb[236].mxu1  ;;  %v3973_v43 = vpop.f32.mrb[251].mxu0 }
 0x541   : > { %v4632_v48 = vmax.f32 %v4631_v41, %v3970_v13  ;;  %v3585_v20 = vadd.f32 %v3584_v19, %v7289_v51  ;;  %v3974_v63 = vadd.f32 %v3973_v43, %v7233_v46  ;;  %v3586_v23 = vpop.f32.mrb[237].mxu1 }
 0x542   : > { %v4596_v10 = vmax.f32 %v4595_v21, %v3972_v39  ;;  %v3587_v2 = vadd.f32 %v3586_v23, %v7292_v26  ;;  %v3588_v31 = vpop.f32.mrb[238].mxu1 }
 0x543   : > { %v4515_v57 = vmax.f32 %v4514_v37, %v3585_v20  ;;  %v4633_v4 = vmax.f32 %v4632_v48, %v3974_v63  ;;  %v3589_v11 = vadd.f32 %v3588_v31, %v7289_v51  ;;  %v3590_v47 = vpop.f32.mrb[239].mxu1 }
 0x544   : > { %v4552_v14 = vmax.f32 %v4551_v27, %v3587_v2  ;;  %v3591_v6 = vadd.f32 %v3590_v47, %v7292_v26 }
 0x545   : > { %v4516_v35 = vmax.f32 %v4515_v57, %v3589_v11  ;;  %v3977_v49 = vpop.f32.mrb[252].mxu0 }
 0x546   : > { %v4553_v25 = vmax.f32 %v4552_v14, %v3591_v6  ;;  %v3978_v34 = vadd.f32 %v3977_v49, %v7229_v38  ;;  %v3979_v44 = vpop.f32.mrb[253].mxu0 }
 0x547   : > { %v3980_v42 = vadd.f32 %v3979_v44, %v7233_v46  ;;  %v3981_v3 = vpop.f32.mrb[254].mxu0 }
 0x548   : > { %v4597_v36 = vmax.f32 %v4596_v10, %v3978_v34  ;;  %v3982_v8 = vadd.f32 %v3981_v3, %v7229_v38  ;;  %v3594_v1 = vpop.f32.mrb[240].mxu1  ;;  %v3983_v61 = vpop.f32.mrb[255].mxu0 }
 0x549   : > { %v4634_v32 = vmax.f32 %v4633_v4, %v3980_v42  ;;  %v3595_v30 = vadd.f32 %v3594_v1, %v7289_v51  ;;  %v3984_v58 = vadd.f32 %v3983_v61, %v7233_v46  ;;  %v3596_v33 = vpop.f32.mrb[241].mxu1 }
 0x54a   : > { %v4598_v9 = vmax.f32 %v4597_v36, %v3982_v8  ;;  %v3597_v22 = vadd.f32 %v3596_v33, %v7292_v26  ;;  %v3598_v59 = vpop.f32.mrb[242].mxu1 }
 0x54b   : > { %v4517_v52 = vmax.f32 %v4516_v35, %v3595_v30  ;;  %v4635_v12 = vmax.f32 %v4634_v32, %v3984_v58  ;;  %v3599_v62 = vadd.f32 %v3598_v59, %v7289_v51  ;;  %v3600_v53 = vpop.f32.mrb[243].mxu1 }
 0x54c   : > { %v4554_v45 = vmax.f32 %v4553_v25, %v3597_v22  ;;  %v3601_v54 = vadd.f32 %v3600_v53, %v7292_v26 }
 0x54d   : > { %v4518_v7 = vmax.f32 %v4517_v52, %v3599_v62  ;;  %v3987_v0 = vpop.f32.mrb[0].mxu0 }
 0x54e   : > { %v4555_v41 = vmax.f32 %v4554_v45, %v3601_v54  ;;  %v3988_v55 = vadd.f32 %v3987_v0, %v7229_v38  ;;  %v3989_v5 = vpop.f32.mrb[1].mxu0 }
 0x54f   : > { %v3990_v15 = vadd.f32 %v3989_v5, %v7233_v46  ;;  %v3991_v24 = vpop.f32.mrb[2].mxu0 }
 0x550   : > { %v4599_v37 = vmax.f32 %v4598_v9, %v3988_v55  ;;  %v3992_v60 = vadd.f32 %v3991_v24, %v7229_v38  ;;  %v3604_v27 = vpop.f32.mrb[244].mxu1  ;;  %v3993_v18 = vpop.f32.mrb[3].mxu0 }
 0x551   : > { %v4636_v40 = vmax.f32 %v4635_v12, %v3990_v15  ;;  %v3605_v13 = vadd.f32 %v3604_v27, %v7289_v51  ;;  %v3994_v50 = vadd.f32 %v3993_v18, %v7233_v46  ;;  %v3606_v21 = vpop.f32.mrb[245].mxu1 }
 0x552   : > { %v4600_v39 = vmax.f32 %v4599_v37, %v3992_v60  ;;  %v3607_v19 = vadd.f32 %v3606_v21, %v7292_v26  ;;  %v3608_v43 = vpop.f32.mrb[246].mxu1 }
 0x553   : > { %v4519_v48 = vmax.f32 %v4518_v7, %v3605_v13  ;;  %v4637_v20 = vmax.f32 %v4636_v40, %v3994_v50  ;;  %v3609_v63 = vadd.f32 %v3608_v43, %v7289_v51  ;;  %v3610_v23 = vpop.f32.mrb[247].mxu1 }
 0x554   : > { %v4556_v10 = vmax.f32 %v4555_v41, %v3607_v19  ;;  %v3611_v2 = vadd.f32 %v3610_v23, %v7292_v26 }
 0x555   : > { %v4520_v31 = vmax.f32 %v4519_v48, %v3609_v63  ;;  %v3997_v57 = vpop.f32.mrb[4].mxu0 }
 0x556   : > { %v4557_v4 = vmax.f32 %v4556_v10, %v3611_v2  ;;  %v3998_v11 = vadd.f32 %v3997_v57, %v7229_v38  ;;  %v3999_v47 = vpop.f32.mrb[5].mxu0 }
 0x557   : > { %v4000_v14 = vadd.f32 %v3999_v47, %v7233_v46  ;;  %v4001_v6 = vpop.f32.mrb[6].mxu0 }
 0x558   : > { %v4601_v35 = vmax.f32 %v4600_v39, %v3998_v11  ;;  %v4002_v49 = vadd.f32 %v4001_v6, %v7229_v38  ;;  %v3614_v25 = vpop.f32.mrb[248].mxu1  ;;  %v4003_v34 = vpop.f32.mrb[7].mxu0 }
 0x559   : > { %v4638_v44 = vmax.f32 %v4637_v20, %v4000_v14  ;;  %v3615_v42 = vadd.f32 %v3614_v25, %v7289_v51  ;;  %v4004_v3 = vadd.f32 %v4003_v34, %v7233_v46  ;;  %v3616_v36 = vpop.f32.mrb[249].mxu1 }
 0x55a   : > { %v4602_v8 = vmax.f32 %v4601_v35, %v4002_v49  ;;  %v3617_v1 = vadd.f32 %v3616_v36, %v7292_v26  ;;  %v3618_v61 = vpop.f32.mrb[250].mxu1 }
 0x55b   : > { %v4521_v32 = vmax.f32 %v4520_v31, %v3615_v42  ;;  %v4639_v30 = vmax.f32 %v4638_v44, %v4004_v3  ;;  %v3619_v58 = vadd.f32 %v3618_v61, %v7289_v51  ;;  %v3620_v33 = vpop.f32.mrb[251].mxu1 }
 0x55c   : > { %v4558_v9 = vmax.f32 %v4557_v4, %v3617_v1  ;;  %v3621_v22 = vadd.f32 %v3620_v33, %v7292_v26 }
 0x55d   : > { %v4522_v59 = vmax.f32 %v4521_v32, %v3619_v58  ;;  %v4007_v52 = vpop.f32.mrb[8].mxu0 }
 0x55e   : > { %v4559_v12 = vmax.f32 %v4558_v9, %v3621_v22  ;;  %v4008_v62 = vadd.f32 %v4007_v52, %v7229_v38  ;;  %v4009_v53 = vpop.f32.mrb[9].mxu0 }
 0x55f   : > { %v4010_v45 = vadd.f32 %v4009_v53, %v7233_v46  ;;  %v4011_v54 = vpop.f32.mrb[10].mxu0 }
 0x560   : > { %v4603_v7 = vmax.f32 %v4602_v8, %v4008_v62  ;;  %v4012_v0 = vadd.f32 %v4011_v54, %v7229_v38  ;;  %v3624_v41 = vpop.f32.mrb[252].mxu1  ;;  %v4013_v55 = vpop.f32.mrb[11].mxu0 }
 0x561   : > { %v4640_v5 = vmax.f32 %v4639_v30, %v4010_v45  ;;  %v3625_v15 = vadd.f32 %v3624_v41, %v7289_v51  ;;  %v4014_v24 = vadd.f32 %v4013_v55, %v7233_v46  ;;  %v3626_v37 = vpop.f32.mrb[253].mxu1 }
 0x562   : > { %v4604_v60 = vmax.f32 %v4603_v7, %v4012_v0  ;;  %v3627_v27 = vadd.f32 %v3626_v37, %v7292_v26  ;;  %v3628_v18 = vpop.f32.mrb[254].mxu1 }
 0x563   : > { %v4523_v40 = vmax.f32 %v4522_v59, %v3625_v15  ;;  %v4641_v13 = vmax.f32 %v4640_v5, %v4014_v24  ;;  %v3629_v50 = vadd.f32 %v3628_v18, %v7289_v51  ;;  %v3630_v21 = vpop.f32.mrb[255].mxu1 }
 0x564   : > { %v4560_v39 = vmax.f32 %v4559_v12, %v3627_v27  ;;  %v3631_v19 = vadd.f32 %v3630_v21, %v7292_v26 }
 0x565   : > { %v4524_v43 = vmax.f32 %v4523_v40, %v3629_v50  ;;  %v4017_v48 = vpop.f32.mrb[12].mxu0 }
 0x566   : > { %v4561_v20 = vmax.f32 %v4560_v39, %v3631_v19  ;;  %v4018_v63 = vadd.f32 %v4017_v48, %v7229_v38  ;;  %v4019_v23 = vpop.f32.mrb[13].mxu0 }
 0x567   : > { %v4020_v10 = vadd.f32 %v4019_v23, %v7233_v46  ;;  %v4021_v2 = vpop.f32.mrb[14].mxu0 }
 0x568   : > { %v4605_v31 = vmax.f32 %v4604_v60, %v4018_v63  ;;  %v4022_v57 = vadd.f32 %v4021_v2, %v7229_v38  ;;  %v3634_v4 = vpop.f32.mrb[0].mxu1  ;;  %v4023_v11 = vpop.f32.mrb[15].mxu0 }
 0x569   : > { %v4642_v47 = vmax.f32 %v4641_v13, %v4020_v10  ;;  %v3635_v14 = vadd.f32 %v3634_v4, %v7289_v51  ;;  %v4024_v6 = vadd.f32 %v4023_v11, %v7233_v46  ;;  %v3636_v35 = vpop.f32.mrb[1].mxu1 }
 0x56a   : > { %v4606_v49 = vmax.f32 %v4605_v31, %v4022_v57  ;;  %v3637_v25 = vadd.f32 %v3636_v35, %v7292_v26  ;;  %v3638_v34 = vpop.f32.mrb[2].mxu1 }
 0x56b   : > { %v4525_v44 = vmax.f32 %v4524_v43, %v3635_v14  ;;  %v4643_v42 = vmax.f32 %v4642_v47, %v4024_v6  ;;  %v3639_v3 = vadd.f32 %v3638_v34, %v7289_v51  ;;  %v3640_v36 = vpop.f32.mrb[3].mxu1 }
 0x56c   : > { %v4562_v8 = vmax.f32 %v4561_v20, %v3637_v25  ;;  %v3641_v1 = vadd.f32 %v3640_v36, %v7292_v26 }
 0x56d   : > { %v4526_v61 = vmax.f32 %v4525_v44, %v3639_v3  ;;  %v4027_v32 = vpop.f32.mrb[16].mxu0 }
 0x56e   : > { %v4563_v30 = vmax.f32 %v4562_v8, %v3641_v1  ;;  %v4028_v58 = vadd.f32 %v4027_v32, %v7229_v38  ;;  %v4029_v33 = vpop.f32.mrb[17].mxu0 }
 0x56f   : > { %v4030_v9 = vadd.f32 %v4029_v33, %v7233_v46  ;;  %v4031_v22 = vpop.f32.mrb[18].mxu0 }
 0x570   : > { %v4607_v59 = vmax.f32 %v4606_v49, %v4028_v58  ;;  %v4032_v52 = vadd.f32 %v4031_v22, %v7229_v38  ;;  %v3644_v12 = vpop.f32.mrb[4].mxu1  ;;  %v4033_v62 = vpop.f32.mrb[19].mxu0 }
 0x571   : > { %v4644_v53 = vmax.f32 %v4643_v42, %v4030_v9  ;;  %v3645_v45 = vadd.f32 %v3644_v12, %v7289_v51  ;;  %v4034_v54 = vadd.f32 %v4033_v62, %v7233_v46  ;;  %v3646_v7 = vpop.f32.mrb[5].mxu1 }
 0x572   : > { %v4608_v0 = vmax.f32 %v4607_v59, %v4032_v52  ;;  %v3647_v41 = vadd.f32 %v3646_v7, %v7292_v26  ;;  %v3648_v55 = vpop.f32.mrb[6].mxu1  ;;  %v4319_v52 = vrot.slane %v7421_v56, 4 }
 0x573   : > { %v4527_v5 = vmax.f32 %v4526_v61, %v3645_v45  ;;  %v4645_v15 = vmax.f32 %v4644_v53, %v4034_v54  ;;  %v3649_v24 = vadd.f32 %v3648_v55, %v7289_v51  ;;  %v3650_v37 = vpop.f32.mrb[7].mxu1  ;;  %v4356_v45 = vrot.slane %v7424_v17, 4 }
 0x574   : > { %v4564_v60 = vmax.f32 %v4563_v30, %v3647_v41  ;;  %v3651_v27 = vadd.f32 %v3650_v37, %v7292_v26  ;;  %v4320_v37 = vmax.f32 %v7421_v56, %v4319_v52 }
 0x575   : > { %v4528_v18 = vmax.f32 %v4527_v5, %v3649_v24  ;;  %v4037_v40 = vpop.f32.mrb[20].mxu0 }
 0x576   : > { %v4565_v13 = vmax.f32 %v4564_v60, %v3651_v27  ;;  %v4038_v50 = vadd.f32 %v4037_v40, %v7229_v38  ;;  %v4039_v21 = vpop.f32.mrb[21].mxu0  ;;  %v4357_v40 = vmax.f32 %v7424_v17, %v4356_v45 }
 0x577   : > { %v4040_v39 = vadd.f32 %v4039_v21, %v7233_v46  ;;  %v4041_v19 = vpop.f32.mrb[22].mxu0 }
 0x578   : > { %v4609_v43 = vmax.f32 %v4608_v0, %v4038_v50  ;;  %v4042_v48 = vadd.f32 %v4041_v19, %v7229_v38  ;;  %v3654_v20 = vpop.f32.mrb[8].mxu1  ;;  %v4043_v63 = vpop.f32.mrb[23].mxu0  ;;  %v4358_v17 = vrot.slane %v4357_v40, 2 }
 0x579   : > { %v4646_v23 = vmax.f32 %v4645_v15, %v4040_v39  ;;  %v3655_v10 = vadd.f32 %v3654_v20, %v7289_v51  ;;  %v4044_v2 = vadd.f32 %v4043_v63, %v7233_v46  ;;  %v3656_v31 = vpop.f32.mrb[9].mxu1 }
 0x57a   : > { %v4610_v57 = vmax.f32 %v4609_v43, %v4042_v48  ;;  %v3657_v4 = vadd.f32 %v3656_v31, %v7292_v26  ;;  %v3658_v11 = vpop.f32.mrb[10].mxu1 }
 0x57b   : > { %v4529_v47 = vmax.f32 %v4528_v18, %v3655_v10  ;;  %v4647_v14 = vmax.f32 %v4646_v23, %v4044_v2  ;;  %v3659_v6 = vadd.f32 %v3658_v11, %v7289_v51  ;;  %v3660_v35 = vpop.f32.mrb[11].mxu1  ;;  %v4321_v23 = vrot.slane %v4320_v37, 2 }
 0x57c   : > { %v4566_v49 = vmax.f32 %v4565_v13, %v3657_v4  ;;  %v3661_v25 = vadd.f32 %v3660_v35, %v7292_v26 }
 0x57d   : > { %v4530_v34 = vmax.f32 %v4529_v47, %v3659_v6  ;;  %v4047_v44 = vpop.f32.mrb[24].mxu0 }
 0x57e   : > { %v4567_v42 = vmax.f32 %v4566_v49, %v3661_v25  ;;  %v4048_v3 = vadd.f32 %v4047_v44, %v7229_v38  ;;  %v4049_v36 = vpop.f32.mrb[25].mxu0  ;;  %v4322_v25 = vmax.f32 %v4320_v37, %v4321_v23  ;;  %v4359_v44 = vmax.f32 %v4357_v40, %v4358_v17 }
 0x57f   : > { %v4050_v8 = vadd.f32 %v4049_v36, %v7233_v46  ;;  %v4051_v1 = vpop.f32.mrb[26].mxu0 }
 0x580   : > { %v4611_v61 = vmax.f32 %v4610_v57, %v4048_v3  ;;  %v4052_v32 = vadd.f32 %v4051_v1, %v7229_v38  ;;  %v3664_v30 = vpop.f32.mrb[12].mxu1  ;;  %v4053_v58 = vpop.f32.mrb[27].mxu0 }
 0x581   : > { %v4648_v33 = vmax.f32 %v4647_v14, %v4050_v8  ;;  %v3665_v9 = vadd.f32 %v3664_v30, %v7289_v51  ;;  %v4054_v22 = vadd.f32 %v4053_v58, %v7233_v46  ;;  %v3666_v59 = vpop.f32.mrb[13].mxu1 }
 0x582   : > { %v4612_v12 = vmax.f32 %v4611_v61, %v4052_v32  ;;  %v3667_v62 = vadd.f32 %v3666_v59, %v7292_v26  ;;  %v3668_v53 = vpop.f32.mrb[14].mxu1  ;;  %v4323_v32 = vrot.slane %v4322_v25, 1 }
 0x583   : > { %v4531_v54 = vmax.f32 %v4530_v34, %v3665_v9  ;;  %v4649_v7 = vmax.f32 %v4648_v33, %v4054_v22  ;;  %v3669_v0 = vadd.f32 %v3668_v53, %v7289_v51  ;;  %v3670_v41 = vpop.f32.mrb[15].mxu1  ;;  %v4360_v9 = vrot.slane %v4359_v44, 1 }
 0x584   : > { %v4568_v55 = vmax.f32 %v4567_v42, %v3667_v62  ;;  %v3671_v5 = vadd.f32 %v3670_v41, %v7292_v26 }
 0x585   : > { %v4532_v15 = vmax.f32 %v4531_v54, %v3669_v0  ;;  %v4057_v24 = vpop.f32.mrb[28].mxu0  ;;  %v4324_v0 = vmax.f32 %v4322_v25, %v4323_v32 }
 0x586   : > { %v4569_v60 = vmax.f32 %v4568_v55, %v3671_v5  ;;  %v4058_v27 = vadd.f32 %v4057_v24, %v7229_v38  ;;  %v4059_v18 = vpop.f32.mrb[29].mxu0  ;;  %v4361_v5 = vmax.f32 %v4359_v44, %v4360_v9 }
 0x587   : > { %v4060_v13 = vadd.f32 %v4059_v18, %v7233_v46  ;;  %v4061_v50 = vpop.f32.mrb[30].mxu0 }
 0x588   : > { %v4613_v21 = vmax.f32 %v4612_v12, %v4058_v27  ;;  %v4062_v39 = vadd.f32 %v4061_v50, %v7229_v38  ;;  %v3674_v19 = vpop.f32.mrb[16].mxu1  ;;  %v4063_v43 = vpop.f32.mrb[31].mxu0 }
 0x589   : > { %v4650_v48 = vmax.f32 %v4649_v7, %v4060_v13  ;;  %v3675_v20 = vadd.f32 %v3674_v19, %v7289_v51  ;;  %v4064_v63 = vadd.f32 %v4063_v43, %v7233_v46  ;;  %v3676_v56 = vpop.f32.mrb[17].mxu1 }
 0x58a   : > { %v4614_v10 = vmax.f32 %v4613_v21, %v4062_v39  ;;  %v3677_v2 = vadd.f32 %v3676_v56, %v7292_v26  ;;  %v3678_v31 = vpop.f32.mrb[18].mxu1  ;;  %v4282_v56 = vrot.slane %v7454_v16, 4 }
 0x58b   : > { %v4533_v57 = vmax.f32 %v4532_v15, %v3675_v20  ;;  %v4651_v4 = vmax.f32 %v4650_v48, %v4064_v63  ;;  %v3679_v11 = vadd.f32 %v3678_v31, %v7289_v51  ;;  %v3680_v47 = vpop.f32.mrb[19].mxu1  ;;  %v4245_v20 = vrot.slane %v7452_v28, 4 }
 0x58c   : > { %v4615_v38 = vrot.slane %v4614_v10, 4  ;;  %v4570_v14 = vmax.f32 %v4569_v60, %v3677_v2  ;;  %v3681_v6 = vadd.f32 %v3680_v47, %v7292_v26 }
 0x58d   : > { %v4652_v35 = vrot.slane %v4651_v4, 4  ;;  %v4534_v49 = vmax.f32 %v4533_v57, %v3679_v11  ;;  %v4246_v2 = vmax.f32 %v7452_v28, %v4245_v20  ;;  %v4283_v57 = vmax.f32 %v7454_v16, %v4282_v56 }
 0x58e   : > { %v4616_v46 = vmax.f32 %v4614_v10, %v4615_v38  ;;  %v4571_v34 = vmax.f32 %v4570_v14, %v3681_v6 }
 0x58f   : > { %v4653_v42 = vmax.f32 %v4651_v4, %v4652_v35 }
 0x590   : > { %v4617_v3 = vrot.slane %v4616_v46, 2  ;;  %v3684_v36 = vpop.f32.mrb[20].mxu1 }
 0x591   : > { %v4654_v8 = vrot.slane %v4653_v42, 2  ;;  %v3685_v1 = vadd.f32 %v3684_v36, %v7289_v51  ;;  %v3686_v61 = vpop.f32.mrb[21].mxu1 }
 0x592   : > { %v4618_v30 = vmax.f32 %v4616_v46, %v4617_v3  ;;  %v3687_v58 = vadd.f32 %v3686_v61, %v7292_v26  ;;  %v3688_v33 = vpop.f32.mrb[22].mxu1  ;;  %v4284_v46 = vrot.slane %v4283_v57, 2 }
 0x593   : > { %v4655_v22 = vmax.f32 %v4653_v42, %v4654_v8  ;;  %v4535_v59 = vmax.f32 %v4534_v49, %v3685_v1  ;;  %v3689_v52 = vadd.f32 %v3688_v33, %v7289_v51  ;;  %v3690_v12 = vpop.f32.mrb[23].mxu1  ;;  %v4247_v49 = vrot.slane %v4246_v2, 2 }
 0x594   : > { %v4619_v62 = vrot.slane %v4618_v30, 1  ;;  %v4572_v53 = vmax.f32 %v4571_v34, %v3687_v58  ;;  %v3691_v45 = vadd.f32 %v3690_v12, %v7292_v26  ;;  %v4285_v36 = vmax.f32 %v4283_v57, %v4284_v46 }
 0x595   : > { %v4656_v54 = vrot.slane %v4655_v22, 1  ;;  %v4536_v7 = vmax.f32 %v4535_v59, %v3689_v52  ;;  %v4248_v42 = vmax.f32 %v4246_v2, %v4247_v49 }
 0x596   : > { %v4620_v41 = vmax.f32 %v4618_v30, %v4619_v62  ;;  %v4573_v55 = vmax.f32 %v4572_v53, %v3691_v45  ;;  %v4286_v32 = vrot.slane %v4285_v36, 1 }
 0x597   : > { %v4657_v15 = vmax.f32 %v4655_v22, %v4656_v54  ;;  %v4249_v61 = vrot.slane %v4248_v42, 1 }
 0x598   : > { %v3694_v24 = vpop.f32.mrb[24].mxu1  ;;  %v4665_v37 = vsel %vm4658_vm1, %v4324_v0, %v4620_v41  ;;  %v4287_v22 = vmax.f32 %v4285_v36, %v4286_v32 }
 0x599   : > { %v3695_v60 = vadd.f32 %v3694_v24, %v7289_v51  ;;  %v3696_v27 = vpop.f32.mrb[25].mxu1  ;;  %v4666_v18 = vsel %vm4658_vm1, %v4361_v5, %v4657_v15  ;;  %v4250_v33 = vmax.f32 %v4248_v42, %v4249_v61 }
 0x59a   : > { %v3697_v40 = vadd.f32 %v3696_v27, %v7292_v26  ;;  %v3698_v13 = vpop.f32.mrb[26].mxu1  ;;  %v4697_v50 = vcombine.low %v4665_v37, %v4666_v18 }
 0x59b   : > { %v4537_v21 = vmax.f32 %v4536_v7, %v3695_v60  ;;  %v3699_v39 = vadd.f32 %v3698_v13, %v7289_v51  ;;  %v3700_v19 = vpop.f32.mrb[27].mxu1 }
 0x59c   : > { %v4574_v43 = vmax.f32 %v4573_v55, %v3697_v40  ;;  %v3701_v48 = vadd.f32 %v3700_v19, %v7292_v26  ;;  %v4711_v45 = vrot.slane %v4697_v50, %v7307_v29 }
 0x59d   : > { %v4538_v63 = vmax.f32 %v4537_v21, %v3699_v39 }
 0x59e   : > { %v4575_v23 = vmax.f32 %v4574_v43, %v3701_v48 }
 0x5a0   : > { %v3704_v10 = vpop.f32.mrb[28].mxu1 }
 0x5a1   : > { %v3705_v31 = vadd.f32 %v3704_v10, %v7289_v51  ;;  %v3706_v17 = vpop.f32.mrb[29].mxu1 }
 0x5a2   : > { %v3707_v4 = vadd.f32 %v3706_v17, %v7292_v26  ;;  %v3708_v11 = vpop.f32.mrb[30].mxu1 }
 0x5a3   : > { %v4539_v47 = vmax.f32 %v4538_v63, %v3705_v31  ;;  %v3709_v38 = vadd.f32 %v3708_v11, %v7289_v51  ;;  %v3710_v14 = vpop.f32.mrb[31].mxu1 }
 0x5a4   : > { %v4576_v6 = vmax.f32 %v4575_v23, %v3707_v4  ;;  %v3711_v35 = vadd.f32 %v3710_v14, %v7292_v26 }
 0x5a5   : > { %v4540_v25 = vmax.f32 %v4539_v47, %v3709_v38 }
 0x5a6   : > { %v4577_v34 = vmax.f32 %v4576_v6, %v3711_v35 }
 0x5a7   : > { %v4541_v28 = vrot.slane %v4540_v25, 4 }
 0x5a8   : > { %v4578_v44 = vrot.slane %v4577_v34, 4 }
 0x5a9   : > { %v4542_v3 = vmax.f32 %v4540_v25, %v4541_v28 }
 0x5aa   : > { %v4579_v16 = vmax.f32 %v4577_v34, %v4578_v44 }
 0x5ab   : > { %v4543_v8 = vrot.slane %v4542_v3, 2 }
 0x5ac   : > { %v4580_v1 = vrot.slane %v4579_v16, 2 }
 0x5ad   : > { %v4544_v51 = vmax.f32 %v4542_v3, %v4543_v8 }
 0x5ae   : > { %v4581_v30 = vmax.f32 %v4579_v16, %v4580_v1 }
 0x5af   : > { %v4545_v58 = vrot.slane %v4544_v51, 1 }
 0x5b0   : > { %v4582_v26 = vrot.slane %v4581_v30, 1 }
 0x5b1   : > { %v4546_v9 = vmax.f32 %v4544_v51, %v4545_v58 }
 0x5b2   : > { %v4583_v59 = vmax.f32 %v4581_v30, %v4582_v26 }
 0x5b3   : > { %v4663_v52 = vsel %vm4658_vm1, %v4250_v33, %v4546_v9 }
 0x5b4   : > { %v4664_v12 = vsel %vm4658_vm1, %v4287_v22, %v4583_v59 }
 0x5b5   : > { %v4696_v62 = vcombine.low %v4663_v52, %v4664_v12 }
 0x5b7   : > { %v4704_v53 = vrot.slane %v4696_v62, %v7307_v29 }
 0x5b9   : > { %v4712_v54 = vcombine.low %v4704_v53, %v4711_v45 }
 0x5bb   : > { %4777 = vst [vmem:[%s7335_s8 + $0x8] sm:$0xff] %v4712_v54 }
 0x5bc   : > { %5273 = shalt.err (!%p5270_p5)
}
 0x5bd   : > { %s5274_s22 = scalar_lea.hbm %s7591_s17, 256  ;;  %s5278_s8 = scalar_lea.hbm %s7648_s7, 512 }
 0x5be   : > { %p5275_p6 = scmp.ne.s32.totalorder %s7591_s17, %s5274_s22  ;;  %p5279_p10 = scmp.lt.u32.totalorder %s7591_s17, %s7648_s7 }
 0x5bf   : > { %p5280_p11 = scmp.lt.u32.totalorder %s5278_s8, %s5274_s22  ;;  %p5282_p13 = scmp.lt.u32.totalorder %s5274_s22, %s7591_s17 }
 0x5c0   : > { %p5276_p7 = pnand %p5275_p6, %p5425_p4 }
 0x5c1   : > { %p5281_p12 = por %p5280_p11, %p5279_p10 }
 0x5c2   : > { %p5277_p9 = pneg %p5276_p7 }
 0x5c3   : > { %p5283_p0 = por %p5282_p13, %p5281_p12 }
 0x5c5   : > { %p5284_p1 = pnand %p5283_p0, %p5277_p9 }
 0x5c7   : > { %5287 = shalt.err (!%p5284_p1)
}
 0x5c8   : > { %5100 = dma.vmem_to_hbm [thread:$0]  (%p5425_p4), %s7593_s12, 256, %s7591_s17, %s4779_s18  }
 0x5c9 PF: > { %p5106_p2 = scmp.ge.s32.totalorder %s5338_s29, 2  ;;  %s4805_s16 = sand.u32 1, %s5318_s24  }
 0x5ca   : > { %s4806_s27 = scalar_lea.sflag [#allocation4], %s4805_s16 }
 0x5cb   : > { %p5103_p3 = pnand %p5106_p2, %p5432_p8 }
 0x5cd   : > { %5313 = dma.done.wait (!%p5103_p3), %s4806_s27, 256  }
 0x5ce   : > { %5315 = vsyncadd (!%p5103_p3), %s4806_s27, 4294967040  ;;  %s20_s29 = sadd.s32 1, %s5338_s29   ;;  %s7695_s24 = smov %s5322_s25 }
 0x5cf   : > { %p17_p5 = scmp.ge.s32.totalorder %s20_s29, 4   ;;  %s7696_s25 = smov %s5326_s26 }
 0x5d0   : > { %s7697_s26 = smov %s5438_s14  ;;  %s7698_s27 = smov %s5334_s28 }
 0x5d1   : > { %s7699_s28 = smov %s7701_s9  ;;  %19 = sbr.rel (!%p17_p5) target bundleno = 4 (0x4), region = 95 }
 0x5d8   :  { %4811 = vsyncpa [#allocation4], 1 }
 0x5d9   :  { %4813 = vsyncpa [#allocation4 + $0x1], 1 }

</bundles_post_ra>
